<compile_context>
chip_gen: v7x
topology: tpu7x:2x2x1
jax: 0.10.0
libtpu: 0.0.40
codegen_flags: <defaults>
</compile_context>

<pallas_src>
import functools

import jax
import jax.numpy as jnp
from jax.experimental import pallas as pl
from jax.experimental.pallas import tpu as pltpu


# ------------------------------ Pallas kernel --------------------------------
def _thermal_kernel(x_ref, rh_ref, cw_ref, w1_ref, b1_ref, w2_ref, b2_ref,
                    out_ref):
    # x_ref : (NB, H_in, W_in)  VMEM  raw thermal images for this grid step
    # rh_ref: (1, 3*TH, H_in)   VMEM  row-interp rows for this row tile (dy-stacked)
    # cw_ref: (W_in, 3*W)       VMEM  col-interp matrix (dx-stacked along lanes)
    # w1_ref: (16, 9)  b1_ref: (16, 1)  VMEM  conv1 weights (taps (dy,dx) row-major) / bias
    # w2_ref: (C, 16)  b2_ref: (C, 1)   VMEM  conv2 (1x1) weights / bias
    # out_ref: (NB, C, TH*W)    VMEM  channel-major output, pixel index on lanes
    nb = x_ref.shape[0]
    th = rh_ref.shape[1] // 3
    w = cw_ref.shape[1] // 3
    hw = th * w

    rh = rh_ref[0]                        # (3*TH, H_in)
    cw = cw_ref[...]                      # (W_in, 3*W)

    def flatten_rows(block):
        # (TH, W) -> (1, TH*W), row-major.
        if w % 128 == 0:
            # Lane-aligned merge: cheap, layout-friendly relayout.
            return block.reshape(1, hw)
        # Generic (small-W / demo) path: concat rows along the lane axis.
        return jnp.concatenate([block[i:i + 1, :] for i in range(th)], axis=1)

    # Resize (+ implicit conv zero-padding) -> 9-tap channel-major slab.
    slabs = []
    for img in range(nb):
        x = x_ref[img]                                                # (H_in, W_in)
        rows = jnp.dot(rh, x, preferred_element_type=jnp.float32)    # (3TH, W_in)
        taps = jnp.dot(rows, cw, preferred_element_type=jnp.float32)  # (3TH, 3W)
        slabs.append(jnp.concatenate(
            [flatten_rows(taps[dy * th:(dy + 1) * th, dx * w:(dx + 1) * w])
             for dy in range(3) for dx in range(3)], axis=0))        # (9, TH*W)
    t = slabs[0] if nb == 1 else jnp.concatenate(slabs, axis=1)      # (9, NB*TH*W)

    # conv1 (3x3, 1->16) + ReLU and conv2 (1x1, 16->C) as two MXU matmuls.
    hidden = jnp.maximum(
        jnp.dot(w1_ref[...], t, preferred_element_type=jnp.float32)
        + b1_ref[...], 0.0)                                           # (16, NB*TH*W)
    out = (jnp.dot(w2_ref[...], hidden, preferred_element_type=jnp.float32)
           + b2_ref[...])                                             # (C, NB*TH*W)

    for img in range(nb):
        out_ref[img] = out[:, img * hw:(img + 1) * hw].astype(out_ref.dtype)


# ------------------------------- Host helpers ---------------------------------
def _interp_matrix(out_size: int, in_size: int) -> jnp.ndarray:
    """PyTorch bilinear (align_corners=False) resize as a dense (out, in) matrix."""
    scale = in_size / out_size
    src = (jnp.arange(out_size, dtype=jnp.float32) + 0.5) * scale - 0.5
    src = jnp.maximum(src, 0.0)                       # PyTorch clamps low side
    i0 = jnp.minimum(jnp.floor(src).astype(jnp.int32), in_size - 1)
    i1 = jnp.minimum(i0 + 1, in_size - 1)
    frac = src - i0.astype(jnp.float32)
    return (jax.nn.one_hot(i0, in_size, dtype=jnp.float32) * (1.0 - frac)[:, None]
            + jax.nn.one_hot(i1, in_size, dtype=jnp.float32) * frac[:, None])


def _pick_image_batch(n: int) -> int:
    """Images per grid step: amortize per-step overhead at tiny sizes."""
    return max(d for d in (1, 2, 4, 8) if n % d == 0)


def _pick_row_tile(h: int, w: int, c: int, nb: int,
                   budget_bytes: int = 20 * 1024 * 1024) -> int:
    """Row tile TH so the per-step f32 working set fits VMEM (v7x: 64 MiB phys)."""
    def step_bytes(th):
        hw = th * w
        # 9-tap slab + 16 hidden + out slab + double-buffered out block + taps_all.
        return 4 * nb * (hw * (9 + 16 + 3 * c) + 9 * hw)
    if step_bytes(h) <= budget_bytes:
        return h
    cands = [d for d in range(h, 0, -1)
             if h % d == 0 and d % 8 == 0 and (d * w) % 128 == 0]
    for th in cands:
        if step_bytes(th) <= budget_bytes:
            return th
    return cands[-1] if cands else h


class ThermalProcessorPallas:
    """Deterministically-initialized JAX/Pallas port of ThermalProcessor."""

    def __init__(self, out_channels: int, key=None):
        if key is None:
            key = jax.random.PRNGKey(42)
        k1, k2, k3, k4 = jax.random.split(key, 4)
        # Conv2d(1, 16, 3): weight (16, 1, 3, 3), bias (16,)
        self.w1 = jax.random.normal(k1, (16, 1, 3, 3), jnp.float32) * 0.1
        self.b1 = jax.random.normal(k2, (16,), jnp.float32) * 0.05
        # Conv2d(16, out_channels, 1): weight (C, 16, 1, 1), bias (C,)
        self.w2 = jax.random.normal(k3, (out_channels, 16, 1, 1),
                                    jnp.float32) * 0.1
        self.b2 = jax.random.normal(k4, (out_channels,), jnp.float32) * 0.05
        self.out_channels = out_channels

        # Kernel-side layouts: conv1 taps flattened (dy, dx) row-major; biases
        # as column vectors so the MXU result gets a lane-broadcast add.
        self._w1_mat = self.w1.reshape(16, 9)                # (16, 9)
        self._b1_col = self.b1.reshape(16, 1)                # (16, 1)
        self._w2_mat = self.w2.reshape(out_channels, 16)     # (C, 16)
        self._b2_col = self.b2.reshape(out_channels, 1)      # (C, 1)

    @functools.partial(jax.jit, static_argnums=(0, 2, 3))
    def __call__(self, thermal, height: int, width: int):
        n, _, h_in, w_in = thermal.shape
        c = self.out_channels
        x = thermal[:, 0, :, :].astype(jnp.float32)           # (N, H_in, W_in)

        nb = _pick_image_batch(n)
        th = _pick_row_tile(height, width, c, nb)
        n_row = height // th

        # Interpolation matrices with the conv's zero padding folded in.
        a_h = _interp_matrix(height, h_in)                    # (H, H_in)
        a_wt = _interp_matrix(width, w_in).T                  # (W_in, W)
        a_hp = jnp.pad(a_h, ((1, 1), (0, 0)))                 # (H+2, H_in)
        a_wtp = jnp.pad(a_wt, ((0, 0), (1, 1)))               # (W_in, W+2)
        # Per row tile r: the three dy-shifted row-interp blocks stacked on
        # sublanes -> one (3*TH, H_in) matmul LHS per tile (1 dot, not 3).
        rh_tiles = jnp.stack(
            [jnp.concatenate(
                [a_hp[dy + r * th: dy + r * th + th] for dy in range(3)], axis=0)
             for r in range(n_row)], axis=0)                  # (n_row, 3*TH, H_in)
        # The three dx-shifted col-interp blocks stacked on lanes (1 dot, not 9).
        cw_cat = jnp.concatenate(
            [a_wtp[:, dx:dx + width] for dx in range(3)], axis=1)  # (W_in, 3*W)

        out_flat = pl.pallas_call(
            _thermal_kernel,
            out_shape=jax.ShapeDtypeStruct((n, c, height * width), jnp.float32),
            grid_spec=pltpu.PrefetchScalarGridSpec(
                num_scalar_prefetch=0,
                grid=(n // nb, n_row),
                in_specs=[
                    pl.BlockSpec((nb, h_in, w_in), lambda b, r: (b, 0, 0)),
                    pl.BlockSpec((1, 3 * th, h_in), lambda b, r: (r, 0, 0)),
                    pl.BlockSpec((w_in, 3 * width), lambda b, r: (0, 0)),
                    pl.BlockSpec((16, 9), lambda b, r: (0, 0)),   # w1
                    pl.BlockSpec((16, 1), lambda b, r: (0, 0)),   # b1
                    pl.BlockSpec((c, 16), lambda b, r: (0, 0)),   # w2
                    pl.BlockSpec((c, 1), lambda b, r: (0, 0)),    # b2
                ],
                out_specs=pl.BlockSpec((nb, c, th * width),
                                       lambda b, r: (b, 0, r)),
            ),
            compiler_params=pltpu.CompilerParams(
                dimension_semantics=("parallel", "parallel"),
                vmem_limit_bytes=32 * 1024 * 1024),
        )(x, rh_tiles, cw_cat, self._w1_mat, self._b1_col,
          self._w2_mat, self._b2_col)
        # Free metadata reshape back to NCHW (no HBM transpose).
        return out_flat.reshape(n, c, height, width)


# ------------------------- Pure-JAX reference (check) -------------------------
def _reference_forward(thermal, height, width, w1, b1, w2, b2):
    x = thermal.astype(jnp.float32)                           # (N, 1, H_in, W_in)
    _, _, in_h, in_w = x.shape

    def axis_coords(out_size, in_size):
        scale = in_size / out_size
        src = (jnp.arange(out_size, dtype=jnp.float32) + 0.5) * scale - 0.5
        src = jnp.maximum(src, 0.0)
        i0 = jnp.minimum(jnp.floor(src).astype(jnp.int32), in_size - 1)
        i1 = jnp.minimum(i0 + 1, in_size - 1)
        return i0, i1, src - i0.astype(jnp.float32)

    y0, y1, fy = axis_coords(height, in_h)
    x0, x1, fx = axis_coords(width, in_w)
    top, bot = x[:, :, y0, :], x[:, :, y1, :]
    rows = top * (1.0 - fy)[None, None, :, None] + bot * fy[None, None, :, None]
    left, right = rows[:, :, :, x0], rows[:, :, :, x1]
    resized = (left * (1.0 - fx)[None, None, None, :]
               + right * fx[None, None, None, :])             # (N, 1, H, W)

    hi = jax.lax.conv_general_dilated(
        resized, w1, (1, 1), "SAME",
        dimension_numbers=("NCHW", "OIHW", "NCHW"),
        precision=jax.lax.Precision.HIGHEST)
    hi = jnp.maximum(hi + b1[None, :, None, None], 0.0)
    out = jax.lax.conv_general_dilated(
        hi, w2, (1, 1), "SAME",
        dimension_numbers=("NCHW", "OIHW", "NCHW"),
        precision=jax.lax.Precision.HIGHEST)
    return out + b2[None, :, None, None]


# ---------------------------------- main --------------------------------------
if __name__ == "__main__":
    key = jax.random.PRNGKey(0)
    k_in, k_params = jax.random.split(key)

    N, H_in, W_in = 2, 8, 8
    height, width = 16, 16
    out_channels = 8

    thermal = jax.random.normal(k_in, (N, 1, H_in, W_in), jnp.float32)
    model = ThermalProcessorPallas(out_channels, key=k_params)

    out = jax.block_until_ready(model(thermal, height, width))

    assert out.shape == (N, out_channels, height, width), out.shape
    assert out.dtype == jnp.float32
    assert bool(jnp.all(jnp.isfinite(out)))

    ref = _reference_forward(thermal, height, width,
                             model.w1, model.b1, model.w2, model.b2)
    max_err = float(jnp.max(jnp.abs(out - ref)))
    assert max_err < 2e-2, f"max abs error vs reference: {max_err}"

    print("KERNEL_OK")
</pallas_src>

<mosaic_0001>
module attributes {stable_mosaic.version = 11 : i64} {
  func.func @_thermal_kernel(%arg0: i32, %arg1: i32, %arg2: memref<2x8x8xf32, #tpu.memory_space<vmem>>, %arg3: memref<1x48x8xf32, #tpu.memory_space<vmem>>, %arg4: memref<8x48xf32, #tpu.memory_space<vmem>>, %arg5: memref<16x9xf32, #tpu.memory_space<vmem>>, %arg6: memref<16x1xf32, #tpu.memory_space<vmem>>, %arg7: memref<8x16xf32, #tpu.memory_space<vmem>>, %arg8: memref<8x1xf32, #tpu.memory_space<vmem>>, %arg9: memref<2x8x256xf32, #tpu.memory_space<vmem>>) attributes {dimension_semantics = [#tpu.dimension_semantics<parallel>, #tpu.dimension_semantics<parallel>], iteration_bounds = array<i64: 1, 1>, scalar_prefetch = 0 : i64, scratch_operands = 0 : i64, tpu.core_type = #tpu.core_type<tc>, window_params = [{transform_indices = @transform_0, window_bounds = array<i64: 2, 8, 8>}, {transform_indices = @transform_1, window_bounds = array<i64: 1, 48, 8>}, {pipeline_mode = #tpu.pipeline_mode<synchronous>, transform_indices = @transform_2, window_bounds = array<i64: 8, 48>}, {pipeline_mode = #tpu.pipeline_mode<synchronous>, transform_indices = @transform_3, window_bounds = array<i64: 16, 9>}, {pipeline_mode = #tpu.pipeline_mode<synchronous>, transform_indices = @transform_4, window_bounds = array<i64: 16, 1>}, {pipeline_mode = #tpu.pipeline_mode<synchronous>, transform_indices = @transform_5, window_bounds = array<i64: 8, 16>}, {pipeline_mode = #tpu.pipeline_mode<synchronous>, transform_indices = @transform_6, window_bounds = array<i64: 8, 1>}, {transform_indices = @transform_7, window_bounds = array<i64: 2, 8, 256>}]} {
    %c0 = arith.constant 0 : index
    %c0_0 = arith.constant 0 : index
    %c0_1 = arith.constant 0 : index
    %0 = vector.load %arg3[%c0, %c0_0, %c0_1] : memref<1x48x8xf32, #tpu.memory_space<vmem>>, vector<1x48x8xf32>
    %1 = vector.shape_cast %0 : vector<1x48x8xf32> to vector<48x8xf32>
    %c0_2 = arith.constant 0 : index
    %c0_3 = arith.constant 0 : index
    %2 = vector.load %arg4[%c0_2, %c0_3] : memref<8x48xf32, #tpu.memory_space<vmem>>, vector<8x48xf32>
    %c0_4 = arith.constant 0 : index
    %c0_5 = arith.constant 0 : index
    %c0_6 = arith.constant 0 : index
    %3 = vector.load %arg2[%c0_4, %c0_5, %c0_6] : memref<2x8x8xf32, #tpu.memory_space<vmem>>, vector<1x8x8xf32>
    %4 = vector.shape_cast %3 : vector<1x8x8xf32> to vector<8x8xf32>
    %cst = arith.constant dense<0.000000e+00> : vector<48x8xf32>
    %5 = tpu.matmul %1, %4, %cst {dimension_numbers = #tpu.dot_dimension_numbers<[1], [0], [0], [1], [0, 0, 1, 1], [], []>} : vector<48x8xf32>, vector<8x8xf32>, vector<48x8xf32> -> vector<48x8xf32>
    %cst_7 = arith.constant dense<0.000000e+00> : vector<48x48xf32>
    %6 = tpu.matmul %5, %2, %cst_7 {dimension_numbers = #tpu.dot_dimension_numbers<[1], [0], [0], [1], [0, 0, 1, 1], [], []>} : vector<48x8xf32>, vector<8x48xf32>, vector<48x48xf32> -> vector<48x48xf32>
    %7 = vector.extract_strided_slice %6 {offsets = [0, 0], sizes = [16, 16], strides = [1, 1]} : vector<48x48xf32> to vector<16x16xf32>
    %8 = vector.extract_strided_slice %7 {offsets = [0, 0], sizes = [1, 16], strides = [1, 1]} : vector<16x16xf32> to vector<1x16xf32>
    %9 = vector.extract_strided_slice %7 {offsets = [1, 0], sizes = [1, 16], strides = [1, 1]} : vector<16x16xf32> to vector<1x16xf32>
    %10 = vector.extract_strided_slice %7 {offsets = [2, 0], sizes = [1, 16], strides = [1, 1]} : vector<16x16xf32> to vector<1x16xf32>
    %11 = vector.extract_strided_slice %7 {offsets = [3, 0], sizes = [1, 16], strides = [1, 1]} : vector<16x16xf32> to vector<1x16xf32>
    %12 = vector.extract_strided_slice %7 {offsets = [4, 0], sizes = [1, 16], strides = [1, 1]} : vector<16x16xf32> to vector<1x16xf32>
    %13 = vector.extract_strided_slice %7 {offsets = [5, 0], sizes = [1, 16], strides = [1, 1]} : vector<16x16xf32> to vector<1x16xf32>
    %14 = vector.extract_strided_slice %7 {offsets = [6, 0], sizes = [1, 16], strides = [1, 1]} : vector<16x16xf32> to vector<1x16xf32>
    %15 = vector.extract_strided_slice %7 {offsets = [7, 0], sizes = [1, 16], strides = [1, 1]} : vector<16x16xf32> to vector<1x16xf32>
    %16 = vector.extract_strided_slice %7 {offsets = [8, 0], sizes = [1, 16], strides = [1, 1]} : vector<16x16xf32> to vector<1x16xf32>
    %17 = vector.extract_strided_slice %7 {offsets = [9, 0], sizes = [1, 16], strides = [1, 1]} : vector<16x16xf32> to vector<1x16xf32>
    %18 = vector.extract_strided_slice %7 {offsets = [10, 0], sizes = [1, 16], strides = [1, 1]} : vector<16x16xf32> to vector<1x16xf32>
    %19 = vector.extract_strided_slice %7 {offsets = [11, 0], sizes = [1, 16], strides = [1, 1]} : vector<16x16xf32> to vector<1x16xf32>
    %20 = vector.extract_strided_slice %7 {offsets = [12, 0], sizes = [1, 16], strides = [1, 1]} : vector<16x16xf32> to vector<1x16xf32>
    %21 = vector.extract_strided_slice %7 {offsets = [13, 0], sizes = [1, 16], strides = [1, 1]} : vector<16x16xf32> to vector<1x16xf32>
    %22 = vector.extract_strided_slice %7 {offsets = [14, 0], sizes = [1, 16], strides = [1, 1]} : vector<16x16xf32> to vector<1x16xf32>
    %23 = vector.extract_strided_slice %7 {offsets = [15, 0], sizes = [1, 16], strides = [1, 1]} : vector<16x16xf32> to vector<1x16xf32>
    %24 = tpu.concatenate %8, %9, %10, %11, %12, %13, %14, %15, %16, %17, %18, %19, %20, %21, %22, %23 in 1 : vector<1x16xf32>, vector<1x16xf32>, vector<1x16xf32>, vector<1x16xf32>, vector<1x16xf32>, vector<1x16xf32>, vector<1x16xf32>, vector<1x16xf32>, vector<1x16xf32>, vector<1x16xf32>, vector<1x16xf32>, vector<1x16xf32>, vector<1x16xf32>, vector<1x16xf32>, vector<1x16xf32>, vector<1x16xf32> -> vector<1x256xf32>
    %25 = vector.extract_strided_slice %6 {offsets = [0, 16], sizes = [16, 16], strides = [1, 1]} : vector<48x48xf32> to vector<16x16xf32>
    %26 = vector.extract_strided_slice %25 {offsets = [0, 0], sizes = [1, 16], strides = [1, 1]} : vector<16x16xf32> to vector<1x16xf32>
    %27 = vector.extract_strided_slice %25 {offsets = [1, 0], sizes = [1, 16], strides = [1, 1]} : vector<16x16xf32> to vector<1x16xf32>
    %28 = vector.extract_strided_slice %25 {offsets = [2, 0], sizes = [1, 16], strides = [1, 1]} : vector<16x16xf32> to vector<1x16xf32>
    %29 = vector.extract_strided_slice %25 {offsets = [3, 0], sizes = [1, 16], strides = [1, 1]} : vector<16x16xf32> to vector<1x16xf32>
    %30 = vector.extract_strided_slice %25 {offsets = [4, 0], sizes = [1, 16], strides = [1, 1]} : vector<16x16xf32> to vector<1x16xf32>
    %31 = vector.extract_strided_slice %25 {offsets = [5, 0], sizes = [1, 16], strides = [1, 1]} : vector<16x16xf32> to vector<1x16xf32>
    %32 = vector.extract_strided_slice %25 {offsets = [6, 0], sizes = [1, 16], strides = [1, 1]} : vector<16x16xf32> to vector<1x16xf32>
    %33 = vector.extract_strided_slice %25 {offsets = [7, 0], sizes = [1, 16], strides = [1, 1]} : vector<16x16xf32> to vector<1x16xf32>
    %34 = vector.extract_strided_slice %25 {offsets = [8, 0], sizes = [1, 16], strides = [1, 1]} : vector<16x16xf32> to vector<1x16xf32>
    %35 = vector.extract_strided_slice %25 {offsets = [9, 0], sizes = [1, 16], strides = [1, 1]} : vector<16x16xf32> to vector<1x16xf32>
    %36 = vector.extract_strided_slice %25 {offsets = [10, 0], sizes = [1, 16], strides = [1, 1]} : vector<16x16xf32> to vector<1x16xf32>
    %37 = vector.extract_strided_slice %25 {offsets = [11, 0], sizes = [1, 16], strides = [1, 1]} : vector<16x16xf32> to vector<1x16xf32>
    %38 = vector.extract_strided_slice %25 {offsets = [12, 0], sizes = [1, 16], strides = [1, 1]} : vector<16x16xf32> to vector<1x16xf32>
    %39 = vector.extract_strided_slice %25 {offsets = [13, 0], sizes = [1, 16], strides = [1, 1]} : vector<16x16xf32> to vector<1x16xf32>
    %40 = vector.extract_strided_slice %25 {offsets = [14, 0], sizes = [1, 16], strides = [1, 1]} : vector<16x16xf32> to vector<1x16xf32>
    %41 = vector.extract_strided_slice %25 {offsets = [15, 0], sizes = [1, 16], strides = [1, 1]} : vector<16x16xf32> to vector<1x16xf32>
    %42 = tpu.concatenate %26, %27, %28, %29, %30, %31, %32, %33, %34, %35, %36, %37, %38, %39, %40, %41 in 1 : vector<1x16xf32>, vector<1x16xf32>, vector<1x16xf32>, vector<1x16xf32>, vector<1x16xf32>, vector<1x16xf32>, vector<1x16xf32>, vector<1x16xf32>, vector<1x16xf32>, vector<1x16xf32>, vector<1x16xf32>, vector<1x16xf32>, vector<1x16xf32>, vector<1x16xf32>, vector<1x16xf32>, vector<1x16xf32> -> vector<1x256xf32>
    %43 = vector.extract_strided_slice %6 {offsets = [0, 32], sizes = [16, 16], strides = [1, 1]} : vector<48x48xf32> to vector<16x16xf32>
    %44 = vector.extract_strided_slice %43 {offsets = [0, 0], sizes = [1, 16], strides = [1, 1]} : vector<16x16xf32> to vector<1x16xf32>
    %45 = vector.extract_strided_slice %43 {offsets = [1, 0], sizes = [1, 16], strides = [1, 1]} : vector<16x16xf32> to vector<1x16xf32>
    %46 = vector.extract_strided_slice %43 {offsets = [2, 0], sizes = [1, 16], strides = [1, 1]} : vector<16x16xf32> to vector<1x16xf32>
    %47 = vector.extract_strided_slice %43 {offsets = [3, 0], sizes = [1, 16], strides = [1, 1]} : vector<16x16xf32> to vector<1x16xf32>
    %48 = vector.extract_strided_slice %43 {offsets = [4, 0], sizes = [1, 16], strides = [1, 1]} : vector<16x16xf32> to vector<1x16xf32>
    %49 = vector.extract_strided_slice %43 {offsets = [5, 0], sizes = [1, 16], strides = [1, 1]} : vector<16x16xf32> to vector<1x16xf32>
    %50 = vector.extract_strided_slice %43 {offsets = [6, 0], sizes = [1, 16], strides = [1, 1]} : vector<16x16xf32> to vector<1x16xf32>
    %51 = vector.extract_strided_slice %43 {offsets = [7, 0], sizes = [1, 16], strides = [1, 1]} : vector<16x16xf32> to vector<1x16xf32>
    %52 = vector.extract_strided_slice %43 {offsets = [8, 0], sizes = [1, 16], strides = [1, 1]} : vector<16x16xf32> to vector<1x16xf32>
    %53 = vector.extract_strided_slice %43 {offsets = [9, 0], sizes = [1, 16], strides = [1, 1]} : vector<16x16xf32> to vector<1x16xf32>
    %54 = vector.extract_strided_slice %43 {offsets = [10, 0], sizes = [1, 16], strides = [1, 1]} : vector<16x16xf32> to vector<1x16xf32>
    %55 = vector.extract_strided_slice %43 {offsets = [11, 0], sizes = [1, 16], strides = [1, 1]} : vector<16x16xf32> to vector<1x16xf32>
    %56 = vector.extract_strided_slice %43 {offsets = [12, 0], sizes = [1, 16], strides = [1, 1]} : vector<16x16xf32> to vector<1x16xf32>
    %57 = vector.extract_strided_slice %43 {offsets = [13, 0], sizes = [1, 16], strides = [1, 1]} : vector<16x16xf32> to vector<1x16xf32>
    %58 = vector.extract_strided_slice %43 {offsets = [14, 0], sizes = [1, 16], strides = [1, 1]} : vector<16x16xf32> to vector<1x16xf32>
    %59 = vector.extract_strided_slice %43 {offsets = [15, 0], sizes = [1, 16], strides = [1, 1]} : vector<16x16xf32> to vector<1x16xf32>
    %60 = tpu.concatenate %44, %45, %46, %47, %48, %49, %50, %51, %52, %53, %54, %55, %56, %57, %58, %59 in 1 : vector<1x16xf32>, vector<1x16xf32>, vector<1x16xf32>, vector<1x16xf32>, vector<1x16xf32>, vector<1x16xf32>, vector<1x16xf32>, vector<1x16xf32>, vector<1x16xf32>, vector<1x16xf32>, vector<1x16xf32>, vector<1x16xf32>, vector<1x16xf32>, vector<1x16xf32>, vector<1x16xf32>, vector<1x16xf32> -> vector<1x256xf32>
    %61 = vector.extract_strided_slice %6 {offsets = [16, 0], sizes = [16, 16], strides = [1, 1]} : vector<48x48xf32> to vector<16x16xf32>
    %62 = vector.extract_strided_slice %61 {offsets = [0, 0], sizes = [1, 16], strides = [1, 1]} : vector<16x16xf32> to vector<1x16xf32>
    %63 = vector.extract_strided_slice %61 {offsets = [1, 0], sizes = [1, 16], strides = [1, 1]} : vector<16x16xf32> to vector<1x16xf32>
    %64 = vector.extract_strided_slice %61 {offsets = [2, 0], sizes = [1, 16], strides = [1, 1]} : vector<16x16xf32> to vector<1x16xf32>
    %65 = vector.extract_strided_slice %61 {offsets = [3, 0], sizes = [1, 16], strides = [1, 1]} : vector<16x16xf32> to vector<1x16xf32>
    %66 = vector.extract_strided_slice %61 {offsets = [4, 0], sizes = [1, 16], strides = [1, 1]} : vector<16x16xf32> to vector<1x16xf32>
    %67 = vector.extract_strided_slice %61 {offsets = [5, 0], sizes = [1, 16], strides = [1, 1]} : vector<16x16xf32> to vector<1x16xf32>
    %68 = vector.extract_strided_slice %61 {offsets = [6, 0], sizes = [1, 16], strides = [1, 1]} : vector<16x16xf32> to vector<1x16xf32>
    %69 = vector.extract_strided_slice %61 {offsets = [7, 0], sizes = [1, 16], strides = [1, 1]} : vector<16x16xf32> to vector<1x16xf32>
    %70 = vector.extract_strided_slice %61 {offsets = [8, 0], sizes = [1, 16], strides = [1, 1]} : vector<16x16xf32> to vector<1x16xf32>
    %71 = vector.extract_strided_slice %61 {offsets = [9, 0], sizes = [1, 16], strides = [1, 1]} : vector<16x16xf32> to vector<1x16xf32>
    %72 = vector.extract_strided_slice %61 {offsets = [10, 0], sizes = [1, 16], strides = [1, 1]} : vector<16x16xf32> to vector<1x16xf32>
    %73 = vector.extract_strided_slice %61 {offsets = [11, 0], sizes = [1, 16], strides = [1, 1]} : vector<16x16xf32> to vector<1x16xf32>
    %74 = vector.extract_strided_slice %61 {offsets = [12, 0], sizes = [1, 16], strides = [1, 1]} : vector<16x16xf32> to vector<1x16xf32>
    %75 = vector.extract_strided_slice %61 {offsets = [13, 0], sizes = [1, 16], strides = [1, 1]} : vector<16x16xf32> to vector<1x16xf32>
    %76 = vector.extract_strided_slice %61 {offsets = [14, 0], sizes = [1, 16], strides = [1, 1]} : vector<16x16xf32> to vector<1x16xf32>
    %77 = vector.extract_strided_slice %61 {offsets = [15, 0], sizes = [1, 16], strides = [1, 1]} : vector<16x16xf32> to vector<1x16xf32>
    %78 = tpu.concatenate %62, %63, %64, %65, %66, %67, %68, %69, %70, %71, %72, %73, %74, %75, %76, %77 in 1 : vector<1x16xf32>, vector<1x16xf32>, vector<1x16xf32>, vector<1x16xf32>, vector<1x16xf32>, vector<1x16xf32>, vector<1x16xf32>, vector<1x16xf32>, vector<1x16xf32>, vector<1x16xf32>, vector<1x16xf32>, vector<1x16xf32>, vector<1x16xf32>, vector<1x16xf32>, vector<1x16xf32>, vector<1x16xf32> -> vector<1x256xf32>
    %79 = vector.extract_strided_slice %6 {offsets = [16, 16], sizes = [16, 16], strides = [1, 1]} : vector<48x48xf32> to vector<16x16xf32>
    %80 = vector.extract_strided_slice %79 {offsets = [0, 0], sizes = [1, 16], strides = [1, 1]} : vector<16x16xf32> to vector<1x16xf32>
    %81 = vector.extract_strided_slice %79 {offsets = [1, 0], sizes = [1, 16], strides = [1, 1]} : vector<16x16xf32> to vector<1x16xf32>
    %82 = vector.extract_strided_slice %79 {offsets = [2, 0], sizes = [1, 16], strides = [1, 1]} : vector<16x16xf32> to vector<1x16xf32>
    %83 = vector.extract_strided_slice %79 {offsets = [3, 0], sizes = [1, 16], strides = [1, 1]} : vector<16x16xf32> to vector<1x16xf32>
    %84 = vector.extract_strided_slice %79 {offsets = [4, 0], sizes = [1, 16], strides = [1, 1]} : vector<16x16xf32> to vector<1x16xf32>
    %85 = vector.extract_strided_slice %79 {offsets = [5, 0], sizes = [1, 16], strides = [1, 1]} : vector<16x16xf32> to vector<1x16xf32>
    %86 = vector.extract_strided_slice %79 {offsets = [6, 0], sizes = [1, 16], strides = [1, 1]} : vector<16x16xf32> to vector<1x16xf32>
    %87 = vector.extract_strided_slice %79 {offsets = [7, 0], sizes = [1, 16], strides = [1, 1]} : vector<16x16xf32> to vector<1x16xf32>
    %88 = vector.extract_strided_slice %79 {offsets = [8, 0], sizes = [1, 16], strides = [1, 1]} : vector<16x16xf32> to vector<1x16xf32>
    %89 = vector.extract_strided_slice %79 {offsets = [9, 0], sizes = [1, 16], strides = [1, 1]} : vector<16x16xf32> to vector<1x16xf32>
    %90 = vector.extract_strided_slice %79 {offsets = [10, 0], sizes = [1, 16], strides = [1, 1]} : vector<16x16xf32> to vector<1x16xf32>
    %91 = vector.extract_strided_slice %79 {offsets = [11, 0], sizes = [1, 16], strides = [1, 1]} : vector<16x16xf32> to vector<1x16xf32>
    %92 = vector.extract_strided_slice %79 {offsets = [12, 0], sizes = [1, 16], strides = [1, 1]} : vector<16x16xf32> to vector<1x16xf32>
    %93 = vector.extract_strided_slice %79 {offsets = [13, 0], sizes = [1, 16], strides = [1, 1]} : vector<16x16xf32> to vector<1x16xf32>
    %94 = vector.extract_strided_slice %79 {offsets = [14, 0], sizes = [1, 16], strides = [1, 1]} : vector<16x16xf32> to vector<1x16xf32>
    %95 = vector.extract_strided_slice %79 {offsets = [15, 0], sizes = [1, 16], strides = [1, 1]} : vector<16x16xf32> to vector<1x16xf32>
    %96 = tpu.concatenate %80, %81, %82, %83, %84, %85, %86, %87, %88, %89, %90, %91, %92, %93, %94, %95 in 1 : vector<1x16xf32>, vector<1x16xf32>, vector<1x16xf32>, vector<1x16xf32>, vector<1x16xf32>, vector<1x16xf32>, vector<1x16xf32>, vector<1x16xf32>, vector<1x16xf32>, vector<1x16xf32>, vector<1x16xf32>, vector<1x16xf32>, vector<1x16xf32>, vector<1x16xf32>, vector<1x16xf32>, vector<1x16xf32> -> vector<1x256xf32>
    %97 = vector.extract_strided_slice %6 {offsets = [16, 32], sizes = [16, 16], strides = [1, 1]} : vector<48x48xf32> to vector<16x16xf32>
    %98 = vector.extract_strided_slice %97 {offsets = [0, 0], sizes = [1, 16], strides = [1, 1]} : vector<16x16xf32> to vector<1x16xf32>
    %99 = vector.extract_strided_slice %97 {offsets = [1, 0], sizes = [1, 16], strides = [1, 1]} : vector<16x16xf32> to vector<1x16xf32>
    %100 = vector.extract_strided_slice %97 {offsets = [2, 0], sizes = [1, 16], strides = [1, 1]} : vector<16x16xf32> to vector<1x16xf32>
    %101 = vector.extract_strided_slice %97 {offsets = [3, 0], sizes = [1, 16], strides = [1, 1]} : vector<16x16xf32> to vector<1x16xf32>
    %102 = vector.extract_strided_slice %97 {offsets = [4, 0], sizes = [1, 16], strides = [1, 1]} : vector<16x16xf32> to vector<1x16xf32>
    %103 = vector.extract_strided_slice %97 {offsets = [5, 0], sizes = [1, 16], strides = [1, 1]} : vector<16x16xf32> to vector<1x16xf32>
    %104 = vector.extract_strided_slice %97 {offsets = [6, 0], sizes = [1, 16], strides = [1, 1]} : vector<16x16xf32> to vector<1x16xf32>
    %105 = vector.extract_strided_slice %97 {offsets = [7, 0], sizes = [1, 16], strides = [1, 1]} : vector<16x16xf32> to vector<1x16xf32>
    %106 = vector.extract_strided_slice %97 {offsets = [8, 0], sizes = [1, 16], strides = [1, 1]} : vector<16x16xf32> to vector<1x16xf32>
    %107 = vector.extract_strided_slice %97 {offsets = [9, 0], sizes = [1, 16], strides = [1, 1]} : vector<16x16xf32> to vector<1x16xf32>
    %108 = vector.extract_strided_slice %97 {offsets = [10, 0], sizes = [1, 16], strides = [1, 1]} : vector<16x16xf32> to vector<1x16xf32>
    %109 = vector.extract_strided_slice %97 {offsets = [11, 0], sizes = [1, 16], strides = [1, 1]} : vector<16x16xf32> to vector<1x16xf32>
    %110 = vector.extract_strided_slice %97 {offsets = [12, 0], sizes = [1, 16], strides = [1, 1]} : vector<16x16xf32> to vector<1x16xf32>
    %111 = vector.extract_strided_slice %97 {offsets = [13, 0], sizes = [1, 16], strides = [1, 1]} : vector<16x16xf32> to vector<1x16xf32>
    %112 = vector.extract_strided_slice %97 {offsets = [14, 0], sizes = [1, 16], strides = [1, 1]} : vector<16x16xf32> to vector<1x16xf32>
    %113 = vector.extract_strided_slice %97 {offsets = [15, 0], sizes = [1, 16], strides = [1, 1]} : vector<16x16xf32> to vector<1x16xf32>
    %114 = tpu.concatenate %98, %99, %100, %101, %102, %103, %104, %105, %106, %107, %108, %109, %110, %111, %112, %113 in 1 : vector<1x16xf32>, vector<1x16xf32>, vector<1x16xf32>, vector<1x16xf32>, vector<1x16xf32>, vector<1x16xf32>, vector<1x16xf32>, vector<1x16xf32>, vector<1x16xf32>, vector<1x16xf32>, vector<1x16xf32>, vector<1x16xf32>, vector<1x16xf32>, vector<1x16xf32>, vector<1x16xf32>, vector<1x16xf32> -> vector<1x256xf32>
    %115 = vector.extract_strided_slice %6 {offsets = [32, 0], sizes = [16, 16], strides = [1, 1]} : vector<48x48xf32> to vector<16x16xf32>
    %116 = vector.extract_strided_slice %115 {offsets = [0, 0], sizes = [1, 16], strides = [1, 1]} : vector<16x16xf32> to vector<1x16xf32>
    %117 = vector.extract_strided_slice %115 {offsets = [1, 0], sizes = [1, 16], strides = [1, 1]} : vector<16x16xf32> to vector<1x16xf32>
    %118 = vector.extract_strided_slice %115 {offsets = [2, 0], sizes = [1, 16], strides = [1, 1]} : vector<16x16xf32> to vector<1x16xf32>
    %119 = vector.extract_strided_slice %115 {offsets = [3, 0], sizes = [1, 16], strides = [1, 1]} : vector<16x16xf32> to vector<1x16xf32>
    %120 = vector.extract_strided_slice %115 {offsets = [4, 0], sizes = [1, 16], strides = [1, 1]} : vector<16x16xf32> to vector<1x16xf32>
    %121 = vector.extract_strided_slice %115 {offsets = [5, 0], sizes = [1, 16], strides = [1, 1]} : vector<16x16xf32> to vector<1x16xf32>
    %122 = vector.extract_strided_slice %115 {offsets = [6, 0], sizes = [1, 16], strides = [1, 1]} : vector<16x16xf32> to vector<1x16xf32>
    %123 = vector.extract_strided_slice %115 {offsets = [7, 0], sizes = [1, 16], strides = [1, 1]} : vector<16x16xf32> to vector<1x16xf32>
    %124 = vector.extract_strided_slice %115 {offsets = [8, 0], sizes = [1, 16], strides = [1, 1]} : vector<16x16xf32> to vector<1x16xf32>
    %125 = vector.extract_strided_slice %115 {offsets = [9, 0], sizes = [1, 16], strides = [1, 1]} : vector<16x16xf32> to vector<1x16xf32>
    %126 = vector.extract_strided_slice %115 {offsets = [10, 0], sizes = [1, 16], strides = [1, 1]} : vector<16x16xf32> to vector<1x16xf32>
    %127 = vector.extract_strided_slice %115 {offsets = [11, 0], sizes = [1, 16], strides = [1, 1]} : vector<16x16xf32> to vector<1x16xf32>
    %128 = vector.extract_strided_slice %115 {offsets = [12, 0], sizes = [1, 16], strides = [1, 1]} : vector<16x16xf32> to vector<1x16xf32>
    %129 = vector.extract_strided_slice %115 {offsets = [13, 0], sizes = [1, 16], strides = [1, 1]} : vector<16x16xf32> to vector<1x16xf32>
    %130 = vector.extract_strided_slice %115 {offsets = [14, 0], sizes = [1, 16], strides = [1, 1]} : vector<16x16xf32> to vector<1x16xf32>
    %131 = vector.extract_strided_slice %115 {offsets = [15, 0], sizes = [1, 16], strides = [1, 1]} : vector<16x16xf32> to vector<1x16xf32>
    %132 = tpu.concatenate %116, %117, %118, %119, %120, %121, %122, %123, %124, %125, %126, %127, %128, %129, %130, %131 in 1 : vector<1x16xf32>, vector<1x16xf32>, vector<1x16xf32>, vector<1x16xf32>, vector<1x16xf32>, vector<1x16xf32>, vector<1x16xf32>, vector<1x16xf32>, vector<1x16xf32>, vector<1x16xf32>, vector<1x16xf32>, vector<1x16xf32>, vector<1x16xf32>, vector<1x16xf32>, vector<1x16xf32>, vector<1x16xf32> -> vector<1x256xf32>
    %133 = vector.extract_strided_slice %6 {offsets = [32, 16], sizes = [16, 16], strides = [1, 1]} : vector<48x48xf32> to vector<16x16xf32>
    %134 = vector.extract_strided_slice %133 {offsets = [0, 0], sizes = [1, 16], strides = [1, 1]} : vector<16x16xf32> to vector<1x16xf32>
    %135 = vector.extract_strided_slice %133 {offsets = [1, 0], sizes = [1, 16], strides = [1, 1]} : vector<16x16xf32> to vector<1x16xf32>
    %136 = vector.extract_strided_slice %133 {offsets = [2, 0], sizes = [1, 16], strides = [1, 1]} : vector<16x16xf32> to vector<1x16xf32>
    %137 = vector.extract_strided_slice %133 {offsets = [3, 0], sizes = [1, 16], strides = [1, 1]} : vector<16x16xf32> to vector<1x16xf32>
    %138 = vector.extract_strided_slice %133 {offsets = [4, 0], sizes = [1, 16], strides = [1, 1]} : vector<16x16xf32> to vector<1x16xf32>
    %139 = vector.extract_strided_slice %133 {offsets = [5, 0], sizes = [1, 16], strides = [1, 1]} : vector<16x16xf32> to vector<1x16xf32>
    %140 = vector.extract_strided_slice %133 {offsets = [6, 0], sizes = [1, 16], strides = [1, 1]} : vector<16x16xf32> to vector<1x16xf32>
    %141 = vector.extract_strided_slice %133 {offsets = [7, 0], sizes = [1, 16], strides = [1, 1]} : vector<16x16xf32> to vector<1x16xf32>
    %142 = vector.extract_strided_slice %133 {offsets = [8, 0], sizes = [1, 16], strides = [1, 1]} : vector<16x16xf32> to vector<1x16xf32>
    %143 = vector.extract_strided_slice %133 {offsets = [9, 0], sizes = [1, 16], strides = [1, 1]} : vector<16x16xf32> to vector<1x16xf32>
    %144 = vector.extract_strided_slice %133 {offsets = [10, 0], sizes = [1, 16], strides = [1, 1]} : vector<16x16xf32> to vector<1x16xf32>
    %145 = vector.extract_strided_slice %133 {offsets = [11, 0], sizes = [1, 16], strides = [1, 1]} : vector<16x16xf32> to vector<1x16xf32>
    %146 = vector.extract_strided_slice %133 {offsets = [12, 0], sizes = [1, 16], strides = [1, 1]} : vector<16x16xf32> to vector<1x16xf32>
    %147 = vector.extract_strided_slice %133 {offsets = [13, 0], sizes = [1, 16], strides = [1, 1]} : vector<16x16xf32> to vector<1x16xf32>
    %148 = vector.extract_strided_slice %133 {offsets = [14, 0], sizes = [1, 16], strides = [1, 1]} : vector<16x16xf32> to vector<1x16xf32>
    %149 = vector.extract_strided_slice %133 {offsets = [15, 0], sizes = [1, 16], strides = [1, 1]} : vector<16x16xf32> to vector<1x16xf32>
    %150 = tpu.concatenate %134, %135, %136, %137, %138, %139, %140, %141, %142, %143, %144, %145, %146, %147, %148, %149 in 1 : vector<1x16xf32>, vector<1x16xf32>, vector<1x16xf32>, vector<1x16xf32>, vector<1x16xf32>, vector<1x16xf32>, vector<1x16xf32>, vector<1x16xf32>, vector<1x16xf32>, vector<1x16xf32>, vector<1x16xf32>, vector<1x16xf32>, vector<1x16xf32>, vector<1x16xf32>, vector<1x16xf32>, vector<1x16xf32> -> vector<1x256xf32>
    %151 = vector.extract_strided_slice %6 {offsets = [32, 32], sizes = [16, 16], strides = [1, 1]} : vector<48x48xf32> to vector<16x16xf32>
    %152 = vector.extract_strided_slice %151 {offsets = [0, 0], sizes = [1, 16], strides = [1, 1]} : vector<16x16xf32> to vector<1x16xf32>
    %153 = vector.extract_strided_slice %151 {offsets = [1, 0], sizes = [1, 16], strides = [1, 1]} : vector<16x16xf32> to vector<1x16xf32>
    %154 = vector.extract_strided_slice %151 {offsets = [2, 0], sizes = [1, 16], strides = [1, 1]} : vector<16x16xf32> to vector<1x16xf32>
    %155 = vector.extract_strided_slice %151 {offsets = [3, 0], sizes = [1, 16], strides = [1, 1]} : vector<16x16xf32> to vector<1x16xf32>
    %156 = vector.extract_strided_slice %151 {offsets = [4, 0], sizes = [1, 16], strides = [1, 1]} : vector<16x16xf32> to vector<1x16xf32>
    %157 = vector.extract_strided_slice %151 {offsets = [5, 0], sizes = [1, 16], strides = [1, 1]} : vector<16x16xf32> to vector<1x16xf32>
    %158 = vector.extract_strided_slice %151 {offsets = [6, 0], sizes = [1, 16], strides = [1, 1]} : vector<16x16xf32> to vector<1x16xf32>
    %159 = vector.extract_strided_slice %151 {offsets = [7, 0], sizes = [1, 16], strides = [1, 1]} : vector<16x16xf32> to vector<1x16xf32>
    %160 = vector.extract_strided_slice %151 {offsets = [8, 0], sizes = [1, 16], strides = [1, 1]} : vector<16x16xf32> to vector<1x16xf32>
    %161 = vector.extract_strided_slice %151 {offsets = [9, 0], sizes = [1, 16], strides = [1, 1]} : vector<16x16xf32> to vector<1x16xf32>
    %162 = vector.extract_strided_slice %151 {offsets = [10, 0], sizes = [1, 16], strides = [1, 1]} : vector<16x16xf32> to vector<1x16xf32>
    %163 = vector.extract_strided_slice %151 {offsets = [11, 0], sizes = [1, 16], strides = [1, 1]} : vector<16x16xf32> to vector<1x16xf32>
    %164 = vector.extract_strided_slice %151 {offsets = [12, 0], sizes = [1, 16], strides = [1, 1]} : vector<16x16xf32> to vector<1x16xf32>
    %165 = vector.extract_strided_slice %151 {offsets = [13, 0], sizes = [1, 16], strides = [1, 1]} : vector<16x16xf32> to vector<1x16xf32>
    %166 = vector.extract_strided_slice %151 {offsets = [14, 0], sizes = [1, 16], strides = [1, 1]} : vector<16x16xf32> to vector<1x16xf32>
    %167 = vector.extract_strided_slice %151 {offsets = [15, 0], sizes = [1, 16], strides = [1, 1]} : vector<16x16xf32> to vector<1x16xf32>
    %168 = tpu.concatenate %152, %153, %154, %155, %156, %157, %158, %159, %160, %161, %162, %163, %164, %165, %166, %167 in 1 : vector<1x16xf32>, vector<1x16xf32>, vector<1x16xf32>, vector<1x16xf32>, vector<1x16xf32>, vector<1x16xf32>, vector<1x16xf32>, vector<1x16xf32>, vector<1x16xf32>, vector<1x16xf32>, vector<1x16xf32>, vector<1x16xf32>, vector<1x16xf32>, vector<1x16xf32>, vector<1x16xf32>, vector<1x16xf32> -> vector<1x256xf32>
    %169 = tpu.concatenate %24, %42, %60, %78, %96, %114, %132, %150, %168 in 0 : vector<1x256xf32>, vector<1x256xf32>, vector<1x256xf32>, vector<1x256xf32>, vector<1x256xf32>, vector<1x256xf32>, vector<1x256xf32>, vector<1x256xf32>, vector<1x256xf32> -> vector<9x256xf32>
    %c1 = arith.constant 1 : index
    %c0_8 = arith.constant 0 : index
    %c0_9 = arith.constant 0 : index
    %170 = vector.load %arg2[%c1, %c0_8, %c0_9] : memref<2x8x8xf32, #tpu.memory_space<vmem>>, vector<1x8x8xf32>
    %171 = vector.shape_cast %170 : vector<1x8x8xf32> to vector<8x8xf32>
    %cst_10 = arith.constant dense<0.000000e+00> : vector<48x8xf32>
    %172 = tpu.matmul %1, %171, %cst_10 {dimension_numbers = #tpu.dot_dimension_numbers<[1], [0], [0], [1], [0, 0, 1, 1], [], []>} : vector<48x8xf32>, vector<8x8xf32>, vector<48x8xf32> -> vector<48x8xf32>
    %cst_11 = arith.constant dense<0.000000e+00> : vector<48x48xf32>
    %173 = tpu.matmul %172, %2, %cst_11 {dimension_numbers = #tpu.dot_dimension_numbers<[1], [0], [0], [1], [0, 0, 1, 1], [], []>} : vector<48x8xf32>, vector<8x48xf32>, vector<48x48xf32> -> vector<48x48xf32>
    %174 = vector.extract_strided_slice %173 {offsets = [0, 0], sizes = [16, 16], strides = [1, 1]} : vector<48x48xf32> to vector<16x16xf32>
    %175 = vector.extract_strided_slice %174 {offsets = [0, 0], sizes = [1, 16], strides = [1, 1]} : vector<16x16xf32> to vector<1x16xf32>
    %176 = vector.extract_strided_slice %174 {offsets = [1, 0], sizes = [1, 16], strides = [1, 1]} : vector<16x16xf32> to vector<1x16xf32>
    %177 = vector.extract_strided_slice %174 {offsets = [2, 0], sizes = [1, 16], strides = [1, 1]} : vector<16x16xf32> to vector<1x16xf32>
    %178 = vector.extract_strided_slice %174 {offsets = [3, 0], sizes = [1, 16], strides = [1, 1]} : vector<16x16xf32> to vector<1x16xf32>
    %179 = vector.extract_strided_slice %174 {offsets = [4, 0], sizes = [1, 16], strides = [1, 1]} : vector<16x16xf32> to vector<1x16xf32>
    %180 = vector.extract_strided_slice %174 {offsets = [5, 0], sizes = [1, 16], strides = [1, 1]} : vector<16x16xf32> to vector<1x16xf32>
    %181 = vector.extract_strided_slice %174 {offsets = [6, 0], sizes = [1, 16], strides = [1, 1]} : vector<16x16xf32> to vector<1x16xf32>
    %182 = vector.extract_strided_slice %174 {offsets = [7, 0], sizes = [1, 16], strides = [1, 1]} : vector<16x16xf32> to vector<1x16xf32>
    %183 = vector.extract_strided_slice %174 {offsets = [8, 0], sizes = [1, 16], strides = [1, 1]} : vector<16x16xf32> to vector<1x16xf32>
    %184 = vector.extract_strided_slice %174 {offsets = [9, 0], sizes = [1, 16], strides = [1, 1]} : vector<16x16xf32> to vector<1x16xf32>
    %185 = vector.extract_strided_slice %174 {offsets = [10, 0], sizes = [1, 16], strides = [1, 1]} : vector<16x16xf32> to vector<1x16xf32>
    %186 = vector.extract_strided_slice %174 {offsets = [11, 0], sizes = [1, 16], strides = [1, 1]} : vector<16x16xf32> to vector<1x16xf32>
    %187 = vector.extract_strided_slice %174 {offsets = [12, 0], sizes = [1, 16], strides = [1, 1]} : vector<16x16xf32> to vector<1x16xf32>
    %188 = vector.extract_strided_slice %174 {offsets = [13, 0], sizes = [1, 16], strides = [1, 1]} : vector<16x16xf32> to vector<1x16xf32>
    %189 = vector.extract_strided_slice %174 {offsets = [14, 0], sizes = [1, 16], strides = [1, 1]} : vector<16x16xf32> to vector<1x16xf32>
    %190 = vector.extract_strided_slice %174 {offsets = [15, 0], sizes = [1, 16], strides = [1, 1]} : vector<16x16xf32> to vector<1x16xf32>
    %191 = tpu.concatenate %175, %176, %177, %178, %179, %180, %181, %182, %183, %184, %185, %186, %187, %188, %189, %190 in 1 : vector<1x16xf32>, vector<1x16xf32>, vector<1x16xf32>, vector<1x16xf32>, vector<1x16xf32>, vector<1x16xf32>, vector<1x16xf32>, vector<1x16xf32>, vector<1x16xf32>, vector<1x16xf32>, vector<1x16xf32>, vector<1x16xf32>, vector<1x16xf32>, vector<1x16xf32>, vector<1x16xf32>, vector<1x16xf32> -> vector<1x256xf32>
    %192 = vector.extract_strided_slice %173 {offsets = [0, 16], sizes = [16, 16], strides = [1, 1]} : vector<48x48xf32> to vector<16x16xf32>
    %193 = vector.extract_strided_slice %192 {offsets = [0, 0], sizes = [1, 16], strides = [1, 1]} : vector<16x16xf32> to vector<1x16xf32>
    %194 = vector.extract_strided_slice %192 {offsets = [1, 0], sizes = [1, 16], strides = [1, 1]} : vector<16x16xf32> to vector<1x16xf32>
    %195 = vector.extract_strided_slice %192 {offsets = [2, 0], sizes = [1, 16], strides = [1, 1]} : vector<16x16xf32> to vector<1x16xf32>
    %196 = vector.extract_strided_slice %192 {offsets = [3, 0], sizes = [1, 16], strides = [1, 1]} : vector<16x16xf32> to vector<1x16xf32>
    %197 = vector.extract_strided_slice %192 {offsets = [4, 0], sizes = [1, 16], strides = [1, 1]} : vector<16x16xf32> to vector<1x16xf32>
    %198 = vector.extract_strided_slice %192 {offsets = [5, 0], sizes = [1, 16], strides = [1, 1]} : vector<16x16xf32> to vector<1x16xf32>
    %199 = vector.extract_strided_slice %192 {offsets = [6, 0], sizes = [1, 16], strides = [1, 1]} : vector<16x16xf32> to vector<1x16xf32>
    %200 = vector.extract_strided_slice %192 {offsets = [7, 0], sizes = [1, 16], strides = [1, 1]} : vector<16x16xf32> to vector<1x16xf32>
    %201 = vector.extract_strided_slice %192 {offsets = [8, 0], sizes = [1, 16], strides = [1, 1]} : vector<16x16xf32> to vector<1x16xf32>
    %202 = vector.extract_strided_slice %192 {offsets = [9, 0], sizes = [1, 16], strides = [1, 1]} : vector<16x16xf32> to vector<1x16xf32>
    %203 = vector.extract_strided_slice %192 {offsets = [10, 0], sizes = [1, 16], strides = [1, 1]} : vector<16x16xf32> to vector<1x16xf32>
    %204 = vector.extract_strided_slice %192 {offsets = [11, 0], sizes = [1, 16], strides = [1, 1]} : vector<16x16xf32> to vector<1x16xf32>
    %205 = vector.extract_strided_slice %192 {offsets = [12, 0], sizes = [1, 16], strides = [1, 1]} : vector<16x16xf32> to vector<1x16xf32>
    %206 = vector.extract_strided_slice %192 {offsets = [13, 0], sizes = [1, 16], strides = [1, 1]} : vector<16x16xf32> to vector<1x16xf32>
    %207 = vector.extract_strided_slice %192 {offsets = [14, 0], sizes = [1, 16], strides = [1, 1]} : vector<16x16xf32> to vector<1x16xf32>
    %208 = vector.extract_strided_slice %192 {offsets = [15, 0], sizes = [1, 16], strides = [1, 1]} : vector<16x16xf32> to vector<1x16xf32>
    %209 = tpu.concatenate %193, %194, %195, %196, %197, %198, %199, %200, %201, %202, %203, %204, %205, %206, %207, %208 in 1 : vector<1x16xf32>, vector<1x16xf32>, vector<1x16xf32>, vector<1x16xf32>, vector<1x16xf32>, vector<1x16xf32>, vector<1x16xf32>, vector<1x16xf32>, vector<1x16xf32>, vector<1x16xf32>, vector<1x16xf32>, vector<1x16xf32>, vector<1x16xf32>, vector<1x16xf32>, vector<1x16xf32>, vector<1x16xf32> -> vector<1x256xf32>
    %210 = vector.extract_strided_slice %173 {offsets = [0, 32], sizes = [16, 16], strides = [1, 1]} : vector<48x48xf32> to vector<16x16xf32>
    %211 = vector.extract_strided_slice %210 {offsets = [0, 0], sizes = [1, 16], strides = [1, 1]} : vector<16x16xf32> to vector<1x16xf32>
    %212 = vector.extract_strided_slice %210 {offsets = [1, 0], sizes = [1, 16], strides = [1, 1]} : vector<16x16xf32> to vector<1x16xf32>
    %213 = vector.extract_strided_slice %210 {offsets = [2, 0], sizes = [1, 16], strides = [1, 1]} : vector<16x16xf32> to vector<1x16xf32>
    %214 = vector.extract_strided_slice %210 {offsets = [3, 0], sizes = [1, 16], strides = [1, 1]} : vector<16x16xf32> to vector<1x16xf32>
    %215 = vector.extract_strided_slice %210 {offsets = [4, 0], sizes = [1, 16], strides = [1, 1]} : vector<16x16xf32> to vector<1x16xf32>
    %216 = vector.extract_strided_slice %210 {offsets = [5, 0], sizes = [1, 16], strides = [1, 1]} : vector<16x16xf32> to vector<1x16xf32>
    %217 = vector.extract_strided_slice %210 {offsets = [6, 0], sizes = [1, 16], strides = [1, 1]} : vector<16x16xf32> to vector<1x16xf32>
    %218 = vector.extract_strided_slice %210 {offsets = [7, 0], sizes = [1, 16], strides = [1, 1]} : vector<16x16xf32> to vector<1x16xf32>
    %219 = vector.extract_strided_slice %210 {offsets = [8, 0], sizes = [1, 16], strides = [1, 1]} : vector<16x16xf32> to vector<1x16xf32>
    %220 = vector.extract_strided_slice %210 {offsets = [9, 0], sizes = [1, 16], strides = [1, 1]} : vector<16x16xf32> to vector<1x16xf32>
    %221 = vector.extract_strided_slice %210 {offsets = [10, 0], sizes = [1, 16], strides = [1, 1]} : vector<16x16xf32> to vector<1x16xf32>
    %222 = vector.extract_strided_slice %210 {offsets = [11, 0], sizes = [1, 16], strides = [1, 1]} : vector<16x16xf32> to vector<1x16xf32>
    %223 = vector.extract_strided_slice %210 {offsets = [12, 0], sizes = [1, 16], strides = [1, 1]} : vector<16x16xf32> to vector<1x16xf32>
    %224 = vector.extract_strided_slice %210 {offsets = [13, 0], sizes = [1, 16], strides = [1, 1]} : vector<16x16xf32> to vector<1x16xf32>
    %225 = vector.extract_strided_slice %210 {offsets = [14, 0], sizes = [1, 16], strides = [1, 1]} : vector<16x16xf32> to vector<1x16xf32>
    %226 = vector.extract_strided_slice %210 {offsets = [15, 0], sizes = [1, 16], strides = [1, 1]} : vector<16x16xf32> to vector<1x16xf32>
    %227 = tpu.concatenate %211, %212, %213, %214, %215, %216, %217, %218, %219, %220, %221, %222, %223, %224, %225, %226 in 1 : vector<1x16xf32>, vector<1x16xf32>, vector<1x16xf32>, vector<1x16xf32>, vector<1x16xf32>, vector<1x16xf32>, vector<1x16xf32>, vector<1x16xf32>, vector<1x16xf32>, vector<1x16xf32>, vector<1x16xf32>, vector<1x16xf32>, vector<1x16xf32>, vector<1x16xf32>, vector<1x16xf32>, vector<1x16xf32> -> vector<1x256xf32>
    %228 = vector.extract_strided_slice %173 {offsets = [16, 0], sizes = [16, 16], strides = [1, 1]} : vector<48x48xf32> to vector<16x16xf32>
    %229 = vector.extract_strided_slice %228 {offsets = [0, 0], sizes = [1, 16], strides = [1, 1]} : vector<16x16xf32> to vector<1x16xf32>
    %230 = vector.extract_strided_slice %228 {offsets = [1, 0], sizes = [1, 16], strides = [1, 1]} : vector<16x16xf32> to vector<1x16xf32>
    %231 = vector.extract_strided_slice %228 {offsets = [2, 0], sizes = [1, 16], strides = [1, 1]} : vector<16x16xf32> to vector<1x16xf32>
    %232 = vector.extract_strided_slice %228 {offsets = [3, 0], sizes = [1, 16], strides = [1, 1]} : vector<16x16xf32> to vector<1x16xf32>
    %233 = vector.extract_strided_slice %228 {offsets = [4, 0], sizes = [1, 16], strides = [1, 1]} : vector<16x16xf32> to vector<1x16xf32>
    %234 = vector.extract_strided_slice %228 {offsets = [5, 0], sizes = [1, 16], strides = [1, 1]} : vector<16x16xf32> to vector<1x16xf32>
    %235 = vector.extract_strided_slice %228 {offsets = [6, 0], sizes = [1, 16], strides = [1, 1]} : vector<16x16xf32> to vector<1x16xf32>
    %236 = vector.extract_strided_slice %228 {offsets = [7, 0], sizes = [1, 16], strides = [1, 1]} : vector<16x16xf32> to vector<1x16xf32>
    %237 = vector.extract_strided_slice %228 {offsets = [8, 0], sizes = [1, 16], strides = [1, 1]} : vector<16x16xf32> to vector<1x16xf32>
    %238 = vector.extract_strided_slice %228 {offsets = [9, 0], sizes = [1, 16], strides = [1, 1]} : vector<16x16xf32> to vector<1x16xf32>
    %239 = vector.extract_strided_slice %228 {offsets = [10, 0], sizes = [1, 16], strides = [1, 1]} : vector<16x16xf32> to vector<1x16xf32>
    %240 = vector.extract_strided_slice %228 {offsets = [11, 0], sizes = [1, 16], strides = [1, 1]} : vector<16x16xf32> to vector<1x16xf32>
    %241 = vector.extract_strided_slice %228 {offsets = [12, 0], sizes = [1, 16], strides = [1, 1]} : vector<16x16xf32> to vector<1x16xf32>
    %242 = vector.extract_strided_slice %228 {offsets = [13, 0], sizes = [1, 16], strides = [1, 1]} : vector<16x16xf32> to vector<1x16xf32>
    %243 = vector.extract_strided_slice %228 {offsets = [14, 0], sizes = [1, 16], strides = [1, 1]} : vector<16x16xf32> to vector<1x16xf32>
    %244 = vector.extract_strided_slice %228 {offsets = [15, 0], sizes = [1, 16], strides = [1, 1]} : vector<16x16xf32> to vector<1x16xf32>
    %245 = tpu.concatenate %229, %230, %231, %232, %233, %234, %235, %236, %237, %238, %239, %240, %241, %242, %243, %244 in 1 : vector<1x16xf32>, vector<1x16xf32>, vector<1x16xf32>, vector<1x16xf32>, vector<1x16xf32>, vector<1x16xf32>, vector<1x16xf32>, vector<1x16xf32>, vector<1x16xf32>, vector<1x16xf32>, vector<1x16xf32>, vector<1x16xf32>, vector<1x16xf32>, vector<1x16xf32>, vector<1x16xf32>, vector<1x16xf32> -> vector<1x256xf32>
    %246 = vector.extract_strided_slice %173 {offsets = [16, 16], sizes = [16, 16], strides = [1, 1]} : vector<48x48xf32> to vector<16x16xf32>
    %247 = vector.extract_strided_slice %246 {offsets = [0, 0], sizes = [1, 16], strides = [1, 1]} : vector<16x16xf32> to vector<1x16xf32>
    %248 = vector.extract_strided_slice %246 {offsets = [1, 0], sizes = [1, 16], strides = [1, 1]} : vector<16x16xf32> to vector<1x16xf32>
    %249 = vector.extract_strided_slice %246 {offsets = [2, 0], sizes = [1, 16], strides = [1, 1]} : vector<16x16xf32> to vector<1x16xf32>
    %250 = vector.extract_strided_slice %246 {offsets = [3, 0], sizes = [1, 16], strides = [1, 1]} : vector<16x16xf32> to vector<1x16xf32>
    %251 = vector.extract_strided_slice %246 {offsets = [4, 0], sizes = [1, 16], strides = [1, 1]} : vector<16x16xf32> to vector<1x16xf32>
    %252 = vector.extract_strided_slice %246 {offsets = [5, 0], sizes = [1, 16], strides = [1, 1]} : vector<16x16xf32> to vector<1x16xf32>
    %253 = vector.extract_strided_slice %246 {offsets = [6, 0], sizes = [1, 16], strides = [1, 1]} : vector<16x16xf32> to vector<1x16xf32>
    %254 = vector.extract_strided_slice %246 {offsets = [7, 0], sizes = [1, 16], strides = [1, 1]} : vector<16x16xf32> to vector<1x16xf32>
    %255 = vector.extract_strided_slice %246 {offsets = [8, 0], sizes = [1, 16], strides = [1, 1]} : vector<16x16xf32> to vector<1x16xf32>
    %256 = vector.extract_strided_slice %246 {offsets = [9, 0], sizes = [1, 16], strides = [1, 1]} : vector<16x16xf32> to vector<1x16xf32>
    %257 = vector.extract_strided_slice %246 {offsets = [10, 0], sizes = [1, 16], strides = [1, 1]} : vector<16x16xf32> to vector<1x16xf32>
    %258 = vector.extract_strided_slice %246 {offsets = [11, 0], sizes = [1, 16], strides = [1, 1]} : vector<16x16xf32> to vector<1x16xf32>
    %259 = vector.extract_strided_slice %246 {offsets = [12, 0], sizes = [1, 16], strides = [1, 1]} : vector<16x16xf32> to vector<1x16xf32>
    %260 = vector.extract_strided_slice %246 {offsets = [13, 0], sizes = [1, 16], strides = [1, 1]} : vector<16x16xf32> to vector<1x16xf32>
    %261 = vector.extract_strided_slice %246 {offsets = [14, 0], sizes = [1, 16], strides = [1, 1]} : vector<16x16xf32> to vector<1x16xf32>
    %262 = vector.extract_strided_slice %246 {offsets = [15, 0], sizes = [1, 16], strides = [1, 1]} : vector<16x16xf32> to vector<1x16xf32>
    %263 = tpu.concatenate %247, %248, %249, %250, %251, %252, %253, %254, %255, %256, %257, %258, %259, %260, %261, %262 in 1 : vector<1x16xf32>, vector<1x16xf32>, vector<1x16xf32>, vector<1x16xf32>, vector<1x16xf32>, vector<1x16xf32>, vector<1x16xf32>, vector<1x16xf32>, vector<1x16xf32>, vector<1x16xf32>, vector<1x16xf32>, vector<1x16xf32>, vector<1x16xf32>, vector<1x16xf32>, vector<1x16xf32>, vector<1x16xf32> -> vector<1x256xf32>
    %264 = vector.extract_strided_slice %173 {offsets = [16, 32], sizes = [16, 16], strides = [1, 1]} : vector<48x48xf32> to vector<16x16xf32>
    %265 = vector.extract_strided_slice %264 {offsets = [0, 0], sizes = [1, 16], strides = [1, 1]} : vector<16x16xf32> to vector<1x16xf32>
    %266 = vector.extract_strided_slice %264 {offsets = [1, 0], sizes = [1, 16], strides = [1, 1]} : vector<16x16xf32> to vector<1x16xf32>
    %267 = vector.extract_strided_slice %264 {offsets = [2, 0], sizes = [1, 16], strides = [1, 1]} : vector<16x16xf32> to vector<1x16xf32>
    %268 = vector.extract_strided_slice %264 {offsets = [3, 0], sizes = [1, 16], strides = [1, 1]} : vector<16x16xf32> to vector<1x16xf32>
    %269 = vector.extract_strided_slice %264 {offsets = [4, 0], sizes = [1, 16], strides = [1, 1]} : vector<16x16xf32> to vector<1x16xf32>
    %270 = vector.extract_strided_slice %264 {offsets = [5, 0], sizes = [1, 16], strides = [1, 1]} : vector<16x16xf32> to vector<1x16xf32>
    %271 = vector.extract_strided_slice %264 {offsets = [6, 0], sizes = [1, 16], strides = [1, 1]} : vector<16x16xf32> to vector<1x16xf32>
    %272 = vector.extract_strided_slice %264 {offsets = [7, 0], sizes = [1, 16], strides = [1, 1]} : vector<16x16xf32> to vector<1x16xf32>
    %273 = vector.extract_strided_slice %264 {offsets = [8, 0], sizes = [1, 16], strides = [1, 1]} : vector<16x16xf32> to vector<1x16xf32>
    %274 = vector.extract_strided_slice %264 {offsets = [9, 0], sizes = [1, 16], strides = [1, 1]} : vector<16x16xf32> to vector<1x16xf32>
    %275 = vector.extract_strided_slice %264 {offsets = [10, 0], sizes = [1, 16], strides = [1, 1]} : vector<16x16xf32> to vector<1x16xf32>
    %276 = vector.extract_strided_slice %264 {offsets = [11, 0], sizes = [1, 16], strides = [1, 1]} : vector<16x16xf32> to vector<1x16xf32>
    %277 = vector.extract_strided_slice %264 {offsets = [12, 0], sizes = [1, 16], strides = [1, 1]} : vector<16x16xf32> to vector<1x16xf32>
    %278 = vector.extract_strided_slice %264 {offsets = [13, 0], sizes = [1, 16], strides = [1, 1]} : vector<16x16xf32> to vector<1x16xf32>
    %279 = vector.extract_strided_slice %264 {offsets = [14, 0], sizes = [1, 16], strides = [1, 1]} : vector<16x16xf32> to vector<1x16xf32>
    %280 = vector.extract_strided_slice %264 {offsets = [15, 0], sizes = [1, 16], strides = [1, 1]} : vector<16x16xf32> to vector<1x16xf32>
    %281 = tpu.concatenate %265, %266, %267, %268, %269, %270, %271, %272, %273, %274, %275, %276, %277, %278, %279, %280 in 1 : vector<1x16xf32>, vector<1x16xf32>, vector<1x16xf32>, vector<1x16xf32>, vector<1x16xf32>, vector<1x16xf32>, vector<1x16xf32>, vector<1x16xf32>, vector<1x16xf32>, vector<1x16xf32>, vector<1x16xf32>, vector<1x16xf32>, vector<1x16xf32>, vector<1x16xf32>, vector<1x16xf32>, vector<1x16xf32> -> vector<1x256xf32>
    %282 = vector.extract_strided_slice %173 {offsets = [32, 0], sizes = [16, 16], strides = [1, 1]} : vector<48x48xf32> to vector<16x16xf32>
    %283 = vector.extract_strided_slice %282 {offsets = [0, 0], sizes = [1, 16], strides = [1, 1]} : vector<16x16xf32> to vector<1x16xf32>
    %284 = vector.extract_strided_slice %282 {offsets = [1, 0], sizes = [1, 16], strides = [1, 1]} : vector<16x16xf32> to vector<1x16xf32>
    %285 = vector.extract_strided_slice %282 {offsets = [2, 0], sizes = [1, 16], strides = [1, 1]} : vector<16x16xf32> to vector<1x16xf32>
    %286 = vector.extract_strided_slice %282 {offsets = [3, 0], sizes = [1, 16], strides = [1, 1]} : vector<16x16xf32> to vector<1x16xf32>
    %287 = vector.extract_strided_slice %282 {offsets = [4, 0], sizes = [1, 16], strides = [1, 1]} : vector<16x16xf32> to vector<1x16xf32>
    %288 = vector.extract_strided_slice %282 {offsets = [5, 0], sizes = [1, 16], strides = [1, 1]} : vector<16x16xf32> to vector<1x16xf32>
    %289 = vector.extract_strided_slice %282 {offsets = [6, 0], sizes = [1, 16], strides = [1, 1]} : vector<16x16xf32> to vector<1x16xf32>
    %290 = vector.extract_strided_slice %282 {offsets = [7, 0], sizes = [1, 16], strides = [1, 1]} : vector<16x16xf32> to vector<1x16xf32>
    %291 = vector.extract_strided_slice %282 {offsets = [8, 0], sizes = [1, 16], strides = [1, 1]} : vector<16x16xf32> to vector<1x16xf32>
    %292 = vector.extract_strided_slice %282 {offsets = [9, 0], sizes = [1, 16], strides = [1, 1]} : vector<16x16xf32> to vector<1x16xf32>
    %293 = vector.extract_strided_slice %282 {offsets = [10, 0], sizes = [1, 16], strides = [1, 1]} : vector<16x16xf32> to vector<1x16xf32>
    %294 = vector.extract_strided_slice %282 {offsets = [11, 0], sizes = [1, 16], strides = [1, 1]} : vector<16x16xf32> to vector<1x16xf32>
    %295 = vector.extract_strided_slice %282 {offsets = [12, 0], sizes = [1, 16], strides = [1, 1]} : vector<16x16xf32> to vector<1x16xf32>
    %296 = vector.extract_strided_slice %282 {offsets = [13, 0], sizes = [1, 16], strides = [1, 1]} : vector<16x16xf32> to vector<1x16xf32>
    %297 = vector.extract_strided_slice %282 {offsets = [14, 0], sizes = [1, 16], strides = [1, 1]} : vector<16x16xf32> to vector<1x16xf32>
    %298 = vector.extract_strided_slice %282 {offsets = [15, 0], sizes = [1, 16], strides = [1, 1]} : vector<16x16xf32> to vector<1x16xf32>
    %299 = tpu.concatenate %283, %284, %285, %286, %287, %288, %289, %290, %291, %292, %293, %294, %295, %296, %297, %298 in 1 : vector<1x16xf32>, vector<1x16xf32>, vector<1x16xf32>, vector<1x16xf32>, vector<1x16xf32>, vector<1x16xf32>, vector<1x16xf32>, vector<1x16xf32>, vector<1x16xf32>, vector<1x16xf32>, vector<1x16xf32>, vector<1x16xf32>, vector<1x16xf32>, vector<1x16xf32>, vector<1x16xf32>, vector<1x16xf32> -> vector<1x256xf32>
    %300 = vector.extract_strided_slice %173 {offsets = [32, 16], sizes = [16, 16], strides = [1, 1]} : vector<48x48xf32> to vector<16x16xf32>
    %301 = vector.extract_strided_slice %300 {offsets = [0, 0], sizes = [1, 16], strides = [1, 1]} : vector<16x16xf32> to vector<1x16xf32>
    %302 = vector.extract_strided_slice %300 {offsets = [1, 0], sizes = [1, 16], strides = [1, 1]} : vector<16x16xf32> to vector<1x16xf32>
    %303 = vector.extract_strided_slice %300 {offsets = [2, 0], sizes = [1, 16], strides = [1, 1]} : vector<16x16xf32> to vector<1x16xf32>
    %304 = vector.extract_strided_slice %300 {offsets = [3, 0], sizes = [1, 16], strides = [1, 1]} : vector<16x16xf32> to vector<1x16xf32>
    %305 = vector.extract_strided_slice %300 {offsets = [4, 0], sizes = [1, 16], strides = [1, 1]} : vector<16x16xf32> to vector<1x16xf32>
    %306 = vector.extract_strided_slice %300 {offsets = [5, 0], sizes = [1, 16], strides = [1, 1]} : vector<16x16xf32> to vector<1x16xf32>
    %307 = vector.extract_strided_slice %300 {offsets = [6, 0], sizes = [1, 16], strides = [1, 1]} : vector<16x16xf32> to vector<1x16xf32>
    %308 = vector.extract_strided_slice %300 {offsets = [7, 0], sizes = [1, 16], strides = [1, 1]} : vector<16x16xf32> to vector<1x16xf32>
    %309 = vector.extract_strided_slice %300 {offsets = [8, 0], sizes = [1, 16], strides = [1, 1]} : vector<16x16xf32> to vector<1x16xf32>
    %310 = vector.extract_strided_slice %300 {offsets = [9, 0], sizes = [1, 16], strides = [1, 1]} : vector<16x16xf32> to vector<1x16xf32>
    %311 = vector.extract_strided_slice %300 {offsets = [10, 0], sizes = [1, 16], strides = [1, 1]} : vector<16x16xf32> to vector<1x16xf32>
    %312 = vector.extract_strided_slice %300 {offsets = [11, 0], sizes = [1, 16], strides = [1, 1]} : vector<16x16xf32> to vector<1x16xf32>
    %313 = vector.extract_strided_slice %300 {offsets = [12, 0], sizes = [1, 16], strides = [1, 1]} : vector<16x16xf32> to vector<1x16xf32>
    %314 = vector.extract_strided_slice %300 {offsets = [13, 0], sizes = [1, 16], strides = [1, 1]} : vector<16x16xf32> to vector<1x16xf32>
    %315 = vector.extract_strided_slice %300 {offsets = [14, 0], sizes = [1, 16], strides = [1, 1]} : vector<16x16xf32> to vector<1x16xf32>
    %316 = vector.extract_strided_slice %300 {offsets = [15, 0], sizes = [1, 16], strides = [1, 1]} : vector<16x16xf32> to vector<1x16xf32>
    %317 = tpu.concatenate %301, %302, %303, %304, %305, %306, %307, %308, %309, %310, %311, %312, %313, %314, %315, %316 in 1 : vector<1x16xf32>, vector<1x16xf32>, vector<1x16xf32>, vector<1x16xf32>, vector<1x16xf32>, vector<1x16xf32>, vector<1x16xf32>, vector<1x16xf32>, vector<1x16xf32>, vector<1x16xf32>, vector<1x16xf32>, vector<1x16xf32>, vector<1x16xf32>, vector<1x16xf32>, vector<1x16xf32>, vector<1x16xf32> -> vector<1x256xf32>
    %318 = vector.extract_strided_slice %173 {offsets = [32, 32], sizes = [16, 16], strides = [1, 1]} : vector<48x48xf32> to vector<16x16xf32>
    %319 = vector.extract_strided_slice %318 {offsets = [0, 0], sizes = [1, 16], strides = [1, 1]} : vector<16x16xf32> to vector<1x16xf32>
    %320 = vector.extract_strided_slice %318 {offsets = [1, 0], sizes = [1, 16], strides = [1, 1]} : vector<16x16xf32> to vector<1x16xf32>
    %321 = vector.extract_strided_slice %318 {offsets = [2, 0], sizes = [1, 16], strides = [1, 1]} : vector<16x16xf32> to vector<1x16xf32>
    %322 = vector.extract_strided_slice %318 {offsets = [3, 0], sizes = [1, 16], strides = [1, 1]} : vector<16x16xf32> to vector<1x16xf32>
    %323 = vector.extract_strided_slice %318 {offsets = [4, 0], sizes = [1, 16], strides = [1, 1]} : vector<16x16xf32> to vector<1x16xf32>
    %324 = vector.extract_strided_slice %318 {offsets = [5, 0], sizes = [1, 16], strides = [1, 1]} : vector<16x16xf32> to vector<1x16xf32>
    %325 = vector.extract_strided_slice %318 {offsets = [6, 0], sizes = [1, 16], strides = [1, 1]} : vector<16x16xf32> to vector<1x16xf32>
    %326 = vector.extract_strided_slice %318 {offsets = [7, 0], sizes = [1, 16], strides = [1, 1]} : vector<16x16xf32> to vector<1x16xf32>
    %327 = vector.extract_strided_slice %318 {offsets = [8, 0], sizes = [1, 16], strides = [1, 1]} : vector<16x16xf32> to vector<1x16xf32>
    %328 = vector.extract_strided_slice %318 {offsets = [9, 0], sizes = [1, 16], strides = [1, 1]} : vector<16x16xf32> to vector<1x16xf32>
    %329 = vector.extract_strided_slice %318 {offsets = [10, 0], sizes = [1, 16], strides = [1, 1]} : vector<16x16xf32> to vector<1x16xf32>
    %330 = vector.extract_strided_slice %318 {offsets = [11, 0], sizes = [1, 16], strides = [1, 1]} : vector<16x16xf32> to vector<1x16xf32>
    %331 = vector.extract_strided_slice %318 {offsets = [12, 0], sizes = [1, 16], strides = [1, 1]} : vector<16x16xf32> to vector<1x16xf32>
    %332 = vector.extract_strided_slice %318 {offsets = [13, 0], sizes = [1, 16], strides = [1, 1]} : vector<16x16xf32> to vector<1x16xf32>
    %333 = vector.extract_strided_slice %318 {offsets = [14, 0], sizes = [1, 16], strides = [1, 1]} : vector<16x16xf32> to vector<1x16xf32>
    %334 = vector.extract_strided_slice %318 {offsets = [15, 0], sizes = [1, 16], strides = [1, 1]} : vector<16x16xf32> to vector<1x16xf32>
    %335 = tpu.concatenate %319, %320, %321, %322, %323, %324, %325, %326, %327, %328, %329, %330, %331, %332, %333, %334 in 1 : vector<1x16xf32>, vector<1x16xf32>, vector<1x16xf32>, vector<1x16xf32>, vector<1x16xf32>, vector<1x16xf32>, vector<1x16xf32>, vector<1x16xf32>, vector<1x16xf32>, vector<1x16xf32>, vector<1x16xf32>, vector<1x16xf32>, vector<1x16xf32>, vector<1x16xf32>, vector<1x16xf32>, vector<1x16xf32> -> vector<1x256xf32>
    %336 = tpu.concatenate %191, %209, %227, %245, %263, %281, %299, %317, %335 in 0 : vector<1x256xf32>, vector<1x256xf32>, vector<1x256xf32>, vector<1x256xf32>, vector<1x256xf32>, vector<1x256xf32>, vector<1x256xf32>, vector<1x256xf32>, vector<1x256xf32> -> vector<9x256xf32>
    %337 = tpu.concatenate %169, %336 in 1 : vector<9x256xf32>, vector<9x256xf32> -> vector<9x512xf32>
    %c0_12 = arith.constant 0 : index
    %c0_13 = arith.constant 0 : index
    %338 = vector.load %arg5[%c0_12, %c0_13] : memref<16x9xf32, #tpu.memory_space<vmem>>, vector<16x9xf32>
    %cst_14 = arith.constant dense<0.000000e+00> : vector<16x512xf32>
    %339 = tpu.matmul %338, %337, %cst_14 {dimension_numbers = #tpu.dot_dimension_numbers<[1], [0], [0], [1], [0, 0, 1, 1], [], []>} : vector<16x9xf32>, vector<9x512xf32>, vector<16x512xf32> -> vector<16x512xf32>
    %c0_15 = arith.constant 0 : index
    %c0_16 = arith.constant 0 : index
    %340 = vector.load %arg6[%c0_15, %c0_16] : memref<16x1xf32, #tpu.memory_space<vmem>>, vector<16x1xf32>
    %341 = vector.broadcast %340 : vector<16x1xf32> to vector<16x512xf32>
    %342 = arith.addf %339, %341 : vector<16x512xf32>
    %cst_17 = arith.constant 0.000000e+00 : f32
    %343 = vector.broadcast %cst_17 : f32 to vector<16x512xf32>
    %344 = arith.maximumf %342, %343 : vector<16x512xf32>
    %c0_18 = arith.constant 0 : index
    %c0_19 = arith.constant 0 : index
    %345 = vector.load %arg7[%c0_18, %c0_19] : memref<8x16xf32, #tpu.memory_space<vmem>>, vector<8x16xf32>
    %cst_20 = arith.constant dense<0.000000e+00> : vector<8x512xf32>
    %346 = tpu.matmul %345, %344, %cst_20 {dimension_numbers = #tpu.dot_dimension_numbers<[1], [0], [0], [1], [0, 0, 1, 1], [], []>} : vector<8x16xf32>, vector<16x512xf32>, vector<8x512xf32> -> vector<8x512xf32>
    %c0_21 = arith.constant 0 : index
    %c0_22 = arith.constant 0 : index
    %347 = vector.load %arg8[%c0_21, %c0_22] : memref<8x1xf32, #tpu.memory_space<vmem>>, vector<8x1xf32>
    %348 = vector.broadcast %347 : vector<8x1xf32> to vector<8x512xf32>
    %349 = arith.addf %346, %348 : vector<8x512xf32>
    %350 = vector.extract_strided_slice %349 {offsets = [0, 0], sizes = [8, 256], strides = [1, 1]} : vector<8x512xf32> to vector<8x256xf32>
    %c0_23 = arith.constant 0 : index
    %c0_24 = arith.constant 0 : index
    %c0_25 = arith.constant 0 : index
    %351 = vector.load %arg9[%c0_23, %c0_24, %c0_25] : memref<2x8x256xf32, #tpu.memory_space<vmem>>, vector<1x8x256xf32>
    %352 = vector.shape_cast %351 : vector<1x8x256xf32> to vector<8x256xf32>
    %353 = vector.shape_cast %350 : vector<8x256xf32> to vector<1x8x256xf32>
    tpu.vector_store %arg9[%c0_23, %c0_24, %c0_25], %353 {strides = array<i32>} : memref<2x8x256xf32, #tpu.memory_space<vmem>>, vector<1x8x256xf32>,
    %354 = vector.extract_strided_slice %349 {offsets = [0, 256], sizes = [8, 256], strides = [1, 1]} : vector<8x512xf32> to vector<8x256xf32>
    %c1_26 = arith.constant 1 : index
    %c0_27 = arith.constant 0 : index
    %c0_28 = arith.constant 0 : index
    %355 = vector.load %arg9[%c1_26, %c0_27, %c0_28] : memref<2x8x256xf32, #tpu.memory_space<vmem>>, vector<1x8x256xf32>
    %356 = vector.shape_cast %355 : vector<1x8x256xf32> to vector<8x256xf32>
    %357 = vector.shape_cast %354 : vector<8x256xf32> to vector<1x8x256xf32>
    tpu.vector_store %arg9[%c1_26, %c0_27, %c0_28], %357 {strides = array<i32>} : memref<2x8x256xf32, #tpu.memory_space<vmem>>, vector<1x8x256xf32>,
    return
  }
  func.func @transform_0(%arg0: i32, %arg1: i32) -> (i32, i32, i32) {
    %c0_i32 = arith.constant 0 : i32
    %c0_i32_0 = arith.constant 0 : i32
    %c0_i32_1 = arith.constant 0 : i32
    return %arg0, %c0_i32, %c0_i32_0 : i32, i32, i32
  }
  func.func @transform_1(%arg0: i32, %arg1: i32) -> (i32, i32, i32) {
    %c0_i32 = arith.constant 0 : i32
    %c0_i32_0 = arith.constant 0 : i32
    %c0_i32_1 = arith.constant 0 : i32
    return %arg1, %c0_i32, %c0_i32_0 : i32, i32, i32
  }
  func.func @transform_2(%arg0: i32, %arg1: i32) -> (i32, i32) {
    %c0_i32 = arith.constant 0 : i32
    %c0_i32_0 = arith.constant 0 : i32
    %c0_i32_1 = arith.constant 0 : i32
    return %c0_i32, %c0_i32_0 : i32, i32
  }
  func.func @transform_3(%arg0: i32, %arg1: i32) -> (i32, i32) {
    %c0_i32 = arith.constant 0 : i32
    %c0_i32_0 = arith.constant 0 : i32
    %c0_i32_1 = arith.constant 0 : i32
    return %c0_i32, %c0_i32_0 : i32, i32
  }
  func.func @transform_4(%arg0: i32, %arg1: i32) -> (i32, i32) {
    %c0_i32 = arith.constant 0 : i32
    %c0_i32_0 = arith.constant 0 : i32
    %c0_i32_1 = arith.constant 0 : i32
    return %c0_i32, %c0_i32_0 : i32, i32
  }
  func.func @transform_5(%arg0: i32, %arg1: i32) -> (i32, i32) {
    %c0_i32 = arith.constant 0 : i32
    %c0_i32_0 = arith.constant 0 : i32
    %c0_i32_1 = arith.constant 0 : i32
    return %c0_i32, %c0_i32_0 : i32, i32
  }
  func.func @transform_6(%arg0: i32, %arg1: i32) -> (i32, i32) {
    %c0_i32 = arith.constant 0 : i32
    %c0_i32_0 = arith.constant 0 : i32
    %c0_i32_1 = arith.constant 0 : i32
    return %c0_i32, %c0_i32_0 : i32, i32
  }
  func.func @transform_7(%arg0: i32, %arg1: i32) -> (i32, i32, i32) {
    %c0_i32 = arith.constant 0 : i32
    %c0_i32_0 = arith.constant 0 : i32
    return %arg0, %c0_i32, %arg1 : i32, i32, i32
  }
}

</mosaic_0001>

<bundles_post_ra>
// kernel: a_call__.1
= control target key start
LH: loop header
LB: loop body
LE: loop exit
PB: predicated region body
PF: predicated region fallthrough
CT: control target
= control target key end

     0   :  { %vm34_vm0 = vcmask 64512   ;;  %s2854_s18 = smov 32   ;;  %s2855_s19 = smov 48   ;;  %vm319_vm1 = vcmask 130048   ;;  %vm321_vm2 = vcmask 261120   ;;  %vm323_vm3 = vcmask 392192   ;;  %s4428_s0 = inlined_call_operand.vmem [shape: f32[2,8,8], index: 0, kind: input, shape index: {}]   ;;  %s4429_s1 = inlined_call_operand.vmem [shape: f32[1,48,8], index: 1, kind: input, shape index: {}]   ;;  %s4430_s2 = inlined_call_operand.vmem [shape: f32[8,48], index: 2, kind: input, shape index: {}]   ;;  %s4431_s4 = inlined_call_operand.vmem [shape: f32[16,1], index: 4, kind: input, shape index: {}]   ;;  %s4432_s6 = inlined_call_operand.vmem [shape: f32[8,1], index: 6, kind: input, shape index: {}]   ;;  %s4433_s3 = inlined_call_operand.vmem [shape: f32[16,9], index: 3, kind: input, shape index: {}]   ;;  %s4434_s5 = inlined_call_operand.vmem [shape: f32[8,16], index: 5, kind: input, shape index: {}]   ;;  %s4435_s7 = inlined_call_operand.vmem [shape: f32[2,8,256], index: 7, kind: output, shape index: {}]  }
   0x1   :  { %v33_v0 = vld [vmem:[%s4428_s0] sm:$0xff]  ;;  %v27_v2 = vld [vmem:[%s4429_s1 + $0x8] sm:$0xff]  ;;  %v28_v3 = vld [vmem:[%s4429_s1 + $0x10] sm:$0xff]  ;;  %s2856_s20 = smov 64   ;;  %s2857_s21 = smov 80   ;;  %vm325_vm4 = vcmask 523264  }
   0x2   :  { %v26_v1 = vld [vmem:[%s4429_s1] sm:$0xff]  ;;  %2146 = vmatprep.subr.mxu0 %v33_v0  ;;  %v2093_v4 = vld [vmem:[%s4428_s0 + $0x8] sm:$0xff]  ;;  %v29_v5 = vld [vmem:[%s4429_s1 + $0x18] sm:$0xff]  ;;  %s2858_s22 = smov 96   ;;  %vm327_vm5 = vcmask 654336   ;;  %vm329_vm6 = vcmask 785408  }
   0x3   :  { %2148 = vmatprep.mubr.msk.f32.mxu0 %vm34_vm0, %v26_v1  ;;  %2147 = vmatpush3.msra.mxu0 %v33_v0  ;;  %v30_v6 = vld [vmem:[%s4429_s1 + $0x20] sm:$0xff]  ;;  %v31_v7 = vld [vmem:[%s4429_s1 + $0x28] sm:$0xff]  ;;  %s2852_s1 = smov 112   ;;  %vm331_vm7 = vcmask 916480   ;;  %vm874_vm8 = vcmask 1040384   ;;  %vm877_vm9 = vcmask 1041408  }
   0x4   :  { %2149 = vmatmul.mubr.msk.f32.vlgmr.msra.gmra.mrb[0].mxu0 %vm34_vm0, %v27_v2  ;;  %2168 = vmatprep.subr.mxu0 %v2093_v4  ;;  %v32_v8 = vld [vmem:[%s4430_s2] sm:$0xff]  ;;  %s2853_s2 = smov 16   ;;  %vm880_vm10 = vcmask 1042432   ;;  %vm883_vm11 = vcmask 1043456   ;;  %vm886_vm12 = vcmask 1044480   ;;  %vm889_vm13 = vcmask 1045504  }
   0x5   :  { %2151 = vmatprep.mubr.msk.f32.mxu0 %vm34_vm0, %v28_v3  ;;  %2169 = vmatpush3.msra.mxu0 %v2093_v4  ;;  %vm892_vm14 = vcmask 1046528   ;;  %vm2861_vm15 = vmmov 1  }
   0x6   :  { %2157 = vmatprep.subr.mxu1 %v32_v8 }
   0x7   :  { %2158 = vmatpush3.msra.mxu1 %v32_v8 }
   0x8   :  { %2152 = vmatmul.mubr.msk.f32.gmra.mrb[2].mxu0 %vm34_vm0, %v29_v5  ;;  %2179 = vmatprep.subr.mxu1 %v32_v8 }
   0x9   :  { %2154 = vmatprep.mubr.msk.f32.mxu0 %vm34_vm0, %v30_v6 }
   0xc   :  { %2155 = vmatmul.mubr.msk.f32.gmra.mrb[4].mxu0 %vm34_vm0, %v31_v7 }
   0xd   :  { %2170 = vmatprep.mubr.msk.f32.mxu0 %vm34_vm0, %v26_v1 }
  0x10   :  { %2171 = vmatmul.mubr.msk.f32.vlgmr.msra.gmra.mrb[6].mxu0 %vm34_vm0, %v27_v2 }
  0x11   :  { %2173 = vmatprep.mubr.msk.f32.mxu0 %vm34_vm0, %v28_v3 }
  0x14   :  { %2174 = vmatmul.mubr.msk.f32.gmra.mrb[8].mxu0 %vm34_vm0, %v29_v5 }
  0x15   :  { %2176 = vmatprep.mubr.msk.f32.mxu0 %vm34_vm0, %v30_v6 }
  0x18   :  { %2177 = vmatmul.mubr.msk.f32.gmra.mrb[10].mxu0 %vm34_vm0, %v31_v7 }
  0xd7   :  { %v2150_v9 = vpop.f32.mrb[0].mxu0 }
  0xd8   :  { %v119_v10 = vpop.f32.mrb[1].mxu0 }
  0xd9   :  { %2159 = vmatprep.mubr.msk.f32.mxu1 %vm34_vm0, %v119_v10 }
  0xda   :  { %2160 = vmatmul.mubr.msk.f32.vlgmr.msra.gmra.mrb[0].mxu1 %vm34_vm0, %v2150_v9 }
  0xdb   :  { %v2153_v11 = vpop.f32.mrb[2].mxu0  ;;  %2180 = vmatpush3.msra.mxu1 %v32_v8 }
  0xdc   :  { %v129_v12 = vpop.f32.mrb[3].mxu0 }
  0xdd   :  { %2162 = vmatprep.mubr.msk.f32.mxu1 %vm34_vm0, %v129_v12 }
  0xde   :  { %2163 = vmatmul.mubr.msk.f32.gmra.mrb[2].mxu1 %vm34_vm0, %v2153_v11 }
  0xdf   :  { %v2156_v13 = vpop.f32.mrb[4].mxu0 }
  0xe0   :  { %v139_v14 = vpop.f32.mrb[5].mxu0 }
  0xe1   :  { %2165 = vmatprep.mubr.msk.f32.mxu1 %vm34_vm0, %v139_v14 }
  0xe2   :  { %2166 = vmatmul.mubr.msk.f32.gmra.mrb[4].mxu1 %vm34_vm0, %v2156_v13 }
  0xe3   :  { %v2172_v15 = vpop.f32.mrb[6].mxu0 }
  0xe4   :  { %v963_v16 = vpop.f32.mrb[7].mxu0 }
  0xe5   :  { %2181 = vmatprep.mubr.msk.f32.mxu1 %vm34_vm0, %v963_v16 }
  0xe6   :  { %2182 = vmatmul.mubr.msk.f32.vlgmr.msra.gmra.mrb[6].mxu1 %vm34_vm0, %v2172_v15 }
  0xe7   :  { %v2175_v17 = vpop.f32.mrb[8].mxu0 }
  0xe8   :  { %v973_v18 = vpop.f32.mrb[9].mxu0 }
  0xe9   :  { %2184 = vmatprep.mubr.msk.f32.mxu1 %vm34_vm0, %v973_v18 }
  0xea   :  { %2185 = vmatmul.mubr.msk.f32.gmra.mrb[8].mxu1 %vm34_vm0, %v2175_v17 }
  0xeb   :  { %v2178_v19 = vpop.f32.mrb[10].mxu0 }
  0xec   :  { %v983_v20 = vpop.f32.mrb[11].mxu0 }
  0xed   :  { %2187 = vmatprep.mubr.msk.f32.mxu1 %vm34_vm0, %v983_v20 }
  0xee   :  { %2188 = vmatmul.mubr.msk.f32.gmra.mrb[10].mxu1 %vm34_vm0, %v2178_v19  ;;  %vm2191_vm0 = vmpackc.low %vm874_vm8, %vm2861_vm15 }
 0x1ad   :  { %v2953_v21 = vpop.f32.mrb[0].mxu1 }
 0x1ae   :  { %4503 = vst [vmem:[#allocation2_spill] sm:$0xff] %v2953_v21  ;;  %v2955_v22 = vpop.f32.mrb[1].mxu1  ;;  %v2958_v23 = vrot.slane %v2953_v21, 1  ;;  %v2961_v24 = vrot.slane %v2953_v21, 3  ;;  %v2964_v25 = vrot.slane %v2953_v21, 4  ;;  %v2973_v28 = vrot.slane %v2953_v21, 2 }
 0x1af   :  { %v2967_v26 = vrot.slane %v2955_v22, 2  ;;  %v2970_v27 = vrot.slane %v2955_v22, 3  ;;  %v2976_v29 = vrot.slane %v2955_v22, 4  ;;  %v2981_v31 = vrot.slane %v2955_v22, 5 }
 0x1b0   :  { %4504 = vst [vmem:[#allocation3_spill] sm:$0xff] %v2958_v23  ;;  %v2220_v30 = vpack.i.bf16 %v2958_v23, %v2955_v22  ;;  %v2984_v32 = vrot.slane %v2953_v21, 5  ;;  %v2987_v33 = vrot.slane %v2953_v21, 6  ;;  %v2994_v36 = vrot.slane %v2955_v22, 1 }
 0x1b1   :  { %4505 = vst [vmem:[#allocation4_spill] sm:$0xff] %v2967_v26  ;;  %v2989_v34 = vpop.f32.mrb[2].mxu1  ;;  %v2225_v35 = vpack.i.bf16 %v2967_v26, %v2958_v23  ;;  %v2245_v37 = vpack.i.bf16 %v2976_v29, %v2961_v24  ;;  %v2255_v39 = vpack.i.bf16 %v2981_v31, %v2964_v25  ;;  %v3009_v42 = vrot.slane %v2955_v22, 6 }
 0x1b2   :  { %4506 = vst [vmem:[#allocation5_spill] sm:$0xff] %v2989_v34  ;;  %2221 = vrot.lane.b32.xlu0 %v2220_v30, %s2852_s1  ;;  %v2999_v38 = vpop.f32.mrb[3].mxu1  ;;  %v2250_v40 = vpack.i.bf16 %v2984_v32, %v2970_v27  ;;  %v2260_v41 = vpack.i.bf16 %v2987_v33, %v2976_v29  ;;  %v3012_v43 = vrot.slane %v2953_v21, 7  ;;  %v3015_v44 = vrot.slane %v2955_v22, 7 }
 0x1b3   :  { %4507 = vst [vmem:[#allocation6_spill] sm:$0xff] %v2999_v38  ;;  %2226 = vrot.lane.b32.xlu1 %v2225_v35, %s2853_s2  ;;  %v2235_v45 = vpack.i.bf16 %v2970_v27, %v2973_v28  ;;  %v3020_v46 = vrot.slane %v2989_v34, 3  ;;  %v3023_v47 = vrot.slane %v2989_v34, 4  ;;  %v3026_v48 = vrot.slane %v2989_v34, 5 }
 0x1b4   :  { %v2230_v49 = vpack.i.bf16 %v2961_v24, %v2994_v36  ;;  %v2265_v51 = vpack.i.bf16 %v3009_v42, %v2984_v32  ;;  %v2270_v52 = vpack.i.bf16 %v3012_v43, %v2981_v31  ;;  %v2275_v53 = vpack.i.bf16 %v3015_v44, %v2987_v33 }
 0x1b5   :  { %v3030_v50 = vpop.f32.mrb[4].mxu1  ;;  %v2290_v55 = vpack.i.bf16 %v3020_v46, %v2976_v29  ;;  %v2295_v56 = vpack.i.bf16 %v3023_v47, %v2981_v31  ;;  %v3049_v58 = vrot.slane %v2989_v34, 6  ;;  %v3052_v59 = vrot.slane %v2989_v34, 7 }
 0x1b6   :  { %4508 = vst [vmem:[#allocation7_spill] sm:$0xff] %v3030_v50  ;;  %2236 = vrot.lane.b32.xlu0 %v2235_v45, %s2854_s18  ;;  %v3039_v54 = vpop.f32.mrb[5].mxu1  ;;  %v477_v60 = vrot.slane %v2999_v38, 6  ;;  %v481_v61 = vrot.slane %v2999_v38, 7  ;;  %v2240_v62 = vpack.i.bf16 %v2964_v25, %v2967_v26  ;;  %v469_v63 = vrot.slane %v2999_v38, 4 }
 0x1b7   :  { %2231 = vrot.lane.b32.xlu1 %v2230_v49, %s2853_s2  ;;  %v4441_v0 = vrot.slane %v3030_v50, 3  ;;  %v4440_v9 = vrot.slane %v3030_v50, 5  ;;  %v473_v10 = vrot.slane %v2999_v38, 5  ;;  %v4442_v11 = vrot.slane %v3030_v50, 4 }
 0x1b8   :  { %v3067_v4 = vpack.i.bf16 %v477_v60, %v3009_v42  ;;  %v3070_v5 = vpack.i.bf16 %v481_v61, %v3015_v44  ;;  %v4439_v12 = vrot.slane %v3030_v50, 6  ;;  %v4438_v13 = vrot.slane %v3039_v54, 3 }
 0x1b9   :  { %v3060_v1 = vpop.f32.mrb[6].mxu1  ;;  %v3081_v8 = vpack.i.bf16 %v4441_v0, %v469_v63  ;;  %v4437_v14 = vrot.slane %v3039_v54, 4  ;;  %v3094_v16 = vpack.i.bf16 %v4440_v9, %v477_v60  ;;  %v3101_v18 = vpack.i.bf16 %v4442_v11, %v473_v10 }
 0x1ba   :  { %2246 = vrot.lane.b32.xlu0 %v2245_v37, %s2855_s19  ;;  %v3073_v6 = vpop.f32.mrb[7].mxu1  ;;  %v3105_v19 = vpack.i.bf16 %v4439_v12, %v481_v61  ;;  %v3110_v20 = vpack.i.bf16 %v4438_v13, %v3026_v48  ;;  %v4436_v35 = vrot.slane %v3039_v54, 5  ;;  %v3121_v37 = vpack.i.bf16 %v3060_v1, %v2953_v21 }
 0x1bb   :  { %2241 = vrot.lane.b32.xlu1 %v2240_v62, %s2854_s18  ;;  %v3116_v30 = vpack.i.bf16 %v4437_v14, %v3049_v58  ;;  %v3133_v49 = vrot.slane %v3060_v1, 3  ;;  %v3150_v14 = vrot.slane %v2989_v34, 2  ;;  %v3159_v61 = vrot.slane %v2989_v34, 1 }
 0x1bc   :  { %v3128_v45 = vpack.i.bf16 %v4436_v35, %v3052_v59  ;;  %v3144_v35 = vrot.slane %v3060_v1, 4  ;;  %v4445_v12 = vrot.slane %v2999_v38, 3  ;;  %v1118_v7 = vrot.slane %v3073_v6, 4 }
 0x1bd   :  { %v3090_v15 = vpop.f32.mrb[8].mxu1  ;;  %4512 = vst [vmem:[#allocation11_spill] sm:$0xff] %v3150_v14  ;;  %4513 = vst [vmem:[#allocation12_spill] sm:$0xff] %v3159_v61  ;;  %v2280_v9 = vpack.i.bf16 %v3150_v14, %v2970_v27  ;;  %v4444_v13 = vrot.slane %v3073_v6, 3  ;;  %v2285_v62 = vpack.i.bf16 %v3159_v61, %v2999_v38  ;;  %v4518_v31 = vpack.i.bf16 %v3026_v48, %v3009_v42 }
 0x1be   :  { %4509 = vst [vmem:[#allocation8_spill] sm:$0xff] %v3090_v15  ;;  %2256 = vrot.lane.b32.xlu0 %v2255_v39, %s2856_s20  ;;  %v3097_v17 = vpop.f32.mrb[9].mxu1  ;;  %v3190_v0 = vpack.i.bf16 %v3090_v15, %v2989_v34  ;;  %v1339_v57 = vrot.slane %v3090_v15, 5  ;;  %v4448_v3 = vrot.slane %v3090_v15, 4  ;;  %v3262_v42 = vrot.slane %v2999_v38, 2 }
 0x1bf   :  { %4510 = vst [vmem:[#allocation9_spill] sm:$0xff] %v3097_v17  ;;  %2251 = vrot.lane.b32.xlu1 %v2250_v40, %s2855_s19  ;;  %v3147_v40 = vrot.slane %v3060_v1, 7  ;;  %v3204_v27 = vpack.i.bf16 %v4444_v13, %v4445_v12  ;;  %v1306_v12 = vrot.slane %v3097_v17, 4  ;;  %v4452_v26 = vrot.slane %v3097_v17, 3 }
 0x1c0   :  { %v1314_v13 = vrot.slane %v3097_v17, 6  ;;  %4521 = vst [vmem:[#allocation18_spill] sm:$0xff] %v3262_v42  ;;  %v698_v23 = vrot.slane %v3030_v50, 7 }
 0x1c1   :  { %v3123_v39 = vpop.f32.mrb[10].mxu1 }
 0x1c2   :  { %4511 = vst [vmem:[#allocation10_spill] sm:$0xff] %v3123_v39  ;;  %2261 = vrot.lane.b32.xlu0 %v2260_v41, %s2856_s20  ;;  %v3136_v60 = vpop.f32.mrb[11].mxu1  ;;  %v3153_v41 = vrot.slane %v3060_v1, 6  ;;  %v1523_v21 = vrot.slane %v3123_v39, 4 }
 0x1c3   :  { %2266 = vrot.lane.b32.xlu1 %v2265_v51, %s2857_s21  ;;  %v3156_v51 = vrot.slane %v3060_v1, 5 }
 0x1c5   :  { %v3270_v34 = vpack.i.bf16 %v4452_v26, %v3156_v51  ;;  %v4458_v26 = vrot.slane %v3030_v50, 2 }
 0x1c6   :  { %2271 = vrot.lane.b32.xlu0 %v2270_v52, %s2857_s21  ;;  %v1122_v52 = vrot.slane %v3073_v6, 5 }
 0x1c7   :  { %2276 = vrot.lane.b32.xlu1 %v2275_v53, %s2858_s22  ;;  %v3196_v53 = vpack.i.bf16 %v1118_v7, %v469_v63  ;;  %v4443_v63 = vrot.slane %v3090_v15, 3  ;;  %4523 = vst [vmem:[#allocation20_spill] sm:$0xff] %v3270_v34 }
 0x1c8   :  { %v3207_v11 = vpack.i.bf16 %v1122_v52, %v473_v10  ;;  %v4447_v10 = vrot.slane %v3073_v6, 7 }
 0x1c9   :  { %v3214_v2 = vpack.i.bf16 %v4443_v63, %v1118_v7  ;;  %v3232_v63 = vrot.slane %v3090_v15, 7 }
 0x1ca   :  { %2281 = vrot.lane.b32.xlu0 %v2280_v9, %s2853_s2  ;;  %v1126_v9 = vrot.slane %v3073_v6, 6 }
 0x1cb   :  { %2286 = vrot.lane.b32.xlu1 %v2285_v62, %s2852_s1  ;;  %4514 = vst [vmem:[#allocation13_spill] sm:$0xff] %v3214_v2  ;;  %v1343_v62 = vrot.slane %v3090_v15, 6 }
 0x1cc   :  { %v3229_v7 = vpack.i.bf16 %v1339_v57, %v1126_v9 }
 0x1cd   :  { %v3236_v29 = vpack.i.bf16 %v1343_v62, %v4447_v10  ;;  %v4519_v10 = vpack.i.bf16 %v3049_v58, %v3015_v44  ;;  %v3273_v44 = vrot.slane %v3097_v17, 7 }
 0x1ce   :  { %2291 = vrot.lane.b32.xlu0 %v2290_v55, %s2854_s18  ;;  %4515 = vst [vmem:[#allocation14_spill] sm:$0xff] %v3229_v7  ;;  %v3240_v55 = vpack.i.bf16 %v4448_v3, %v1122_v52  ;;  %v3256_v52 = vpack.i.bf16 %v1306_v12, %v3153_v41  ;;  %v3278_v3 = vpack.i.bf16 %v1314_v13, %v1126_v9 }
 0x1cf   :  { %2296 = vrot.lane.b32.xlu1 %v2295_v56, %s2855_s19  ;;  %4516 = vst [vmem:[#allocation15_spill] sm:$0xff] %v3236_v29  ;;  %v1310_v56 = vrot.slane %v3097_v17, 5 }
 0x1d0   :  { %4517 = vst [vmem:[#allocation16_spill] sm:$0xff] %v3240_v55  ;;  %4520 = vst [vmem:[#allocation17_spill] sm:$0xff] %v3256_v52  ;;  %v1519_v52 = vrot.slane %v3123_v39, 3  ;;  %v1527_v55 = vrot.slane %v3123_v39, 5 }
 0x1d1   :  { %4525 = vst [vmem:[#allocation22_spill] sm:$0xff] %v3278_v3  ;;  %v3293_v9 = vpack.i.bf16 %v1523_v21, %v1310_v56  ;;  %v1535_v3 = vrot.slane %v3123_v39, 7 }
 0x1d2   :  { %2301 = vrot.lane.b32.xlu0 %v4518_v31, %s2856_s20  ;;  %v3265_v31 = vpack.i.bf16 %v1310_v56, %v3147_v40  ;;  %v3310_v56 = vpack.i.bf16 %v1519_v52, %v1306_v12  ;;  %v3316_v2 = vpack.i.bf16 %v1527_v55, %v1314_v13  ;;  %v4535_v12 = vrot.slane %v2999_v38, 3 }
 0x1d3   :  { %2311 = vrot.lane.b32.xlu1 %v4519_v10, %s2857_s21  ;;  %v3276_v10 = vrot.slane %v3030_v50, 1  ;;  %4527 = vst [vmem:[#allocation23_spill] sm:$0xff] %v3293_v9  ;;  %v4531_v9 = vrot.slane %v3030_v50, 3  ;;  %v4539_v13 = vrot.slane %v3039_v54, 4 }
 0x1d4   :  { %4522 = vst [vmem:[#allocation19_spill] sm:$0xff] %v3265_v31  ;;  %v4526_v31 = vpack.i.bf16 %v3052_v59, %v3012_v43  ;;  %4532 = vst [vmem:[#allocation26_spill] sm:$0xff] %v3316_v2 }
 0x1d5   :  { %4524 = vst [vmem:[#allocation21_spill] sm:$0xff] %v3276_v10  ;;  %v2330_v34 = vpack.i.bf16 %v3276_v10, %v3262_v42  ;;  %v3314_v7 = vpack.i.bf16 %v1519_v52, %v4531_v9  ;;  %v2335_v52 = vpack.i.bf16 %v4458_v26, %v4535_v12 }
 0x1d6   :  { %2306 = vrot.lane.b32.xlu0 %v4526_v31, %s2852_s1  ;;  %v4528_v31 = vrot.slane %v3030_v50, 4 }
 0x1d7   :  { %2316 = vrot.lane.b32.xlu1 %v3067_v4, %s2858_s22  ;;  %v3306_v4 = vpack.i.bf16 %v1535_v3, %v698_v23  ;;  %v4533_v23 = vrot.slane %v3030_v50, 5 }
 0x1d8   :  { %v3301_v29 = vpack.i.bf16 %v1523_v21, %v4528_v31  ;;  %v3320_v21 = vrot.slane %v3123_v39, 6  ;;  %v1490_v31 = vrot.slane %v3136_v60, 3 }
 0x1d9   :  { %4530 = vst [vmem:[#allocation25_spill] sm:$0xff] %v3306_v4  ;;  %v3325_v3 = vpack.i.bf16 %v1527_v55, %v4533_v23  ;;  %v4537_v55 = vpack.i.bf16 %v3030_v50, %v3052_v59  ;;  %v1502_v59 = vrot.slane %v3136_v60, 6 }
 0x1da   :  { %4529 = vst [vmem:[#allocation24_spill] sm:$0xff] %v3301_v29  ;;  %2321 = vrot.lane.b32.xlu0 %v3070_v5, %s2852_s1  ;;  %v1494_v5 = vrot.slane %v3136_v60, 4  ;;  %v665_v29 = vrot.slane %v3039_v54, 6  ;;  %v3344_v23 = vpack.i.bf16 %v1490_v31, %v1339_v57  ;;  %v1498_v57 = vrot.slane %v3136_v60, 5 }
 0x1db   :  { %2331 = vrot.lane.b32.xlu1 %v2330_v34, %s2853_s2  ;;  %4534 = vst [vmem:[#allocation27_spill] sm:$0xff] %v3325_v3  ;;  %v4536_v34 = vrot.slane %v3030_v50, 6  ;;  %v4538_v3 = vrot.slane %v3039_v54, 3 }
 0x1dc   :  { %v3350_v26 = vpack.i.bf16 %v1494_v5, %v1343_v62  ;;  %v3354_v2 = vpack.i.bf16 %v1494_v5, %v4539_v13  ;;  %v3364_v62 = vpack.i.bf16 %v1502_v59, %v665_v29  ;;  %v4542_v5 = vrot.slane %v3039_v54, 5 }
 0x1dd   :  { %v3337_v9 = vpack.i.bf16 %v3320_v21, %v4536_v34  ;;  %v3348_v12 = vpack.i.bf16 %v1490_v31, %v4538_v3  ;;  %v1506_v31 = vrot.slane %v3136_v60, 7  ;;  %v3367_v3 = vpack.i.bf16 %v1498_v57, %v3232_v63 }
 0x1de   :  { %2326 = vrot.lane.b32.xlu0 %v4537_v55, %s2858_s22  ;;  %v669_v55 = vrot.slane %v3039_v54, 7  ;;  %4540 = vst [vmem:[#allocation28_spill] sm:$0xff] %v3364_v62  ;;  %v3371_v13 = vpack.i.bf16 %v1498_v57, %v4542_v5  ;;  %v3390_v29 = vrot.slane %v3039_v54, 1  ;;  %v4549_v57 = vpack.i.bf16 %v3133_v49, %v3020_v46 }
 0x1df   :  { %2341 = vrot.lane.b32.xlu1 %v3081_v8, %s2855_s19  ;;  %4541 = vst [vmem:[#allocation29_spill] sm:$0xff] %v3367_v3  ;;  %v3456_v5 = vrot.slane %v3073_v6, 1 }
 0x1e0   :  { %4543 = vst [vmem:[#allocation30_spill] sm:$0xff] %v3371_v13  ;;  %v3374_v34 = vpack.i.bf16 %v1506_v31, %v669_v55  ;;  %4545 = vst [vmem:[#allocation32_spill] sm:$0xff] %v3390_v29  ;;  %v4550_v55 = vpack.i.bf16 %v3144_v35, %v3023_v47  ;;  %v4580_v13 = vld [vmem:[#allocation22_spill] sm:$0xff] }
 0x1e1   :  { %4553 = vst [vmem:[#allocation34_spill] sm:$0xff] %v3456_v5 }
 0x1e2   :  { %2336 = vrot.lane.b32.xlu0 %v2335_v52, %s2854_s18  ;;  %4544 = vst [vmem:[#allocation31_spill] sm:$0xff] %v3374_v34  ;;  %v4583_v34 = vrot.slane %v3097_v17, 3 }
 0x1e3   :  { %2356 = vrot.lane.b32.xlu1 %v3081_v8, %s2854_s18  ;;  %v2385_v8 = vpack.i.bf16 %v3390_v29, %v3020_v46  ;;  %v4552_v46 = vpack.i.bf16 %v3147_v40, %v3012_v43  ;;  %v3469_v43 = vrot.slane %v2999_v38, 1 }
 0x1e6   :  { %2346 = vrot.lane.b32.xlu0 %v2335_v52, %s2853_s2 }
 0x1e7   :  { %2361 = vrot.lane.b32.xlu1 %v3094_v16, %s2857_s21 }
 0x1ea   :  { %2351 = vrot.lane.b32.xlu0 %v3101_v18, %s2856_s20 }
 0x1eb   :  { %2366 = vrot.lane.b32.xlu1 %v3101_v18, %s2855_s19  ;;  %v3399_v18 = vrot.slane %v3039_v54, 2 }
 0x1ee   :  { %2371 = vrot.lane.b32.xlu0 %v3105_v19, %s2858_s22 }
 0x1ef   :  { %2376 = vrot.lane.b32.xlu1 %v3094_v16, %s2856_s20  ;;  %v2390_v16 = vpack.i.bf16 %v3399_v18, %v3023_v47  ;;  %v4554_v47 = vpack.i.bf16 %v3153_v41, %v3049_v58  ;;  %v2495_v58 = vpack.i.bf16 %v3456_v5, %v3469_v43 }
 0x1f2   :  { %2396 = vrot.lane.b32.xlu0 %v3110_v20, %s2855_s19 }
 0x1f3   :  { %2381 = vrot.lane.b32.xlu1 %v3105_v19, %s2857_s21  ;;  %v3412_v19 = vrot.slane %v3060_v1, 1 }
 0x1f5   :  { %v2430_v20 = vpack.i.bf16 %v3412_v19, %v3073_v6  ;;  %v2440_v59 = vpack.i.bf16 %v3412_v19, %v3159_v61 }
 0x1f6   :  { %2401 = vrot.lane.b32.xlu0 %v3116_v30, %s2856_s20  ;;  %v3419_v30 = vrot.slane %v3060_v1, 2 }
 0x1f7   :  { %2386 = vrot.lane.b32.xlu1 %v2385_v8, %s2853_s2  ;;  %v2490_v8 = vpack.i.bf16 %v3456_v5, %v2994_v36 }
 0x1f8   :  { %4546 = vst [vmem:[#allocation33_spill] sm:$0xff] %v3419_v30  ;;  %v2425_v52 = vpack.i.bf16 %v3419_v30, %v2973_v28  ;;  %v2450_v31 = vpack.i.bf16 %v3419_v30, %v3150_v14 }
 0x1fa   :  { %2406 = vrot.lane.b32.xlu0 %v3128_v45, %s2857_s21  ;;  %v4547_v45 = vpack.i.bf16 %v3073_v6, %v2955_v22 }
 0x1fb   :  { %2391 = vrot.lane.b32.xlu1 %v2390_v16, %s2854_s18  ;;  %v4556_v16 = vpack.i.bf16 %v3153_v41, %v2987_v33  ;;  %v4559_v41 = vrot.slane %v3073_v6, 7 }
 0x1fe   :  { %2411 = vrot.lane.b32.xlu0 %v3121_v37, %s2852_s1 }
 0x1ff   :  { %2416 = vrot.lane.b32.xlu1 %v3121_v37, %s2858_s22  ;;  %v4548_v37 = vpack.i.bf16 %v3133_v49, %v2961_v24  ;;  %v4551_v24 = vpack.i.bf16 %v3144_v35, %v2964_v25  ;;  %v4555_v25 = vpack.i.bf16 %v3156_v51, %v2984_v32  ;;  %v4558_v32 = vpack.i.bf16 %v3156_v51, %v3026_v48 }
 0x202   :  { %2431 = vrot.lane.b32.xlu0 %v2430_v20, %s2852_s1  ;;  %v3479_v20 = vrot.slane %v3073_v6, 2 }
 0x203   :  { %2421 = vrot.lane.b32.xlu1 %v4547_v45, %s2858_s22 }
 0x204   :  { %4557 = vst [vmem:[#allocation35_spill] sm:$0xff] %v3479_v20  ;;  %v2500_v45 = vpack.i.bf16 %v3479_v20, %v3262_v42  ;;  %v3579_v42 = vrot.slane %v3097_v17, 1 }
 0x206   :  { %2436 = vrot.lane.b32.xlu0 %v4548_v37, %s2854_s18  ;;  %v2605_v5 = vpack.i.bf16 %v3579_v42, %v3133_v49 }
 0x207   :  { %2426 = vrot.lane.b32.xlu1 %v2425_v52, %s2853_s2  ;;  %v2520_v52 = vpack.i.bf16 %v4559_v41, %v3276_v10 }
 0x20a   :  { %2461 = vrot.lane.b32.xlu0 %v4549_v57, %s2855_s19 }
 0x20b   :  { %2441 = vrot.lane.b32.xlu1 %v2440_v59, %s2853_s2 }
 0x20e   :  { %2471 = vrot.lane.b32.xlu0 %v4550_v55, %s2856_s20  ;;  %v4560_v55 = vrot.slane %v3073_v6, 3 }
 0x20f   :  { %2446 = vrot.lane.b32.xlu1 %v4551_v24, %s2855_s19 }
 0x212   :  { %2476 = vrot.lane.b32.xlu0 %v4552_v46, %s2858_s22  ;;  %v4562_v46 = vpack.i.bf16 %v3097_v17, %v2999_v38 }
 0x213   :  { %2451 = vrot.lane.b32.xlu1 %v2450_v31, %s2854_s18  ;;  %v3524_v31 = vrot.slane %v3090_v15, 1 }
 0x215   :  { %4561 = vst [vmem:[#allocation36_spill] sm:$0xff] %v3524_v31  ;;  %v2560_v41 = vpack.i.bf16 %v3524_v31, %v3097_v17 }
 0x216   :  { %2486 = vrot.lane.b32.xlu0 %v4554_v47, %s2858_s22  ;;  %v4563_v47 = vld [vmem:[#allocation13_spill] sm:$0xff] }
 0x217   :  { %2456 = vrot.lane.b32.xlu1 %v4555_v25, %s2856_s20 }
 0x21a   :  { %2491 = vrot.lane.b32.xlu0 %v2490_v8, %s2852_s1 }
 0x21b   :  { %2466 = vrot.lane.b32.xlu1 %v4556_v16, %s2857_s21 }
 0x21e   :  { %2496 = vrot.lane.b32.xlu0 %v2495_v58, %s2853_s2 }
 0x21f   :  { %2481 = vrot.lane.b32.xlu1 %v4558_v32, %s2857_s21  ;;  %v4564_v32 = vld [vmem:[#allocation14_spill] sm:$0xff] }
 0x220   :  { %4569 = vst [vmem:[#allocation14_spill] sm:$0xff] %v3579_v42 }
 0x222   :  { %2511 = vrot.lane.b32.xlu0 %v3196_v53, %s2856_s20  ;;  %v4460_v53 = vrot.slane %v3090_v15, 2 }
 0x223   :  { %2501 = vrot.lane.b32.xlu1 %v2500_v45, %s2854_s18 }
 0x224   :  { %v3491_v33 = vpop.permute.xlu0 %2221 }
 0x225   :  { %v3496_v37 = vpop.permute.xlu1 %2226 }
 0x226   :  { %2521 = vrot.lane.b32.xlu0 %v2520_v52, %s2852_s1 }
 0x227   :  { %2506 = vrot.lane.b32.xlu1 %v3204_v27, %s2855_s19  ;;  %v2545_v27 = vpack.i.bf16 %v4460_v53, %v4560_v55  ;;  %v4565_v55 = vld [vmem:[#allocation15_spill] sm:$0xff]  ;;  %v4568_v53 = vpack.i.bf16 %v3232_v63, %v3147_v40  ;;  %v2615_v40 = vpack.i.bf16 %v3579_v42, %v3469_v43 }
 0x228   :  { %v3501_v48 = vpop.permute.xlu0 %2236 }
 0x229   :  { %v3503_v51 = vpop.permute.xlu1 %2231 }
 0x22a   :  { %2526 = vrot.lane.b32.xlu0 %v3190_v0, %s2852_s1 }
 0x22b   :  { %2516 = vrot.lane.b32.xlu1 %v3207_v11, %s2857_s21 }
 0x22c   :  { %v3510_v59 = vpop.permute.xlu0 %2246 }
 0x22d   :  { %v3512_v57 = vpop.permute.xlu1 %2241 }
 0x22e   :  { %2531 = vrot.lane.b32.xlu0 %v3190_v0, %s2858_s22  ;;  %v2540_v0 = vpack.i.bf16 %v3524_v31, %v3479_v20 }
 0x22f   :  { %2546 = vrot.lane.b32.xlu1 %v2545_v27, %s2854_s18 }
 0x230   :  { %v3521_v24 = vpop.permute.xlu0 %2256 }
 0x231   :  { %v3526_v11 = vpop.permute.xlu1 %2251 }
 0x232   :  { %2536 = vrot.lane.b32.xlu0 %v4562_v46, %s2858_s22 }
 0x233   :  { %2551 = vrot.lane.b32.xlu1 %v4563_v47, %s2855_s19 }
 0x234   :  { %v3534_v25 = vpop.permute.xlu0 %2261 }
 0x235   :  { %v3538_v8 = vpop.permute.xlu1 %2266 }
 0x236   :  { %2541 = vrot.lane.b32.xlu0 %v2540_v0, %s2853_s2  ;;  %v4567_v0 = vld [vmem:[#allocation16_spill] sm:$0xff] }
 0x237   :  { %2571 = vrot.lane.b32.xlu1 %v4563_v47, %s2854_s18 }
 0x238   :  { %v3543_v16 = vpop.permute.xlu0 %2271 }
 0x239   :  { %v3545_v58 = vpop.permute.xlu1 %2276 }
 0x23a   :  { %2556 = vrot.lane.b32.xlu0 %v2545_v27, %s2853_s2  ;;  %v3564_v27 = vrot.slane %v3097_v17, 2 }
 0x23b   :  { %2576 = vrot.lane.b32.xlu1 %v4564_v32, %s2857_s21 }
 0x23c   :  { %v3550_v45 = vpop.permute.xlu0 %2281  ;;  %4566 = vst [vmem:[#allocation13_spill] sm:$0xff] %v3564_v27  ;;  %v2610_v30 = vpack.i.bf16 %v3564_v27, %v3144_v35 }
 0x23d   :  { %v3554_v52 = vpop.permute.xlu1 %2286 }
 0x23e   :  { %2561 = vrot.lane.b32.xlu0 %v2560_v41, %s2852_s1 }
 0x23f   :  { %2586 = vrot.lane.b32.xlu1 %v4565_v55, %s2858_s22 }
 0x240   :  { %v3559_v46 = vpop.permute.xlu0 %2291 }
 0x241   :  { %v3561_v47 = vpop.permute.xlu1 %2296 }
 0x242   :  { %2566 = vrot.lane.b32.xlu0 %v4567_v0, %s2856_s20 }
 0x243   :  { %2596 = vrot.lane.b32.xlu1 %v4568_v53, %s2852_s1 }
 0x244   :  { %v3572_v10 = vpop.permute.xlu0 %2301 }
 0x245   :  { %v3574_v41 = vpop.permute.xlu1 %2311 }
 0x246   :  { %2581 = vrot.lane.b32.xlu0 %v4567_v0, %s2855_s19 }
 0x247   :  { %2611 = vrot.lane.b32.xlu1 %v2610_v30, %s2854_s18  ;;  %v4570_v30 = vld [vmem:[#allocation17_spill] sm:$0xff] }
 0x248   :  { %v3584_v20 = vpop.permute.xlu0 %2306 }
 0x249   :  { %v3586_v31 = vpop.permute.xlu1 %2316 }
 0x24a   :  { %2591 = vrot.lane.b32.xlu0 %v4564_v32, %s2856_s20  ;;  %v4573_v32 = vld [vmem:[#allocation19_spill] sm:$0xff] }
 0x24b   :  { %2616 = vrot.lane.b32.xlu1 %v2615_v40, %s2852_s1 }
 0x24c   :  { %v3593_v35 = vpop.permute.xlu0 %2321 }
 0x24d   :  { %v3595_v53 = vpop.permute.xlu1 %2331 }
 0x24e   :  { %2601 = vrot.lane.b32.xlu0 %v4565_v55, %s2857_s21  ;;  %v3615_v55 = vrot.slane %v3123_v39, 1 }
 0x24f   :  { %2626 = vrot.lane.b32.xlu1 %v4570_v30, %s2856_s20  ;;  %v2334_v30 = vunpack.i.h.bf16 %v3595_v53 }
 0x250   :  { %v3601_v0 = vpop.permute.xlu0 %2326  ;;  %4575 = vst [vmem:[#allocation19_spill] sm:$0xff] %v3615_v55 }
 0x251   :  { %4571 = vst [vmem:[#allocation15_spill] sm:$0xff] %v3601_v0  ;;  %v3605_v14 = vpop.permute.xlu1 %2341  ;;  %v4576_v0 = vld [vmem:[#allocation20_spill] sm:$0xff] }
 0x252   :  { %4572 = vst [vmem:[#allocation16_spill] sm:$0xff] %v3605_v14  ;;  %2606 = vrot.lane.b32.xlu0 %v2605_v5, %s2853_s2  ;;  %v4577_v5 = vpack.i.bf16 %v3123_v39, %v3232_v63 }
 0x253   :  { %2631 = vrot.lane.b32.xlu1 %v4573_v32, %s2857_s21 }
 0x254   :  { %v3610_v40 = vpop.permute.xlu0 %2336 }
 0x255   :  { %v3612_v61 = vpop.permute.xlu1 %2356  ;;  %v2339_v49 = vunpack.i.h.bf16 %v3610_v40 }
 0x256   :  { %4574 = vst [vmem:[#allocation17_spill] sm:$0xff] %v3612_v61  ;;  %2621 = vrot.lane.b32.xlu0 %v4576_v0, %s2855_s19  ;;  %v2660_v61 = vpack.i.bf16 %v3615_v55, %v3564_v27  ;;  %v709_v0 = vsel %vm319_vm1, %v3030_v50, %v2334_v30  ;;  %v4584_v30 = vrot.slane %v3123_v39, 2 }
 0x257   :  { %2651 = vrot.lane.b32.xlu1 %v4577_v5, %s2858_s22  ;;  %v710_v63 = vsel %vm321_vm2, %v709_v0, %v2339_v49  ;;  %v2344_v5 = vunpack.i.h.bf16 %v3605_v14  ;;  %v2229_v14 = vunpack.i.h.bf16 %v3496_v37 }
 0x258   :  { %v3625_v32 = vpop.permute.xlu0 %2346  ;;  %v2675_v62 = vpack.i.bf16 %v4584_v30, %v4583_v34  ;;  %v4590_v30 = vld [vmem:[#allocation23_spill] sm:$0xff] }
 0x259   :  { %4578 = vst [vmem:[#allocation20_spill] sm:$0xff] %v3625_v32  ;;  %v3627_v42 = vpop.permute.xlu1 %2361 }
 0x25a   :  { %4579 = vst [vmem:[#allocation37_spill] sm:$0xff] %v3627_v42  ;;  %2636 = vrot.lane.b32.xlu0 %v4580_v13, %s2858_s22  ;;  %v711_v13 = vsel %vm323_vm3, %v710_v63, %v2344_v5  ;;  %v2364_v0 = vunpack.i.h.bf16 %v3627_v42  ;;  %v4588_v5 = vpack.i.bf16 %v3123_v39, %v3030_v50 }
 0x25b   :  { %2661 = vrot.lane.b32.xlu1 %v2660_v61, %s2853_s2  ;;  %v4585_v61 = vpack.i.bf16 %v3273_v44, %v3039_v54 }
 0x25c   :  { %v3639_v32 = vpop.permute.xlu0 %2351 }
 0x25d   :  { %4581 = vst [vmem:[#allocation22_spill] sm:$0xff] %v3639_v32  ;;  %v2354_v27 = vunpack.i.h.bf16 %v3639_v32  ;;  %v3642_v3 = vpop.permute.xlu1 %2366  ;;  %v4604_v32 = vld [vmem:[#allocation26_spill] sm:$0xff] }
 0x25e   :  { %4582 = vst [vmem:[#allocation38_spill] sm:$0xff] %v3642_v3  ;;  %2641 = vrot.lane.b32.xlu0 %v4585_v61, %s2858_s22 }
 0x25f   :  { %v712_v49 = vsel %vm325_vm4, %v711_v13, %v2354_v27  ;;  %2676 = vrot.lane.b32.xlu1 %v2675_v62, %s2853_s2 }
 0x260   :  { %v3656_v3 = vpop.permute.xlu0 %2371  ;;  %v713_v63 = vsel %vm327_vm5, %v712_v49, %v2364_v0  ;;  %v4593_v49 = vpack.i.bf16 %v3136_v60, %v3039_v54 }
 0x261   :  { %4586 = vst [vmem:[#allocation39_spill] sm:$0xff] %v3656_v3  ;;  %v2374_v17 = vunpack.i.h.bf16 %v3656_v3  ;;  %v3659_v34 = vpop.permute.xlu1 %2376  ;;  %v4599_v3 = vrot.slane %v3090_v15, 3 }
 0x262   :  { %4587 = vst [vmem:[#allocation40_spill] sm:$0xff] %v3659_v34  ;;  %2646 = vrot.lane.b32.xlu0 %v4588_v5, %s2852_s1  ;;  %v2690_v34 = vpack.i.bf16 %v3615_v55, %v3273_v44 }
 0x263   :  { %v3667_v27 = vsel %vm329_vm6, %v713_v63, %v2374_v17  ;;  %2681 = vrot.lane.b32.xlu1 %v4590_v30, %s2856_s20 }
 0x264   :  { %4589 = vst [vmem:[#allocation41_spill] sm:$0xff] %v3667_v27  ;;  %v3671_v13 = vpop.permute.xlu0 %2396 }
 0x265   :  { %4591 = vst [vmem:[#allocation23_spill] sm:$0xff] %v3671_v13  ;;  %v3673_v61 = vpop.permute.xlu1 %2381  ;;  %v2399_v27 = vunpack.i.h.bf16 %v3671_v13 }
 0x266   :  { %4592 = vst [vmem:[#allocation42_spill] sm:$0xff] %v3673_v61  ;;  %2656 = vrot.lane.b32.xlu0 %v4593_v49, %s2852_s1  ;;  %v3700_v49 = vrot.slane %v3136_v60, 2 }
 0x267   :  { %2691 = vrot.lane.b32.xlu1 %v2690_v34, %s2852_s1 }
 0x268   :  { %v3682_v0 = vpop.permute.xlu0 %2401 }
 0x269   :  { %4594 = vst [vmem:[#allocation43_spill] sm:$0xff] %v3682_v0  ;;  %v3684_v17 = vpop.permute.xlu1 %2386 }
 0x26a   :  { %4595 = vst [vmem:[#allocation44_spill] sm:$0xff] %v3684_v17  ;;  %v2389_v63 = vunpack.i.h.bf16 %v3684_v17  ;;  %2666 = vrot.lane.b32.xlu0 %v2675_v62, %s2854_s18  ;;  %v2223_v62 = vunpack.i.l.bf16 %v3491_v33 }
 0x26b   :  { %2716 = vrot.lane.b32.xlu1 %v3306_v4, %s2852_s1 }
 0x26c   :  { %v702_v5 = vsel %vm319_vm1, %v3039_v54, %v2389_v63  ;;  %v3692_v50 = vpop.permute.xlu0 %2406  ;;  %v3707_v54 = vrot.slane %v3136_v60, 1  ;;  %v2404_v63 = vunpack.i.h.bf16 %v3682_v0 }
 0x26d   :  { %4596 = vst [vmem:[#allocation45_spill] sm:$0xff] %v3692_v50  ;;  %v3694_v55 = vpop.permute.xlu1 %2391 }
 0x26e   :  { %4597 = vst [vmem:[#allocation46_spill] sm:$0xff] %v3694_v55  ;;  %v2394_v34 = vunpack.i.h.bf16 %v3694_v55  ;;  %2671 = vrot.lane.b32.xlu0 %v3310_v56, %s2855_s19  ;;  %4598 = vst [vmem:[#allocation47_spill] sm:$0xff] %v3707_v54  ;;  %v2409_v55 = vunpack.i.h.bf16 %v3692_v50  ;;  %v2750_v13 = vpack.i.bf16 %v3707_v54, %v4599_v3  ;;  %v4600_v3 = vrot.slane %v3090_v15, 4  ;;  %v4605_v54 = vld [vmem:[#allocation24_spill] sm:$0xff] }
 0x26f   :  { %2721 = vrot.lane.b32.xlu1 %v3314_v7, %s2853_s2  ;;  %v2228_v7 = vunpack.i.l.bf16 %v3496_v37  ;;  %v2248_v15 = vunpack.i.l.bf16 %v3510_v59 }
 0x270   :  { %v703_v39 = vsel %vm321_vm2, %v702_v5, %v2394_v34  ;;  %v2412_v61 = vpop.permute.xlu0 %2411  ;;  %v2239_v5 = vunpack.i.h.bf16 %v3501_v48 }
 0x271   :  { %v704_v17 = vsel %vm323_vm3, %v703_v39, %v2399_v27  ;;  %v2417_v42 = vpop.permute.xlu1 %2416  ;;  %v384_v39 = vsel %vm319_vm1, %v2223_v62, %v2994_v36  ;;  %v3730_v27 = vpack.i.bf16 %v3700_v49, %v4600_v3  ;;  %v2233_v36 = vunpack.i.l.bf16 %v3503_v51 }
 0x272   :  { %2686 = vrot.lane.b32.xlu0 %v3310_v56, %s2854_s18  ;;  %v705_v34 = vsel %vm325_vm4, %v704_v17, %v2404_v63  ;;  %v2238_v17 = vunpack.i.l.bf16 %v3501_v48  ;;  %v2249_v62 = vunpack.i.h.bf16 %v3510_v59  ;;  %v2243_v3 = vunpack.i.l.bf16 %v3512_v57 }
 0x273   :  { %2731 = vrot.lane.b32.xlu1 %v3306_v4, %s2858_s22  ;;  %v3735_v56 = vsel %vm327_vm5, %v705_v34, %v2409_v55  ;;  %v2419_v4 = vunpack.i.h.bf16 %v2417_v42  ;;  %v2224_v55 = vunpack.i.h.bf16 %v3491_v33  ;;  %v4603_v34 = vld [vmem:[#allocation2_spill] sm:$0xff]  ;;  %v2414_v0 = vunpack.i.h.bf16 %v2412_v61 }
 0x274   :  { %4601 = vst [vmem:[#allocation48_spill] sm:$0xff] %v3735_v56  ;;  %v3741_v63 = vpop.permute.xlu0 %2431  ;;  %v333_v48 = vsel %vm319_vm1, %v4603_v34, %v2228_v7  ;;  %v385_v56 = vsel %vm321_vm2, %v384_v39, %v2229_v14  ;;  %v2234_v59 = vunpack.i.h.bf16 %v3503_v51  ;;  %v2413_v38 = vunpack.i.l.bf16 %v2412_v61 }
 0x275   :  { %4602 = vst [vmem:[#allocation49_spill] sm:$0xff] %v3741_v63  ;;  %v2434_v37 = vunpack.i.h.bf16 %v3741_v63  ;;  %v3746_v50 = vpop.permute.xlu1 %2421  ;;  %v2418_v29 = vunpack.i.l.bf16 %v2417_v42  ;;  %v334_v33 = vsel %vm321_vm2, %v333_v48, %v2238_v17  ;;  %v386_v7 = vsel %vm323_vm3, %v385_v56, %v2239_v5 }
 0x276   :  { %2696 = vrot.lane.b32.xlu0 %v4604_v32, %s2857_s21  ;;  %v320_v14 = vsel %vm319_vm1, %v2955_v22, %v2233_v36  ;;  %v2244_v39 = vunpack.i.h.bf16 %v3512_v57  ;;  %v335_v51 = vsel %vm323_vm3, %v334_v33, %v2248_v15  ;;  %v387_v42 = vsel %vm325_vm4, %v386_v7, %v2249_v62  ;;  %v4606_v22 = vld [vmem:[#allocation3_spill] sm:$0xff] }
 0x277   :  { %v3756_v63 = vsel %vm319_vm1, %v2419_v4, %v2434_v37  ;;  %2736 = vrot.lane.b32.xlu1 %v4605_v54, %s2854_s18  ;;  %v322_v4 = vsel %vm321_vm2, %v320_v14, %v2243_v3  ;;  %v2259_v61 = vunpack.i.h.bf16 %v3521_v24  ;;  %v2258_v54 = vunpack.i.l.bf16 %v3521_v24 }
 0x278   :  { %v2437_v34 = vpop.permute.xlu0 %2436  ;;  %v1228_v5 = vsel %vm319_vm1, %v2414_v0, %v3412_v19  ;;  %v391_v15 = vsel %vm319_vm1, %v2413_v38, %v4606_v22  ;;  %v449_v57 = vsel %vm319_vm1, %v2418_v29, %v2224_v55  ;;  %v2253_v3 = vunpack.i.l.bf16 %v3526_v11 }
 0x279   :  { %v2427_v37 = vpop.permute.xlu1 %2426  ;;  %v2439_v36 = vunpack.i.h.bf16 %v2437_v34  ;;  %v2438_v62 = vunpack.i.l.bf16 %v2437_v34  ;;  %v2269_v24 = vunpack.i.h.bf16 %v3538_v8  ;;  %v2279_v38 = vunpack.i.h.bf16 %v3545_v58 }
 0x27a   :  { %v2429_v56 = vunpack.i.h.bf16 %v2427_v37  ;;  %v2428_v17 = vunpack.i.l.bf16 %v2427_v37  ;;  %2701 = vrot.lane.b32.xlu0 %v4590_v30, %s2855_s19  ;;  %v2263_v30 = vunpack.i.l.bf16 %v3534_v25  ;;  %v450_v7 = vsel %vm321_vm2, %v449_v57, %v2973_v28 }
 0x27b   :  { %2751 = vrot.lane.b32.xlu1 %v2750_v13, %s2853_s2  ;;  %v2268_v13 = vunpack.i.l.bf16 %v3538_v8  ;;  %v388_v37 = vsel %vm327_vm5, %v387_v42, %v2259_v61  ;;  %v4607_v8 = vpack.i.bf16 %v3700_v49, %v3399_v18  ;;  %v336_v28 = vsel %vm325_vm4, %v335_v51, %v2258_v54 }
 0x27c   :  { %v1229_v19 = vsel %vm321_vm2, %v1228_v5, %v2429_v56  ;;  %v392_v0 = vsel %vm321_vm2, %v391_v15, %v2428_v17  ;;  %v3782_v48 = vpop.permute.xlu0 %2461  ;;  %v2254_v5 = vunpack.i.h.bf16 %v3526_v11  ;;  %v2273_v56 = vunpack.i.l.bf16 %v3543_v16  ;;  %v4608_v15 = vld [vmem:[#allocation5_spill] sm:$0xff] }
 0x27d   :  { %v2442_v33 = vpop.permute.xlu1 %2441  ;;  %v393_v29 = vsel %vm323_vm3, %v392_v0, %v2438_v62  ;;  %v1230_v55 = vsel %vm323_vm3, %v1229_v19, %v2439_v36  ;;  %v2278_v17 = vunpack.i.l.bf16 %v3545_v58  ;;  %v389_v22 = vsel %vm329_vm6, %v388_v37, %v2269_v24 }
 0x27e   :  { %v2444_v14 = vunpack.i.h.bf16 %v2442_v33  ;;  %v2443_v34 = vunpack.i.l.bf16 %v2442_v33  ;;  %2706 = vrot.lane.b32.xlu0 %v4604_v32, %s2856_s20  ;;  %v324_v61 = vsel %vm323_vm3, %v322_v4, %v2253_v3  ;;  %v3809_v58 = vsel %vm331_vm7, %v389_v22, %v2279_v38 }
 0x27f   :  { %2761 = vrot.lane.b32.xlu1 %v4607_v8, %s2853_s2  ;;  %v2288_v57 = vunpack.i.l.bf16 %v3554_v52  ;;  %v451_v36 = vsel %vm323_vm3, %v450_v7, %v2234_v59  ;;  %v326_v51 = vsel %vm325_vm4, %v324_v61, %v2263_v30  ;;  %v337_v54 = vsel %vm327_vm5, %v336_v28, %v2268_v13 }
 0x280   :  { %v1170_v32 = vsel %vm319_vm1, %v3060_v1, %v2444_v14  ;;  %v521_v42 = vsel %vm319_vm1, %v4608_v15, %v2443_v34  ;;  %v2472_v11 = vpop.permute.xlu0 %2471  ;;  %v4609_v19 = vpack.i.bf16 %v3136_v60, %v3320_v21  ;;  %v2264_v4 = vunpack.i.h.bf16 %v3534_v25 }
 0x281   :  { %v2447_v62 = vpop.permute.xlu1 %2446  ;;  %v2274_v3 = vunpack.i.h.bf16 %v3543_v16  ;;  %v328_v0 = vsel %vm327_vm5, %v326_v51, %v2273_v56  ;;  %v338_v59 = vsel %vm329_vm6, %v337_v54, %v2278_v17  ;;  %v834_v30 = vrot.slane %v3809_v58, 7 }
 0x282   :  { %v2449_v24 = vunpack.i.h.bf16 %v2447_v62  ;;  %v2448_v1 = vunpack.i.l.bf16 %v2447_v62  ;;  %2711 = vrot.lane.b32.xlu0 %v4609_v19, %s2858_s22  ;;  %v452_v38 = vsel %vm325_vm4, %v451_v36, %v2244_v39  ;;  %v2284_v25 = vunpack.i.h.bf16 %v3550_v45 }
 0x283   :  { %2766 = vrot.lane.b32.xlu1 %v3344_v23, %s2855_s19  ;;  %v2283_v16 = vunpack.i.l.bf16 %v3550_v45  ;;  %v3835_v14 = vsel %vm319_vm1, %v2288_v57, %v3469_v43  ;;  %v2293_v23 = vunpack.i.l.bf16 %v3559_v46  ;;  %v2298_v37 = vunpack.i.l.bf16 %v3561_v47 }
 0x284   :  { %v394_v33 = vsel %vm325_vm4, %v393_v29, %v2448_v1  ;;  %v1231_v13 = vsel %vm325_vm4, %v1230_v55, %v2449_v24  ;;  %v3829_v7 = vpop.permute.xlu0 %2476  ;;  %v2308_v39 = vunpack.i.l.bf16 %v3584_v20  ;;  %v4610_v55 = vpack.i.bf16 %v3320_v21, %v3273_v44  ;;  %v4611_v24 = vld [vmem:[#allocation27_spill] sm:$0xff] }
 0x285   :  { %v2452_v34 = vpop.permute.xlu1 %2451  ;;  %v2318_v17 = vunpack.i.l.bf16 %v3586_v31  ;;  %v453_v8 = vsel %vm327_vm5, %v452_v38, %v2254_v5  ;;  %v2464_v43 = vunpack.i.h.bf16 %v3782_v48  ;;  %v2463_v28 = vunpack.i.l.bf16 %v3782_v48 }
 0x286   :  { %v2454_v29 = vunpack.i.h.bf16 %v2452_v34  ;;  %v2453_v56 = vunpack.i.l.bf16 %v2452_v34  ;;  %2726 = vrot.lane.b32.xlu0 %v4610_v55, %s2857_s21  ;;  %v2474_v22 = vunpack.i.h.bf16 %v2472_v11  ;;  %v2473_v15 = vunpack.i.l.bf16 %v2472_v11 }
 0x287   :  { %2771 = vrot.lane.b32.xlu1 %v3348_v12, %s2854_s18  ;;  %v2303_v44 = vunpack.i.l.bf16 %v3572_v10  ;;  %v2323_v21 = vunpack.i.l.bf16 %v3593_v35  ;;  %v2313_v11 = vunpack.i.l.bf16 %v3574_v41  ;;  %v2309_v1 = vunpack.i.h.bf16 %v3584_v20 }
 0x288   :  { %v522_v61 = vsel %vm321_vm2, %v521_v42, %v2453_v56  ;;  %v1171_v57 = vsel %vm321_vm2, %v1170_v32, %v2454_v29  ;;  %v3852_v36 = vpop.permute.xlu0 %2486  ;;  %v339_v19 = vsel %vm331_vm7, %v338_v59, %v2308_v39  ;;  %v454_v38 = vsel %vm329_vm6, %v453_v8, %v2264_v4 }
 0x289   :  { %v523_v5 = vsel %vm323_vm3, %v522_v61, %v2463_v28  ;;  %v1172_v62 = vsel %vm323_vm3, %v1171_v57, %v2464_v43  ;;  %v2457_v48 = vpop.permute.xlu1 %2456  ;;  %v330_v34 = vsel %vm329_vm6, %v328_v0, %v2318_v17  ;;  %v2333_v29 = vunpack.i.l.bf16 %v3595_v53 }
 0x28a   :  { %v2459_v51 = vunpack.i.h.bf16 %v2457_v48  ;;  %v2458_v54 = vunpack.i.l.bf16 %v2457_v48  ;;  %2741 = vrot.lane.b32.xlu0 %v4611_v24, %s2855_s19  ;;  %v524_v42 = vsel %vm325_vm4, %v523_v5, %v2473_v15  ;;  %v1173_v32 = vsel %vm325_vm4, %v1172_v62, %v2474_v22  ;;  %v4612_v15 = vld [vmem:[#allocation4_spill] sm:$0xff] }
 0x28b   :  { %2776 = vrot.lane.b32.xlu1 %v3350_v26, %s2856_s20  ;;  %v2424_v28 = vunpack.i.h.bf16 %v3746_v50  ;;  %v2423_v59 = vunpack.i.l.bf16 %v3746_v50  ;;  %v332_v26 = vsel %vm331_vm7, %v330_v34, %v2323_v21  ;;  %v455_v22 = vsel %vm331_vm7, %v454_v38, %v2274_v3 }
 0x28c   :  { %v395_v56 = vsel %vm327_vm5, %v394_v33, %v2458_v54  ;;  %v1232_v55 = vsel %vm327_vm5, %v1231_v13, %v2459_v51  ;;  %v2492_v43 = vpop.permute.xlu0 %2491  ;;  %v2479_v53 = vunpack.i.h.bf16 %v3829_v7  ;;  %v2478_v33 = vunpack.i.l.bf16 %v3829_v7 }
 0x28d   :  { %v2494_v39 = vunpack.i.h.bf16 %v2492_v43  ;;  %v2493_v4 = vunpack.i.l.bf16 %v2492_v43  ;;  %v2467_v8 = vpop.permute.xlu1 %2466  ;;  %v2338_v3 = vunpack.i.l.bf16 %v3610_v40  ;;  %v841_v40 = vrot.slane %v455_v22, 6  ;;  %v4613_v43 = vld [vmem:[#allocation47_spill] sm:$0xff] }
 0x28e   :  { %v2469_v0 = vunpack.i.h.bf16 %v2467_v8  ;;  %v2468_v17 = vunpack.i.l.bf16 %v2467_v8  ;;  %2746 = vrot.lane.b32.xlu0 %v3337_v9, %s2856_s20  ;;  %v2489_v22 = vunpack.i.h.bf16 %v3852_v36 }
 0x28f   :  { %v442_v13 = vsel %vm319_vm1, %v2423_v59, %v2493_v4  ;;  %v3882_v50 = vsel %vm319_vm1, %v2424_v28, %v2494_v39  ;;  %2781 = vrot.lane.b32.xlu1 %v3354_v2, %s2855_s19  ;;  %v4614_v28 = vld [vmem:[#allocation32_spill] sm:$0xff]  ;;  %v4616_v4 = vld [vmem:[#allocation6_spill] sm:$0xff] }
 0x290   :  { %v443_v61 = vsel %vm321_vm2, %v442_v13, %v4612_v15  ;;  %v396_v9 = vsel %vm329_vm6, %v395_v56, %v2468_v17  ;;  %v1233_v57 = vsel %vm329_vm6, %v1232_v55, %v2469_v0  ;;  %v2497_v21 = vpop.permute.xlu0 %2496  ;;  %v4615_v59 = vpack.i.bf16 %v4613_v43, %v4614_v28 }
 0x291   :  { %v444_v7 = vsel %vm323_vm3, %v443_v61, %v2283_v16  ;;  %v397_v5 = vsel %vm331_vm7, %v396_v9, %v2478_v33  ;;  %v3896_v62 = vsel %vm331_vm7, %v1233_v57, %v2479_v53  ;;  %v2499_v48 = vunpack.i.h.bf16 %v2497_v21  ;;  %v2482_v51 = vpop.permute.xlu1 %2481 }
 0x292   :  { %v445_v54 = vsel %vm325_vm4, %v444_v7, %v2293_v23  ;;  %v835_v24 = vrot.slane %v397_v5, 7  ;;  %v2498_v38 = vunpack.i.l.bf16 %v2497_v21  ;;  %2756 = vrot.lane.b32.xlu0 %v3730_v27, %s2854_s18  ;;  %v2484_v56 = vunpack.i.h.bf16 %v2482_v51 }
 0x293   :  { %v446_v16 = vsel %vm327_vm5, %v445_v54, %v2298_v37  ;;  %v1163_v34 = vsel %vm319_vm1, %v3073_v6, %v2499_v48  ;;  %v2483_v55 = vunpack.i.l.bf16 %v2482_v51  ;;  %2786 = vrot.lane.b32.xlu1 %v4615_v59, %s2852_s1  ;;  %v2488_v23 = vunpack.i.l.bf16 %v3852_v36  ;;  %v4619_v48 = vld [vmem:[#allocation22_spill] sm:$0xff] }
 0x294   :  { %v447_v39 = vsel %vm329_vm6, %v446_v16, %v2303_v44  ;;  %v514_v27 = vsel %vm319_vm1, %v4616_v4, %v2498_v38  ;;  %v2512_v8 = vpop.permute.xlu0 %2511  ;;  %v876_v37 = vsel %vm874_vm8, %v339_v19, %v835_v24  ;;  %v1174_v17 = vsel %vm327_vm5, %v1173_v32, %v2484_v56  ;;  %v4617_v44 = vld [vmem:[#allocation28_spill] sm:$0xff] }
 0x295   :  { %v448_v6 = vsel %vm331_vm7, %v447_v39, %v2313_v11  ;;  %v525_v0 = vsel %vm327_vm5, %v524_v42, %v2483_v55  ;;  %v2502_v53 = vpop.permute.xlu1 %2501  ;;  %v875_v19 = vsel %vm874_vm8, %v332_v26, %v834_v30  ;;  %v4618_v42 = vld [vmem:[#allocation29_spill] sm:$0xff]  ;;  %v3933_v32 = vsel %vm329_vm6, %v1174_v17, %v2489_v22 }
 0x296   :  { %v840_v33 = vrot.slane %v448_v6, 6  ;;  %v526_v13 = vsel %vm329_vm6, %v525_v0, %v2488_v23  ;;  %v2504_v15 = vunpack.i.h.bf16 %v2502_v53  ;;  %2796 = vrot.lane.b32.xlu0 %v4617_v44, %s2858_s22  ;;  %v2503_v11 = vunpack.i.l.bf16 %v2502_v53  ;;  %v4624_v53 = vld [vmem:[#allocation37_spill] sm:$0xff] }
 0x297   :  { %v527_v36 = vsel %vm331_vm7, %v526_v13, %v2309_v1  ;;  %2791 = vrot.lane.b32.xlu1 %v4618_v42, %s2857_s21  ;;  %v879_v61 = vsel %vm877_vm9, %v876_v37, %v841_v40  ;;  %v573_v9 = vsel %vm321_vm2, %v3835_v14, %v2333_v29  ;;  %v2289_v1 = vunpack.i.h.bf16 %v3554_v52  ;;  %v4620_v40 = vld [vmem:[#allocation30_spill] sm:$0xff]  ;;  %v4621_v52 = vld [vmem:[#allocation16_spill] sm:$0xff] }
 0x298   :  { %v847_v57 = vrot.slane %v527_v36, 5  ;;  %v1164_v58 = vsel %vm321_vm2, %v1163_v34, %v2504_v15  ;;  %v3939_v30 = vpop.permute.xlu0 %2521  ;;  %v3942_v20 = vsel %vm877_vm9, %v875_v19, %v840_v33  ;;  %v2294_v26 = vunpack.i.h.bf16 %v3559_v46  ;;  %v4625_v13 = vld [vmem:[#allocation12_spill] sm:$0xff]  ;;  %v4626_v19 = vld [vmem:[#allocation15_spill] sm:$0xff] }
 0x299   :  { %v574_v21 = vsel %vm323_vm3, %v573_v9, %v2338_v3  ;;  %v515_v7 = vsel %vm321_vm2, %v514_v27, %v2503_v11  ;;  %v2507_v5 = vpop.permute.xlu1 %2506  ;;  %v2353_v51 = vunpack.i.l.bf16 %v4619_v48  ;;  %v2299_v24 = vunpack.i.h.bf16 %v3561_v47  ;;  %v4622_v3 = vld [vmem:[#allocation31_spill] sm:$0xff]  ;;  %v4628_v48 = vld [vmem:[#allocation46_spill] sm:$0xff] }
 0x29a   :  { %v2509_v14 = vunpack.i.h.bf16 %v2507_v5  ;;  %v2508_v29 = vunpack.i.l.bf16 %v2507_v5  ;;  %2801 = vrot.lane.b32.xlu0 %v4620_v40, %s2856_s20  ;;  %v3952_v54 = vsel %vm880_vm10, %v879_v61, %v847_v57  ;;  %v2343_v38 = vunpack.i.l.bf16 %v4621_v52  ;;  %v4629_v52 = vld [vmem:[#allocation49_spill] sm:$0xff] }
 0x29b   :  { %v2514_v46 = vunpack.i.h.bf16 %v2512_v8  ;;  %v2513_v16 = vunpack.i.l.bf16 %v2512_v8  ;;  %2806 = vrot.lane.b32.xlu1 %v4622_v3, %s2852_s1  ;;  %v2304_v34 = vunpack.i.h.bf16 %v3572_v10  ;;  %v2314_v56 = vunpack.i.h.bf16 %v3574_v41  ;;  %v4623_v10 = vld [vmem:[#allocation39_spill] sm:$0xff] }
 0x29c   :  { %v516_v55 = vsel %vm323_vm3, %v515_v7, %v2508_v29  ;;  %v1165_v59 = vsel %vm323_vm3, %v1164_v58, %v2509_v14  ;;  %v3962_v23 = vpop.permute.xlu0 %2526  ;;  %v575_v39 = vsel %vm325_vm4, %v574_v21, %v2343_v38  ;;  %v2373_v22 = vunpack.i.l.bf16 %v4623_v10  ;;  %v4627_v21 = vld [vmem:[#allocation44_spill] sm:$0xff] }
 0x29d   :  { %v2528_v47 = vunpack.i.l.bf16 %v3962_v23  ;;  %v2517_v4 = vpop.permute.xlu1 %2516  ;;  %v517_v27 = vsel %vm325_vm4, %v516_v55, %v2513_v16  ;;  %v1166_v8 = vsel %vm325_vm4, %v1165_v59, %v2514_v46  ;;  %v576_v37 = vsel %vm327_vm5, %v575_v39, %v2353_v51 }
 0x29e   :  { %v2519_v41 = vunpack.i.h.bf16 %v2517_v4  ;;  %v2518_v6 = vunpack.i.l.bf16 %v2517_v4  ;;  %2811 = vrot.lane.b32.xlu0 %v4617_v44, %s2857_s21  ;;  %v2319_v0 = vunpack.i.h.bf16 %v3586_v31  ;;  %v2324_v17 = vunpack.i.h.bf16 %v3593_v35 }
 0x29f   :  { %v2363_v33 = vunpack.i.l.bf16 %v4624_v53  ;;  %v579_v15 = vsel %vm319_vm1, %v2528_v47, %v4625_v13  ;;  %2831 = vrot.lane.b32.xlu1 %v3354_v2, %s2854_s18  ;;  %v2328_v36 = vunpack.i.l.bf16 %v4626_v19  ;;  %v2393_v51 = vunpack.i.l.bf16 %v4628_v48 }
 0x2a0   :  { %v580_v11 = vsel %vm321_vm2, %v579_v15, %v2284_v25  ;;  %v518_v42 = vsel %vm327_vm5, %v517_v27, %v2518_v6  ;;  %v3985_v31 = vsel %vm327_vm5, %v1166_v8, %v2519_v41  ;;  %v3987_v35 = vpop.permute.xlu0 %2531  ;;  %v2388_v25 = vunpack.i.l.bf16 %v4627_v21  ;;  %v4634_v6 = vld [vmem:[#allocation34_spill] sm:$0xff]  ;;  %v4636_v21 = vld [vmem:[#allocation8_spill] sm:$0xff] }
 0x2a1   :  { %v577_v61 = vsel %vm329_vm6, %v576_v37, %v2363_v33  ;;  %v581_v9 = vsel %vm323_vm3, %v580_v11, %v2294_v26  ;;  %v519_v57 = vsel %vm329_vm6, %v518_v42, %v2319_v0  ;;  %v2533_v2 = vunpack.i.l.bf16 %v3987_v35  ;;  %v2547_v58 = vpop.permute.xlu1 %2546  ;;  %v4633_v37 = vld [vmem:[#allocation45_spill] sm:$0xff] }
 0x2a2   :  { %v578_v45 = vsel %vm331_vm7, %v577_v61, %v2373_v22  ;;  %v582_v7 = vsel %vm325_vm4, %v581_v9, %v2299_v24  ;;  %v520_v5 = vsel %vm331_vm7, %v519_v57, %v2324_v17  ;;  %2816 = vrot.lane.b32.xlu0 %v3348_v12, %s2853_s2  ;;  %v2433_v38 = vunpack.i.l.bf16 %v4629_v52  ;;  %v4630_v24 = vld [vmem:[#allocation11_spill] sm:$0xff]  ;;  %v4635_v9 = vld [vmem:[#allocation25_spill] sm:$0xff] }
 0x2a3   :  { %v583_v26 = vsel %vm327_vm5, %v582_v7, %v2304_v34  ;;  %v846_v14 = vrot.slane %v520_v5, 5  ;;  %v637_v29 = vsel %vm319_vm1, %v2533_v2, %v2289_v1  ;;  %2836 = vrot.lane.b32.xlu1 %v4620_v40, %s2855_s19  ;;  %v4631_v12 = vld [vmem:[#allocation23_spill] sm:$0xff]  ;;  %v2859_v47 = vmov 0.0  }
 0x2a4   :  { %v584_v46 = vsel %vm329_vm6, %v583_v26, %v2314_v56  ;;  %v638_v16 = vsel %vm321_vm2, %v637_v29, %v4630_v24  ;;  %v4008_v55 = vpop.permute.xlu0 %2536  ;;  %v2398_v59 = vunpack.i.l.bf16 %v4631_v12  ;;  %1822 = vmatprep.mubr.f32.mxu0 %v2859_v47  ;;  %1899 = vmatprep.mubr.f32.mxu1 %v2859_v47  ;;  %v852_v40 = vrot.slane %v578_v45, 4  ;;  %v4632_v56 = vld [vmem:[#allocation43_spill] sm:$0xff] }
 0x2a5   :  { %v639_v39 = vsel %vm323_vm3, %v638_v16, %v2388_v25  ;;  %v2552_v34 = vpop.permute.xlu1 %2551  ;;  %v585_v1 = vsel %vm331_vm7, %v584_v46, %v2328_v36  ;;  %v2403_v4 = vunpack.i.l.bf16 %v4632_v56  ;;  %v2408_v10 = vunpack.i.l.bf16 %v4633_v37  ;;  %v1728_v26 = vld [vmem:[%s4431_s4 + $0x8] sm:$0xff]  ;;  %v4637_v46 = vld [vmem:[#allocation36_spill] sm:$0xff] }
 0x2a6   :  { %v640_v27 = vsel %vm325_vm4, %v639_v39, %v2393_v51  ;;  %2821 = vrot.lane.b32.xlu0 %v4622_v3, %s2858_s22  ;;  %v853_v8 = vrot.slane %v585_v1, 4  ;;  %v881_v41 = vsel %vm880_vm10, %v3942_v20, %v846_v14  ;;  %v1221_v0 = vsel %vm319_vm1, %v2433_v38, %v4634_v6 }
 0x2a7   :  { %v641_v22 = vsel %vm327_vm5, %v640_v27, %v2398_v59  ;;  %2841 = vrot.lane.b32.xlu1 %v4617_v44, %s2856_s20  ;;  %v4031_v13 = vsel %vm883_vm11, %v881_v41, %v852_v40  ;;  %v2529_v15 = vunpack.i.h.bf16 %v3962_v23  ;;  %v2549_v20 = vunpack.i.h.bf16 %v2547_v58  ;;  %v4638_v59 = vld [vmem:[#allocation35_spill] sm:$0xff]  ;;  %v1921_v27 = vld [vmem:[%s4432_s6] sm:$0xff] }
 0x2a8   :  { %v642_v17 = vsel %vm329_vm6, %v641_v22, %v2403_v4  ;;  %v2542_v53 = vpop.permute.xlu0 %2541  ;;  %v885_v33 = vsel %vm883_vm11, %v3952_v54, %v853_v8  ;;  %v2548_v61 = vunpack.i.l.bf16 %v2547_v58  ;;  %v2554_v2 = vunpack.i.h.bf16 %v2552_v34  ;;  %v1727_v58 = vld [vmem:[%s4431_s4] sm:$0xff] }
 0x2a9   :  { %v2544_v36 = vunpack.i.h.bf16 %v2542_v53  ;;  %v2543_v44 = vunpack.i.l.bf16 %v2542_v53  ;;  %v2572_v11 = vpop.permute.xlu1 %2571  ;;  %v643_v42 = vsel %vm331_vm7, %v642_v17, %v2408_v10  ;;  %v2553_v45 = vunpack.i.l.bf16 %v2552_v34 }
 0x2aa   :  { %2826 = vrot.lane.b32.xlu0 %v4635_v9, %s2857_s21  ;;  %v859_v57 = vrot.slane %v643_v42, 3  ;;  %v2860_v23 = vmov 0   ;;  %v1416_v24 = vsel %vm319_vm1, %v2529_v15, %v4637_v46  ;;  %v2574_v16 = vunpack.i.h.bf16 %v2572_v11 }
 0x2ab   :  { %v1358_v54 = vsel %vm319_vm1, %v4636_v21, %v2544_v36  ;;  %v1222_v25 = vsel %vm321_vm2, %v1221_v0, %v2543_v44  ;;  %2846 = vrot.lane.b32.xlu1 %v4622_v3, %s2857_s21  ;;  %2850 = vset.pattern.permute.xlu0 %v2860_v23  ;;  %v2573_v12 = vunpack.i.l.bf16 %v2572_v11  ;;  %v1280_v39 = vsel %vm321_vm2, %v3882_v50, %v4638_v59 }
 0x2ac   :  { %v1223_v7 = vsel %vm323_vm3, %v1222_v25, %v2548_v61  ;;  %v1359_v5 = vsel %vm321_vm2, %v1358_v54, %v2549_v20  ;;  %v2557_v48 = vpop.permute.xlu0 %2556  ;;  %v4048_v51 = vsel %vm886_vm12, %v885_v33, %v859_v57  ;;  %2851 = vset.pattern.permute.xlu1 %v2860_v23  ;;  %v2534_v8 = vunpack.i.h.bf16 %v3987_v35 }
 0x2ad   :  { %v2559_v3 = vunpack.i.h.bf16 %v2557_v48  ;;  %v2558_v14 = vunpack.i.l.bf16 %v2557_v48  ;;  %v2577_v29 = vpop.permute.xlu1 %2576  ;;  %v1224_v52 = vsel %vm325_vm4, %v1223_v7, %v2553_v45  ;;  %v1360_v38 = vsel %vm323_vm3, %v1359_v5, %v2554_v2 }
 0x2ae   :  { %1731 = vperm.xlu0 %2850, %v1727_v58   ;;  %v1672_v17 = vrot.slane %v3896_v62, 7  ;;  %v2579_v53 = vunpack.i.h.bf16 %v2577_v29  ;;  %v2578_v33 = vunpack.i.l.bf16 %v2577_v29  ;;  %v2538_v29 = vunpack.i.l.bf16 %v4008_v55 }
 0x2af   :  { %v1281_v34 = vsel %vm323_vm3, %v1280_v39, %v2558_v14  ;;  %v1417_v1 = vsel %vm321_vm2, %v1416_v24, %v2559_v3  ;;  %1736 = vperm.xlu1 %2851, %v1728_v26   ;;  %v2539_v14 = vunpack.i.h.bf16 %v4008_v55 }
 0x2b0   :  { %v4062_v40 = vpop.permute.xlu0 %2561  ;;  %v1282_v56 = vsel %vm325_vm4, %v1281_v34, %v2573_v12  ;;  %v1418_v4 = vsel %vm323_vm3, %v1417_v1, %v2574_v16  ;;  %v4639_v16 = vld [vmem:[#allocation20_spill] sm:$0xff]  ;;  %v4640_v1 = vld [vmem:[#allocation17_spill] sm:$0xff] }
 0x2b1   :  { %v2564_v50 = vunpack.i.h.bf16 %v4062_v40  ;;  %v2587_v37 = vpop.permute.xlu1 %2586  ;;  %v2348_v12 = vunpack.i.l.bf16 %v4639_v16 }
 0x2b2   :  { %v2589_v36 = vunpack.i.h.bf16 %v2587_v37  ;;  %v2588_v44 = vunpack.i.l.bf16 %v2587_v37  ;;  %v4642_v37 = vld [vmem:[#allocation38_spill] sm:$0xff] }
 0x2b3   :  { %v4072_v10 = vsel %vm319_vm1, %v2534_v8, %v2564_v50  ;;  %1924 = vperm.xlu1 %2851, %v1921_v27  }
 0x2b4   :  { %v2567_v22 = vpop.permute.xlu0 %2566 }
 0x2b5   :  { %v2569_v41 = vunpack.i.h.bf16 %v2567_v22  ;;  %v2568_v6 = vunpack.i.l.bf16 %v2567_v22  ;;  %v2597_v0 = vpop.permute.xlu1 %2596  ;;  %v2368_v22 = vunpack.i.l.bf16 %v4642_v37 }
 0x2b6   :  { %v2598_v15 = vunpack.i.l.bf16 %v2597_v0  ;;  %v2599_v61 = vunpack.i.h.bf16 %v2597_v0 }
 0x2b7   :  { %v1225_v35 = vsel %vm327_vm5, %v1224_v52, %v2568_v6  ;;  %v1361_v11 = vsel %vm325_vm4, %v1360_v38, %v2569_v41  ;;  %v4643_v6 = vld [vmem:[#allocation40_spill] sm:$0xff] }
 0x2b8   :  { %v1226_v42 = vsel %vm329_vm6, %v1225_v35, %v2578_v33  ;;  %v1362_v20 = vsel %vm327_vm5, %v1361_v11, %v2579_v53  ;;  %v1176_v9 = vsel %vm331_vm7, %v3933_v32, %v2598_v15  ;;  %v2582_v57 = vpop.permute.xlu0 %2581  ;;  %v2378_v0 = vunpack.i.l.bf16 %v4643_v6  ;;  %v4644_v15 = vld [vmem:[#allocation42_spill] sm:$0xff] }
 0x2b9   :  { %v4082_v62 = vsel %vm331_vm7, %v1226_v42, %v2588_v44  ;;  %v1363_v2 = vsel %vm329_vm6, %v1362_v20, %v2589_v36  ;;  %v4086_v45 = vsel %vm874_vm8, %v1176_v9, %v1672_v17  ;;  %v2584_v54 = vunpack.i.h.bf16 %v2582_v57  ;;  %v2612_v25 = vpop.permute.xlu1 %2611 }
 0x2ba   :  { %v4089_v23 = vsel %vm331_vm7, %v1363_v2, %v2599_v61  ;;  %v2583_v58 = vunpack.i.l.bf16 %v2582_v57  ;;  %v2383_v36 = vunpack.i.l.bf16 %v4644_v15  ;;  %v4645_v61 = vld [vmem:[#allocation33_spill] sm:$0xff]  ;;  %v2563_v2 = vunpack.i.l.bf16 %v4062_v40 }
 0x2bb   :  { %v1419_v7 = vsel %vm325_vm4, %v1418_v4, %v2584_v54  ;;  %v4641_v4 = vld [vmem:[#allocation18_spill] sm:$0xff]  ;;  %v1287_v9 = vsel %vm321_vm2, %v3756_v63, %v4645_v61  ;;  %v2614_v54 = vunpack.i.h.bf16 %v2612_v25  ;;  %v2524_v63 = vunpack.i.h.bf16 %v3939_v30 }
 0x2bc   :  { %v1283_v5 = vsel %vm327_vm5, %v1282_v56, %v2583_v58  ;;  %v2592_v32 = vpop.permute.xlu0 %2591  ;;  %v2358_v56 = vunpack.i.l.bf16 %v4640_v1  ;;  %v2613_v58 = vunpack.i.l.bf16 %v2612_v25 }
 0x2bd   :  { %v2594_v48 = vunpack.i.h.bf16 %v2592_v32  ;;  %v2593_v26 = vunpack.i.l.bf16 %v2592_v32  ;;  %v2617_v3 = vpop.permute.xlu1 %2616 }
 0x2be   :  { %v2619_v52 = vunpack.i.h.bf16 %v2617_v3  ;;  %v2618_v38 = vunpack.i.l.bf16 %v2617_v3 }
 0x2bf   :  { %v1284_v46 = vsel %vm329_vm6, %v1283_v5, %v2593_v26  ;;  %v1420_v24 = vsel %vm327_vm5, %v1419_v7, %v2594_v48  ;;  %v4646_v5 = vld [vmem:[#allocation9_spill] sm:$0xff] }
 0x2c0   :  { %v4099_v59 = vsel %vm319_vm1, %v2539_v14, %v2619_v52  ;;  %v630_v39 = vsel %vm319_vm1, %v2538_v29, %v2618_v38  ;;  %v2602_v34 = vpop.permute.xlu0 %2601 }
 0x2c1   :  { %v631_v27 = vsel %vm321_vm2, %v630_v39, %v4641_v4  ;;  %v2604_v55 = vunpack.i.h.bf16 %v2602_v34  ;;  %v2603_v8 = vunpack.i.l.bf16 %v2602_v34  ;;  %v2627_v50 = vpop.permute.xlu1 %2626 }
 0x2c2   :  { %v632_v41 = vsel %vm323_vm3, %v631_v27, %v2348_v12  ;;  %v2629_v12 = vunpack.i.h.bf16 %v2627_v50  ;;  %v2628_v39 = vunpack.i.l.bf16 %v2627_v50 }
 0x2c3   :  { %v633_v17 = vsel %vm325_vm4, %v632_v41, %v2358_v56  ;;  %v1285_v53 = vsel %vm331_vm7, %v1284_v46, %v2603_v8  ;;  %v1421_v33 = vsel %vm329_vm6, %v1420_v24, %v2604_v55  ;;  %v4647_v46 = vld [vmem:[#allocation14_spill] sm:$0xff]  ;;  %v1671_v56 = vrot.slane %v4082_v62, 7 }
 0x2c4   :  { %v634_v44 = vsel %vm327_vm5, %v633_v17, %v2368_v22  ;;  %v2607_v35 = vpop.permute.xlu0 %2606  ;;  %v1409_v24 = vsel %vm319_vm1, %v2563_v2, %v4647_v46  ;;  %v1684_v17 = vrot.slane %v4089_v23, 5  ;;  %v1677_v61 = vrot.slane %v1285_v53, 6  ;;  %v4650_v46 = vld [vmem:[#allocation21_spill] sm:$0xff] }
 0x2c5   :  { %v635_v11 = vsel %vm329_vm6, %v634_v44, %v2378_v0  ;;  %v2609_v42 = vunpack.i.h.bf16 %v2607_v35  ;;  %v2608_v20 = vunpack.i.l.bf16 %v2607_v35  ;;  %v2632_v57 = vpop.permute.xlu1 %2631 }
 0x2c6   :  { %v636_v7 = vsel %vm331_vm7, %v635_v11, %v2383_v36  ;;  %v2633_v4 = vunpack.i.l.bf16 %v2632_v57  ;;  %v2634_v8 = vunpack.i.h.bf16 %v2632_v57 }
 0x2c7   :  { %v1351_v32 = vsel %vm319_vm1, %v4646_v5, %v2609_v42  ;;  %v1288_v48 = vsel %vm323_vm3, %v1287_v9, %v2608_v20  ;;  %v858_v26 = vrot.slane %v636_v7, 3 }
 0x2c8   :  { %v2622_v3 = vpop.permute.xlu0 %2621  ;;  %v1289_v14 = vsel %vm325_vm4, %v1288_v48, %v2613_v58  ;;  %v1352_v29 = vsel %vm321_vm2, %v1351_v32, %v2614_v54  ;;  %v4648_v54 = vld [vmem:[#allocation10_spill] sm:$0xff] }
 0x2c9   :  { %v2624_v52 = vunpack.i.h.bf16 %v2622_v3  ;;  %v2623_v38 = vunpack.i.l.bf16 %v2622_v3  ;;  %v4125_v40 = vpop.permute.xlu1 %2651  ;;  %v4129_v25 = vsel %vm886_vm12, %v4031_v13, %v858_v26  ;;  %v4649_v3 = vld [vmem:[#allocation13_spill] sm:$0xff] }
 0x2ca   :  { %v2653_v34 = vunpack.i.l.bf16 %v4125_v40 }
 0x2cb   :  { %v1290_v27 = vsel %vm327_vm5, %v1289_v14, %v2623_v38  ;;  %v1353_v55 = vsel %vm323_vm3, %v1352_v29, %v2624_v52  ;;  %v1468_v14 = vsel %vm321_vm2, %v4099_v59, %v4649_v3 }
 0x2cc   :  { %v1291_v22 = vsel %vm329_vm6, %v1290_v27, %v2628_v39  ;;  %v1354_v13 = vsel %vm325_vm4, %v1353_v55, %v2629_v12  ;;  %v1422_v41 = vsel %vm331_vm7, %v1421_v33, %v2653_v34  ;;  %v2637_v0 = vpop.permute.xlu0 %2636  ;;  %v2349_v39 = vunpack.i.h.bf16 %v4639_v16 }
 0x2cd   :  { %v1292_v50 = vsel %vm331_vm7, %v1291_v22, %v2633_v4  ;;  %v2639_v36 = vunpack.i.h.bf16 %v2637_v0  ;;  %v2638_v44 = vunpack.i.l.bf16 %v2637_v0  ;;  %v2662_v62 = vpop.permute.xlu1 %2661  ;;  %v1355_v11 = vsel %vm327_vm5, %v1354_v13, %v2634_v8 }
 0x2ce   :  { %v1678_v35 = vrot.slane %v1292_v50, 6  ;;  %v2664_v42 = vunpack.i.h.bf16 %v2662_v62  ;;  %v2663_v20 = vunpack.i.l.bf16 %v2662_v62  ;;  %v1690_v9 = vrot.slane %v1422_v41, 4 }
 0x2cf   :  { %v1168_v57 = vsel %vm329_vm6, %v3985_v31, %v2638_v44  ;;  %v1356_v33 = vsel %vm329_vm6, %v1355_v11, %v2639_v36  ;;  %v2359_v4 = vunpack.i.h.bf16 %v4640_v1  ;;  %v2379_v36 = vunpack.i.h.bf16 %v4643_v6  ;;  %v4651_v44 = vld [vmem:[#allocation41_spill] sm:$0xff] }
 0x2d0   :  { %v1714_v23 = vsel %vm877_vm9, %v4086_v45, %v1678_v35  ;;  %v1169_v2 = vsel %vm331_vm7, %v1168_v57, %v2524_v63  ;;  %v1546_v58 = vsel %vm319_vm1, %v4648_v54, %v2664_v42  ;;  %v1410_v7 = vsel %vm321_vm2, %v1409_v24, %v2663_v20  ;;  %v4152_v5 = vpop.permute.xlu0 %2641 }
 0x2d1   :  { %v1716_v53 = vsel %vm880_vm10, %v1714_v23, %v1684_v17  ;;  %v1711_v32 = vsel %vm874_vm8, %v1169_v2, %v1671_v56  ;;  %v4156_v48 = vpop.permute.xlu1 %2676  ;;  %v2369_v17 = vunpack.i.h.bf16 %v4642_v37 }
 0x2d2   :  { %v4159_v31 = vsel %vm883_vm11, %v1716_v53, %v1690_v9  ;;  %v1713_v45 = vsel %vm877_vm9, %v1711_v32, %v1677_v61  ;;  %v2678_v26 = vunpack.i.l.bf16 %v4156_v48 }
 0x2d4   :  { %v4167_v29 = vsel %vm323_vm3, %v1468_v14, %v2678_v26  ;;  %v4169_v63 = vpop.permute.xlu0 %2646 }
 0x2d5   :  { %v2648_v52 = vunpack.i.l.bf16 %v4169_v63  ;;  %v2682_v38 = vpop.permute.xlu1 %2681 }
 0x2d6   :  { %v2684_v9 = vunpack.i.h.bf16 %v2682_v38  ;;  %v2683_v57 = vunpack.i.l.bf16 %v2682_v38 }
 0x2d7   :  { %v767_v24 = vsel %vm319_vm1, %v2648_v52, %v4650_v46 }
 0x2d8   :  { %v4174_v12 = vpop.permute.xlu0 %2656  ;;  %v768_v59 = vsel %vm321_vm2, %v767_v24, %v2349_v39  ;;  %v2644_v39 = vunpack.i.h.bf16 %v4152_v5 }
 0x2d9   :  { %v4177_v34 = vpop.permute.xlu1 %2691  ;;  %v769_v13 = vsel %vm323_vm3, %v768_v59, %v2359_v4 }
 0x2da   :  { %v2693_v56 = vunpack.i.l.bf16 %v4177_v34  ;;  %v770_v61 = vsel %vm325_vm4, %v769_v13, %v2369_v17 }
 0x2db   :  { %v771_v32 = vsel %vm327_vm5, %v770_v61, %v2379_v36 }
 0x2dc   :  { %v1357_v27 = vsel %vm331_vm7, %v1356_v33, %v2693_v56  ;;  %v2667_v55 = vpop.permute.xlu0 %2666 }
 0x2dd   :  { %v1683_v8 = vrot.slane %v1357_v27, 5  ;;  %v4183_v22 = vpop.permute.xlu1 %2716  ;;  %v2669_v41 = vunpack.i.h.bf16 %v2667_v55  ;;  %v2668_v0 = vunpack.i.l.bf16 %v2667_v55 }
 0x2de   :  { %v2718_v16 = vunpack.i.l.bf16 %v4183_v22 }
 0x2df   :  { %v1715_v50 = vsel %vm880_vm10, %v1713_v45, %v1683_v8  ;;  %v1411_v37 = vsel %vm323_vm3, %v1410_v7, %v2668_v0  ;;  %v1547_v33 = vsel %vm321_vm2, %v1546_v58, %v2669_v41  ;;  %v2384_v7 = vunpack.i.h.bf16 %v4644_v15 }
 0x2e0   :  { %v715_v1 = vsel %vm331_vm7, %v4651_v44, %v2718_v16  ;;  %v2672_v62 = vpop.permute.xlu0 %2671 }
 0x2e1   :  { %v865_v35 = vrot.slane %v715_v1, 2  ;;  %v2674_v11 = vunpack.i.h.bf16 %v2672_v62  ;;  %v2673_v42 = vunpack.i.l.bf16 %v2672_v62  ;;  %v4192_v20 = vpop.permute.xlu1 %2721  ;;  %v772_v14 = vsel %vm329_vm6, %v771_v32, %v2384_v7 }
 0x2e2   :  { %v2523_v1 = vunpack.i.l.bf16 %v3939_v30 }
 0x2e3   :  { %v1412_v6 = vsel %vm325_vm4, %v1411_v37, %v2673_v42  ;;  %v1548_v23 = vsel %vm323_vm3, %v1547_v33, %v2674_v11  ;;  %v891_v2 = vsel %vm889_vm13, %v4048_v51, %v865_v35  ;;  %v2649_v35 = vunpack.i.h.bf16 %v4169_v63 }
 0x2e4   :  { %v4201_v53 = vpop.permute.xlu0 %2686  ;;  %v1413_v45 = vsel %vm327_vm5, %v1412_v6, %v2683_v57  ;;  %v4206_v26 = vsel %vm325_vm4, %v1548_v23, %v2684_v9  ;;  %v2329_v9 = vunpack.i.h.bf16 %v4626_v19  ;;  %v2694_v57 = vunpack.i.h.bf16 %v4177_v34 }
 0x2e5   :  { %v4209_v3 = vpop.permute.xlu1 %2731  ;;  %v2688_v0 = vunpack.i.l.bf16 %v4201_v53  ;;  %v2654_v33 = vunpack.i.h.bf16 %v4125_v40  ;;  %v2679_v23 = vunpack.i.h.bf16 %v4156_v48  ;;  %v2659_v19 = vunpack.i.h.bf16 %v4174_v12 }
 0x2e6   :  { %v2733_v58 = vunpack.i.l.bf16 %v4209_v3  ;;  %v2658_v34 = vunpack.i.l.bf16 %v4174_v12  ;;  %v2723_v40 = vunpack.i.l.bf16 %v4192_v20  ;;  %v2643_v48 = vunpack.i.l.bf16 %v4152_v5 }
 0x2e7   :  { %v1470_v62 = vsel %vm325_vm4, %v4167_v29, %v2688_v0  ;;  %v825_v29 = vsel %vm319_vm1, %v2329_v9, %v2523_v1  ;;  %v1662_v7 = vsel %vm319_vm1, %v2654_v33, %v2694_v57  ;;  %v4655_v12 = vrot.slane %v4636_v21, 2 }
 0x2e8   :  { %v773_v52 = vsel %vm331_vm7, %v772_v14, %v2733_v58  ;;  %v4214_v51 = vpop.permute.xlu0 %2696  ;;  %v2724_v58 = vunpack.i.h.bf16 %v4192_v20  ;;  %v4656_v21 = vrot.slane %v4648_v54, 2 }
 0x2e9   :  { %v871_v38 = vrot.slane %v773_v52, 1  ;;  %v2698_v46 = vunpack.i.l.bf16 %v4214_v51  ;;  %v4217_v24 = vpop.permute.xlu1 %2736  ;;  %v4653_v52 = vld [vmem:[#allocation7_spill] sm:$0xff]  ;;  %v2699_v20 = vunpack.i.h.bf16 %v4214_v51 }
 0x2eb   :  { %v1414_v15 = vsel %vm329_vm6, %v1413_v45, %v2698_v46  ;;  %v4222_v56 = vsel %vm892_vm14, %v891_v2, %v871_v38  ;;  %v4652_v2 = vld [vmem:[#allocation19_spill] sm:$0xff]  ;;  %v4654_v38 = vrot.slane %v4653_v52, 2 }
 0x2ec   :  { %v1415_v59 = vsel %vm331_vm7, %v1414_v15, %v2644_v39  ;;  %v4225_v4 = vpop.permute.xlu0 %2701  ;;  %v1604_v32 = vsel %vm319_vm1, %v2649_v35, %v4652_v2  ;;  %v2689_v39 = vunpack.i.h.bf16 %v4201_v53  ;;  %v1475_v15 = vsel %vm321_vm2, %v4072_v10, %v4655_v12 }
 0x2ed   :  { %v1689_v27 = vrot.slane %v1415_v59, 4  ;;  %v2752_v55 = vpop.permute.xlu1 %2751  ;;  %v2703_v17 = vunpack.i.l.bf16 %v4225_v4  ;;  %v826_v46 = vsel %vm321_vm2, %v825_v29, %v4654_v38  ;;  %v1605_v59 = vsel %vm321_vm2, %v1604_v32, %v2679_v23 }
 0x2ee   :  { %v2719_v53 = vunpack.i.h.bf16 %v4183_v22  ;;  %v1663_v10 = vsel %vm321_vm2, %v1662_v7, %v4656_v21  ;;  %v827_v51 = vsel %vm323_vm3, %v826_v46, %v2723_v40  ;;  %v2738_v22 = vunpack.i.l.bf16 %v4217_v24 }
 0x2ef   :  { %v1717_v8 = vsel %vm883_vm11, %v1715_v50, %v1689_v27  ;;  %v1471_v11 = vsel %vm327_vm5, %v1470_v62, %v2703_v17  ;;  %v2754_v27 = vunpack.i.h.bf16 %v2752_v55  ;;  %v1597_v17 = vsel %vm319_vm1, %v2659_v19, %v4613_v43 }
 0x2f0   :  { %v4228_v13 = vpop.permute.xlu0 %2706  ;;  %v2734_v62 = vunpack.i.h.bf16 %v4209_v3  ;;  %v1606_v43 = vsel %vm323_vm3, %v1605_v59, %v2689_v39  ;;  %v2704_v54 = vunpack.i.h.bf16 %v4225_v4  ;;  %v4314_v23 = vsel %vm325_vm4, %v827_v51, %v2738_v22 }
 0x2f1   :  { %v4230_v41 = vpop.permute.xlu1 %2761  ;;  %v2708_v44 = vunpack.i.l.bf16 %v4228_v13  ;;  %v2709_v3 = vunpack.i.h.bf16 %v4228_v13 }
 0x2f2   :  { %v1607_v13 = vsel %vm325_vm4, %v1606_v43, %v2704_v54 }
 0x2f3   :  { %v1472_v37 = vsel %vm329_vm6, %v1471_v11, %v2708_v44  ;;  %v760_v44 = vsel %vm319_vm1, %v2658_v34, %v4614_v28  ;;  %v2739_v28 = vunpack.i.h.bf16 %v4217_v24  ;;  %v1550_v11 = vsel %vm327_vm5, %v4206_v26, %v2699_v20 }
 0x2f4   :  { %v4233_v16 = vpop.permute.xlu0 %2711  ;;  %v1608_v19 = vsel %vm327_vm5, %v1607_v13, %v2709_v3 }
 0x2f5   :  { %v4236_v36 = vpop.permute.xlu1 %2766  ;;  %v2713_v35 = vunpack.i.l.bf16 %v4233_v16 }
 0x2f6   :  { %v2768_v26 = vunpack.i.l.bf16 %v4236_v36 }
 0x2f7   :  { %v1551_v4 = vsel %vm329_vm6, %v1550_v11, %v2713_v35 }
 0x2f8   :  { %v4242_v50 = vpop.permute.xlu0 %2726 }
 0x2f9   :  { %v2728_v42 = vunpack.i.l.bf16 %v4242_v50  ;;  %v4247_v61 = vpop.permute.xlu1 %2771 }
 0x2fa   :  { %v2773_v59 = vunpack.i.l.bf16 %v4247_v61  ;;  %v2774_v51 = vunpack.i.h.bf16 %v4247_v61 }
 0x2fb   :  { %v1473_v30 = vsel %vm331_vm7, %v1472_v37, %v2728_v42  ;;  %v1539_v42 = vsel %vm319_vm1, %v3136_v60, %v2754_v27  ;;  %v2764_v37 = vunpack.i.h.bf16 %v4230_v41  ;;  %v2729_v60 = vunpack.i.h.bf16 %v4242_v50 }
 0x2fc   :  { %v1695_v6 = vrot.slane %v1473_v30, 3  ;;  %v4255_v63 = vpop.permute.xlu0 %2741  ;;  %v2763_v30 = vunpack.i.l.bf16 %v4230_v41 }
 0x2fd   :  { %v4262_v45 = vpop.permute.xlu1 %2776  ;;  %v1598_v50 = vsel %vm321_vm2, %v1597_v17, %v2764_v37  ;;  %v1609_v39 = vsel %vm329_vm6, %v1608_v19, %v2729_v60  ;;  %v2714_v17 = vunpack.i.h.bf16 %v4233_v16  ;;  %v4657_v16 = vld [vmem:[#allocation48_spill] sm:$0xff] }
 0x2fe   :  { %v4268_v14 = vsel %vm886_vm12, %v1717_v8, %v1695_v6  ;;  %v2753_v8 = vunpack.i.l.bf16 %v2752_v55  ;;  %v1664_v55 = vsel %vm323_vm3, %v1663_v10, %v2724_v58  ;;  %v2769_v6 = vunpack.i.h.bf16 %v4236_v36 }
 0x2ff   :  { %v4320_v32 = vsel %vm325_vm4, %v1664_v55, %v2739_v28  ;;  %v1552_v58 = vsel %vm331_vm7, %v1551_v4, %v2719_v53  ;;  %v2779_v40 = vunpack.i.h.bf16 %v4262_v45  ;;  %v2778_v52 = vunpack.i.l.bf16 %v4262_v45 }
 0x300   :  { %v4281_v0 = vpop.permute.xlu0 %2746  ;;  %v1476_v9 = vsel %vm323_vm3, %v1475_v15, %v2753_v8  ;;  %v761_v46 = vsel %vm321_vm2, %v760_v44, %v2763_v30  ;;  %v1702_v53 = vrot.slane %v1552_v58, 2  ;;  %v1610_v44 = vsel %vm331_vm7, %v1609_v39, %v2734_v62 }
 0x301   :  { %v4291_v1 = vpop.permute.xlu1 %2781  ;;  %v1708_v62 = vrot.slane %v1610_v44, 1 }
 0x302   :  { %v2783_v60 = vunpack.i.l.bf16 %v4291_v1 }
 0x304   :  { %v2757_v57 = vpop.permute.xlu0 %2756 }
 0x305   :  { %v2759_v29 = vunpack.i.h.bf16 %v2757_v57  ;;  %v2758_v33 = vunpack.i.l.bf16 %v2757_v57  ;;  %v2787_v24 = vpop.permute.xlu1 %2786 }
 0x306   :  { %v2789_v28 = vunpack.i.h.bf16 %v2787_v24  ;;  %v2788_v22 = vunpack.i.l.bf16 %v2787_v24  ;;  %v2784_v24 = vunpack.i.h.bf16 %v4291_v1  ;;  %v2743_v1 = vunpack.i.l.bf16 %v4255_v63 }
 0x307   :  { %v1477_v2 = vsel %vm325_vm4, %v1476_v9, %v2758_v33  ;;  %v1540_v41 = vsel %vm321_vm2, %v1539_v42, %v2759_v29  ;;  %v762_v42 = vsel %vm323_vm3, %v761_v46, %v2773_v59  ;;  %v1599_v33 = vsel %vm323_vm3, %v1598_v50, %v2774_v51 }
 0x308   :  { %v1478_v34 = vsel %vm327_vm5, %v1477_v2, %v2768_v26  ;;  %v1541_v36 = vsel %vm323_vm3, %v1540_v41, %v2769_v6  ;;  %v2797_v7 = vpop.permute.xlu0 %2796  ;;  %v818_v13 = vsel %vm319_vm1, %v2643_v48, %v2788_v22  ;;  %v2749_v48 = vunpack.i.h.bf16 %v4281_v0 }
 0x309   :  { %v2792_v38 = vpop.permute.xlu1 %2791  ;;  %v2798_v20 = vunpack.i.l.bf16 %v2797_v7  ;;  %v1479_v27 = vsel %vm329_vm6, %v1478_v34, %v2778_v52  ;;  %v1542_v8 = vsel %vm325_vm4, %v1541_v36, %v2779_v40  ;;  %v2799_v55 = vunpack.i.h.bf16 %v2797_v7 }
 0x30a   :  { %v2794_v12 = vunpack.i.h.bf16 %v2792_v38  ;;  %v2793_v15 = vunpack.i.l.bf16 %v2792_v38  ;;  %v2744_v7 = vunpack.i.h.bf16 %v4255_v63  ;;  %v2748_v40 = vunpack.i.l.bf16 %v4281_v0 }
 0x30b   :  { %v707_v9 = vsel %vm329_vm6, %v4657_v16, %v2798_v20  ;;  %v763_v39 = vsel %vm325_vm4, %v762_v42, %v2783_v60 }
 0x30c   :  { %v1480_v21 = vsel %vm331_vm7, %v1479_v27, %v2793_v15  ;;  %v1543_v45 = vsel %vm327_vm5, %v1542_v8, %v2794_v12  ;;  %v2802_v10 = vpop.permute.xlu0 %2801 }
 0x30d   :  { %v1696_v35 = vrot.slane %v1480_v21, 3  ;;  %v2807_v43 = vpop.permute.xlu1 %2806  ;;  %v1544_v57 = vsel %vm329_vm6, %v1543_v45, %v2799_v55  ;;  %v2804_v41 = vunpack.i.h.bf16 %v2802_v10  ;;  %v2803_v19 = vunpack.i.l.bf16 %v2802_v10 }
 0x30e   :  { %v2809_v54 = vunpack.i.h.bf16 %v2807_v43  ;;  %v2808_v11 = vunpack.i.l.bf16 %v2807_v43  ;;  %v829_v43 = vsel %vm327_vm5, %v4314_v23, %v2743_v1 }
 0x30f   :  { %v1720_v3 = vsel %vm886_vm12, %v4159_v31, %v1696_v35  ;;  %v1655_v31 = vsel %vm319_vm1, %v2714_v17, %v2789_v28  ;;  %v764_v12 = vsel %vm327_vm5, %v763_v39, %v2803_v19  ;;  %v1666_v28 = vsel %vm327_vm5, %v4320_v32, %v2744_v7 }
 0x310   :  { %v708_v61 = vsel %vm331_vm7, %v707_v9, %v2808_v11  ;;  %v1545_v37 = vsel %vm331_vm7, %v1544_v57, %v2809_v54  ;;  %v2812_v30 = vpop.permute.xlu0 %2811  ;;  %v1722_v29 = vsel %vm889_vm13, %v1720_v3, %v1702_v53  ;;  %v1656_v63 = vsel %vm321_vm2, %v1655_v31, %v3700_v49 }
 0x311   :  { %v864_v4 = vrot.slane %v708_v61, 2  ;;  %v1701_v6 = vrot.slane %v1545_v37, 2  ;;  %v2832_v26 = vpop.permute.xlu1 %2831  ;;  %v4356_v2 = vsel %vm892_vm14, %v1722_v29, %v1708_v62  ;;  %v2814_v50 = vunpack.i.h.bf16 %v2812_v30 }
 0x312   :  { %v2813_v58 = vunpack.i.l.bf16 %v2812_v30  ;;  %v2834_v8 = vunpack.i.h.bf16 %v2832_v26  ;;  %v2833_v17 = vunpack.i.l.bf16 %v2832_v26  ;;  %v830_v11 = vsel %vm329_vm6, %v829_v43, %v2748_v40 }
 0x313   :  { %v890_v34 = vsel %vm889_vm13, %v4129_v25, %v864_v4  ;;  %v1721_v36 = vsel %vm889_vm13, %v4268_v14, %v1701_v6  ;;  %v1600_v25 = vsel %vm325_vm4, %v1599_v33, %v2784_v24  ;;  %v819_v14 = vsel %vm321_vm2, %v818_v13, %v3399_v18 }
 0x314   :  { %v2817_v5 = vpop.permute.xlu0 %2816  ;;  %v1601_v15 = vsel %vm327_vm5, %v1600_v25, %v2804_v41  ;;  %v765_v20 = vsel %vm329_vm6, %v764_v12, %v2813_v58  ;;  %v1667_v42 = vsel %vm329_vm6, %v1666_v28, %v2749_v48  ;;  %vm1739_vm2 = vcmask 72704  }
 0x315   :  { %v2819_v52 = vunpack.i.h.bf16 %v2817_v5  ;;  %v2818_v38 = vunpack.i.l.bf16 %v2817_v5  ;;  %v2837_v46 = vpop.permute.xlu1 %2836  ;;  %v1602_v27 = vsel %vm329_vm6, %v1601_v15, %v2814_v50 }
 0x316   :  { %v2839_v21 = vunpack.i.h.bf16 %v2837_v46  ;;  %v2838_v18 = vunpack.i.l.bf16 %v2837_v46 }
 0x317   :  { %v820_v59 = vsel %vm323_vm3, %v819_v14, %v2818_v38  ;;  %v1657_v0 = vsel %vm323_vm3, %v1656_v63, %v2819_v52 }
 0x318   :  { %v2822_v53 = vpop.permute.xlu0 %2821  ;;  %v821_v44 = vsel %vm325_vm4, %v820_v59, %v2833_v17  ;;  %v1658_v51 = vsel %vm325_vm4, %v1657_v0, %v2834_v8 }
 0x319   :  { %v2824_v45 = vunpack.i.h.bf16 %v2822_v53  ;;  %v2823_v10 = vunpack.i.l.bf16 %v2822_v53  ;;  %v2842_v49 = vpop.permute.xlu1 %2841  ;;  %v822_v57 = vsel %vm327_vm5, %v821_v44, %v2838_v18  ;;  %v1659_v62 = vsel %vm327_vm5, %v1658_v51, %v2839_v21  ;;  %v1920_v44 = vld [vmem:[%s4434_s5] sm:$0xff] }
 0x31a   :  { %v2844_v55 = vunpack.i.h.bf16 %v2842_v49  ;;  %v2843_v35 = vunpack.i.l.bf16 %v2842_v49 }
 0x31b   :  { %v766_v22 = vsel %vm331_vm7, %v765_v20, %v2823_v10  ;;  %v1603_v54 = vsel %vm331_vm7, %v1602_v27, %v2824_v45 }
 0x31c   :  { %v870_v16 = vrot.slane %v766_v22, 1  ;;  %v1707_v9 = vrot.slane %v1603_v54, 1  ;;  %v2827_v3 = vpop.permute.xlu0 %2826  ;;  %v823_v32 = vsel %vm329_vm6, %v822_v57, %v2843_v35  ;;  %v1660_v30 = vsel %vm329_vm6, %v1659_v62, %v2844_v55 }
 0x31d   :  { %v2829_v61 = vunpack.i.h.bf16 %v2827_v3  ;;  %v2828_v23 = vunpack.i.l.bf16 %v2827_v3  ;;  %v2847_v37 = vpop.permute.xlu1 %2846 }
 0x31e   :  { %v2849_v29 = vunpack.i.h.bf16 %v2847_v37  ;;  %v2848_v33 = vunpack.i.l.bf16 %v2847_v37  ;;  %v893_v6 = vsel %vm892_vm14, %v890_v34, %v870_v16  ;;  %v1723_v26 = vsel %vm892_vm14, %v1721_v36, %v1707_v9  ;;  %v1725_v34 = vld [vmem:[%s4433_s3] sm:$0xff] }
 0x31f   :  { %v831_v24 = vsel %vm331_vm7, %v830_v11, %v2828_v23  ;;  %v1668_v4 = vsel %vm331_vm7, %v1667_v42, %v2829_v61 }
 0x320   :  { %v2190_v60 = vpack.c.bf16 %v831_v24, %v4222_v56  ;;  %v2196_v31 = vpack.c.bf16 %v1668_v4, %v4356_v2  ;;  %v824_v13 = vsel %vm331_vm7, %v823_v32, %v2848_v33  ;;  %v1661_v41 = vsel %vm331_vm7, %v1660_v30, %v2849_v29  ;;  %v1726_v56 = vld [vmem:[%s4433_s3 + $0x8] sm:$0xff] }
 0x321   :  { %v2193_v19 = vpack.c.bf16 %v824_v13, %v893_v6  ;;  %v2199_v7 = vpack.c.bf16 %v1661_v41, %v1723_v26 }
 0x322   :  { %2192 = vmatprep.subr.msk.bf16.mxu0 %vm2191_vm0, %v2190_v60  ;;  %2198 = vmatprep.subr.msk.bf16.mxu1 %vm2191_vm0, %v2196_v31 }
 0x323   :  { %2195 = vmatpush1.bf16.msk.msra.mxu0 %vm2191_vm0, %v2193_v19  ;;  %2201 = vmatpush1.bf16.msk.msra.mxu1 %vm2191_vm0, %v2199_v7 }
 0x326   :  { %2108 = vmatmul.mubr.msk.f32.vlgmr.msra.gmra.mrb[12].mxu0 %vm1739_vm2, %v1725_v34  ;;  %2112 = vmatmul.mubr.msk.f32.vlgmr.msra.gmra.mrb[12].mxu1 %vm1739_vm2, %v1725_v34 }
 0x327   :  { %1828 = vmatprep.mubr.f32.mxu0 %v2859_v47  ;;  %1905 = vmatprep.mubr.f32.mxu1 %v2859_v47 }
 0x32a   :  { %2109 = vmatmul.mubr.msk.f32.gmra.mrb[14].mxu0 %vm1739_vm2, %v1726_v56  ;;  %2113 = vmatmul.mubr.msk.f32.gmra.mrb[14].mxu1 %vm1739_vm2, %v1726_v56 }
 0x32b   :  { %1994 = vmatprep.mubr.f32.mxu0 %v2859_v47  ;;  %2065 = vmatprep.mubr.f32.mxu1 %v2859_v47 }
 0x32d   :  { %v1732_v2 = vpop.permute.xlu0 %1731 }
 0x32e   :  { %v1737_v40 = vpop.permute.xlu1 %1736 }
 0x332   :  { %v1925_v51 = vpop.permute.xlu1 %1924 }
 0x3f9   :  { %v1824_v36 = vpop.f32.mrb[12].mxu0  ;;  %v1901_v1 = vpop.f32.mrb[12].mxu1 }
 0x3fa   :  { %v1826_v50 = vpop.f32.mrb[13].mxu0  ;;  %v1903_v58 = vpop.f32.mrb[13].mxu1  ;;  %v1825_v5 = vadd.f32 %v1824_v36, %v1732_v2  ;;  %v1902_v48 = vadd.f32 %v1901_v1, %v1732_v2 }
 0x3fb   :  { %v1827_v52 = vadd.f32 %v1826_v50, %v1732_v2  ;;  %v1904_v38 = vadd.f32 %v1903_v58, %v1732_v2 }
 0x3fc   :  { %v1912_v0 = vmax.f32 %v1825_v5, 0.0  ;;  %v1914_v47 = vmax.f32 %v1902_v48, 0.0 }
 0x3fd   :  { %v1830_v46 = vpop.f32.mrb[14].mxu0  ;;  %v1907_v39 = vpop.f32.mrb[14].mxu1  ;;  %v1913_v8 = vmax.f32 %v1827_v52, 0.0  ;;  %v1915_v17 = vmax.f32 %v1904_v38, 0.0 }
 0x3fe   :  { %v1831_v25 = vadd.f32 %v1830_v46, %v1737_v40  ;;  %v1908_v14 = vadd.f32 %v1907_v39, %v1737_v40  ;;  %v1832_v63 = vpop.f32.mrb[15].mxu0  ;;  %v1909_v12 = vpop.f32.mrb[15].mxu1 }
 0x3ff   :  { %v1833_v15 = vadd.f32 %v1832_v63, %v1737_v40  ;;  %v1910_v59 = vadd.f32 %v1909_v12, %v1737_v40 }
 0x400   :  { %v1916_v20 = vmax.f32 %v1831_v25, 0.0  ;;  %v1918_v27 = vmax.f32 %v1908_v14, 0.0 }
 0x401   :  { %v1917_v53 = vmax.f32 %v1833_v15, 0.0  ;;  %v1919_v21 = vmax.f32 %v1910_v59, 0.0 }
 0x402   :  { %v2204_v18 = vpack.c.bf16 %v1916_v20, %v1912_v0  ;;  %v2208_v45 = vpack.c.bf16 %v1918_v27, %v1914_v47 }
 0x403   :  { %v2202_v10 = vpack.c.bf16 %v1917_v53, %v1913_v8  ;;  %v2206_v49 = vpack.c.bf16 %v1919_v21, %v1915_v17 }
 0x405   :  { %2203 = vmatprep.subr.bf16.mxu0 %v2202_v10  ;;  %2207 = vmatprep.subr.bf16.mxu1 %v2206_v49 }
 0x406   :  { %2205 = vmatpush1.bf16.msra.mxu0 %v2204_v18  ;;  %2209 = vmatpush1.bf16.msra.mxu1 %v2208_v45 }
 0x409   :  { %2114 = vmatmul.mubr.msk.f32.vlgmr.msra.gmra.mrb[16].mxu0 %vm319_vm1, %v1920_v44  ;;  %2115 = vmatmul.mubr.msk.f32.vlgmr.msra.gmra.mrb[16].mxu1 %vm319_vm1, %v1920_v44 }
 0x4dc   :  { %v1996_v55 = vpop.f32.mrb[16].mxu0  ;;  %v2067_v35 = vpop.f32.mrb[16].mxu1 }
 0x4dd   :  { %v1997_v43 = vadd.f32 %v1996_v55, %v1925_v51  ;;  %v2068_v28 = vadd.f32 %v2067_v35, %v1925_v51  ;;  %v1998_v22 = vpop.f32.mrb[17].mxu0  ;;  %v2069_v54 = vpop.f32.mrb[17].mxu1 }
 0x4de   :  { %v1999_v11 = vadd.f32 %v1998_v22, %v1925_v51  ;;  %v2070_v42 = vadd.f32 %v2069_v54, %v1925_v51 }
 0x4df   :  { %2072 = vst [vmem:[%s4435_s7] sm:$0xff] %v1997_v43  ;;  %2116 = vst [vmem:[%s4435_s7 + $0x10] sm:$0xff] %v2068_v28 }
 0x4e0   :  { %2073 = vst [vmem:[%s4435_s7 + $0x8] sm:$0xff] %v1999_v11  ;;  %2117 = vst [vmem:[%s4435_s7 + $0x18] sm:$0xff] %v2070_v42 }

</bundles_post_ra>
